<compile_context>
chip_gen: v6e
topology: v6e:2x2x1
jax: 0.10.0
libtpu: 0.0.40
codegen_flags: <defaults>
</compile_context>

<pallas_src>
import functools

import jax
import jax.numpy as jnp
from jax.experimental import pallas as pl
from jax.experimental.pallas import tpu as pltpu


# ----------------------------- fused Pallas kernel -----------------------------

def _encoder_kernel(*refs, num_layers, contexts, dilations, t_valid, matmul_dtype):
    """Fused forward: TDNN stack -> masked stats pooling -> seg1 -> seg2.

    refs layout (inputs then outputs):
      refs[0]                       : x_framed (bb, T_pad, K0)
      refs[1 + 2*i], refs[2 + 2*i]  : W_i, b_i  (C_i*D_in_i, D_out_i), (1, D_out_i)
      refs[1+2L .. 4+2L]            : W_s1, b_s1, W_s2, b_s2
      refs[-1]                      : out       (bb, 1, seg_dim)
    """
    x_ref = refs[0]
    layer_refs = [(refs[1 + 2 * i], refs[2 + 2 * i]) for i in range(num_layers)]
    ws1_ref, bs1_ref, ws2_ref, bs2_ref = refs[1 + 2 * num_layers: 5 + 2 * num_layers]
    o_ref = refs[-1]

    bb, t_pad, d_in0 = x_ref.shape
    m = bb * t_pad

    # Flatten batch*time ONCE; t_pad is a multiple of 8 so this collapse is layout-free.
    # Every layer keeps this same tall, 8-aligned M.
    hf = x_ref[...].reshape(m, d_in0)

    # ---- TDNN stack: dilated context taps -> Linear -> ReLU, per layer ----
    for i, (w_ref, b_ref) in enumerate(layer_refs):
        c, dil = contexts[i], dilations[i]
        d_in = hf.shape[1]
        d_out = w_ref.shape[1]
        w = w_ref[...]                                    # already matmul_dtype (bf16)
        hb = hf.astype(matmul_dtype)                      # cast once per layer, at the dot

        # Bias hoisted into the f32 accumulator init (off the post-matmul VPU path).
        acc = jnp.broadcast_to(b_ref[...], (m, d_out)).astype(jnp.float32)

        # Context taps are shifted views of the SAME tall flat operand.  Rows whose
        # context window runs past the valid frames (incl. cross-batch rows in the
        # flat view) are garbage, but they are exactly the tail rows masked out of
        # the pooling below, so they never influence the output.
        span = (c - 1) * dil
        hpad = hb if span == 0 else jnp.concatenate(
            [hb, jnp.zeros((span, d_in), hb.dtype)], axis=0)
        for cc in range(c):
            k = cc * dil
            xs = hpad[k:k + m, :]
            acc = acc + jnp.dot(xs, w[cc * d_in:(cc + 1) * d_in, :],
                                preferred_element_type=jnp.float32)

        hf = jnp.maximum(acc, 0.0)                        # ReLU kept in f32

    # ---- masked statistics pooling (mean + unbiased std, torch.std default) ----
    d = hf.shape[1]
    h = hf.reshape(bb, t_pad, d)                          # free: t_pad % 8 == 0
    t_idx = jax.lax.broadcasted_iota(jnp.int32, (1, t_pad, 1), 1)
    valid = t_idx < t_valid                               # static t_valid
    hm = jnp.where(valid, h, 0.0)
    mean = jnp.sum(hm, axis=1) * (1.0 / t_valid)                        # (bb, d)
    centered = jnp.where(valid, h - mean[:, None, :], 0.0)
    var = jnp.sum(centered * centered, axis=1) * (1.0 / (t_valid - 1))  # unbiased
    std = jnp.sqrt(var)

    # ---- segment_layer1 + segment_layer2 (no nonlinearity, as in the reference) ----
    # W_s1 split into its mean-half and std-half to avoid a lane concat of (mean,std).
    w1 = ws1_ref[...]
    h1 = (jnp.dot(mean.astype(matmul_dtype), w1[:d, :], preferred_element_type=jnp.float32)
          + jnp.dot(std.astype(matmul_dtype), w1[d:, :], preferred_element_type=jnp.float32)
          + bs1_ref[...])
    h2 = (jnp.dot(h1.astype(matmul_dtype), ws2_ref[...], preferred_element_type=jnp.float32)
          + bs2_ref[...])
    o_ref[...] = h2[:, None, :].astype(o_ref.dtype)       # (bb, 1, seg_dim)


# ----------------------------- wrapper -----------------------------

def _num_tensorcores_per_chip():
    try:
        kind = jax.devices()[0].device_kind.lower()
    except Exception:
        return 1
    return 2 if "v7" in kind else 1


def encoder_forward(x, params, context_sizes, dilations, *,
                    batch_block=None, matmul_dtype=jnp.bfloat16):
    B, T, D_in = x.shape
    num_layers = len(context_sizes)
    seg_dim = params["seg2"][0].shape[1]
    widths = [w.shape[1] for w, _ in params["tdnn"]]

    # valid frame count after the whole TDNN stack (original module semantics)
    t_valid = T - sum((c - 1) * d for c, d in zip(context_sizes, dilations))
    assert t_valid >= 2, "need >= 2 valid frames for the unbiased std"

    # ---- pre-frame the tiny-K first layer in plain XLA (single K=c0*D_in matmul) ----
    c0, dil0 = context_sizes[0], dilations[0]
    t0 = T - (c0 - 1) * dil0
    if c0 > 1:
        x_in = jnp.concatenate(
            [x[:, i * dil0:i * dil0 + t0, :] for i in range(c0)], axis=-1)
    else:
        x_in = x
    k0 = c0 * D_in
    kernel_contexts = (1,) + tuple(context_sizes[1:])
    kernel_dilations = (1,) + tuple(dilations[1:])

    # ---- pad time to a multiple of 8 (pad rows are masked out of pooling) ----
    t_pad = -(-t0 // 8) * 8
    if t_pad != t0:
        x_in = jnp.pad(x_in, ((0, 0), (0, t_pad - t0), (0, 0)))
    x_in = x_in.astype(matmul_dtype)

    # ---- cast weights to the matmul dtype once (halves weight DMA/VMEM); biases f32 ----
    tdnn_p = [(w.astype(matmul_dtype), b.astype(jnp.float32)) for w, b in params["tdnn"]]
    seg_p = [(params[n][0].astype(matmul_dtype), params[n][1].astype(jnp.float32))
             for n in ("seg1", "seg2")]
    weight_bytes = sum(w.size * w.dtype.itemsize + b.size * 4 for w, b in tdnn_p + seg_p)

    # ---- batch tile: as big as a conservative VMEM budget allows; keep >= 2 grid
    #      steps on 2-TensorCore parts (v7x) so "parallel" shards across cores ----
    d_max = max([k0] + widths)

    def vmem_est(bb):
        act = bb * t_pad * d_max * 4 * 4            # a few live f32/bf16 activation copies
        io = bb * t_pad * k0 * x_in.dtype.itemsize * 2 + bb * seg_dim * 4 * 2
        return act + io + 2 * weight_bytes

    if batch_block is None:
        budget = 20 * 1024 * 1024                   # stays under v7x's 32 MiB default scoped VMEM
        min_steps = min(_num_tensorcores_per_chip(), B)
        cands = [d for d in range(1, B + 1) if B % d == 0 and B // d >= min_steps]
        fitting = [d for d in cands if vmem_est(d) <= budget]
        bb = max(fitting) if fitting else min(cands)
    else:
        bb = batch_block
    assert B % bb == 0, f"batch_block {bb} must divide batch {B}"
    grid = (B // bb,)

    kernel = functools.partial(
        _encoder_kernel, num_layers=num_layers, contexts=kernel_contexts,
        dilations=kernel_dilations, t_valid=t_valid, matmul_dtype=matmul_dtype)

    # ---- cost hint for XLA's scheduler around the fused call ----
    flops = 0
    d_prev = k0
    for i in range(num_layers):
        flops += 2 * B * t_pad * kernel_contexts[i] * d_prev * widths[i]
        d_prev = widths[i]
    flops += 2 * B * (2 * d_prev * seg_dim + seg_dim * seg_dim)
    bytes_accessed = int(x_in.size * x_in.dtype.itemsize + weight_bytes + B * seg_dim * 4)
    try:
        cost = pl.CostEstimate(flops=int(flops), transcendentals=int(B * d_prev),
                               bytes_accessed=bytes_accessed)
    except Exception:
        cost = None

    def build(single_buffer_weights, with_cost):
        def wspec(shape):
            idx = lambda b: (0,) * len(shape)
            if single_buffer_weights:
                # block is constant across the grid -> no need to double-buffer
                return pl.BlockSpec(shape, idx, pipeline_mode=pl.Buffered(1))
            return pl.BlockSpec(shape, idx)

        flat_inputs = [x_in]
        in_specs = [pl.BlockSpec((bb, t_pad, k0), lambda b: (b, 0, 0))]
        for w, bias in tdnn_p + seg_p:
            flat_inputs += [w, bias]
            in_specs += [wspec(w.shape), wspec(bias.shape)]

        call = pl.pallas_call(
            kernel,
            out_shape=jax.ShapeDtypeStruct((B, 1, seg_dim), jnp.float32),
            grid=grid,
            in_specs=in_specs,
            out_specs=pl.BlockSpec((bb, 1, seg_dim), lambda b: (b, 0, 0)),
            compiler_params=pltpu.CompilerParams(
                dimension_semantics=("parallel",)),
            cost_estimate=(cost if with_cost else None),
        )
        return call, flat_inputs

    out = None
    last_exc = None
    for single_buf, with_cost in ((True, True), (False, True), (False, False)):
        try:
            call, flat_inputs = build(single_buf, with_cost)
            out = call(*flat_inputs)
            break
        except Exception as e:        # version-dependent fallbacks (Buffered / cost_estimate)
            last_exc = e
            out = None
    if out is None:
        raise last_exc
    return out.reshape(B, seg_dim)


# ----------------------------- pure-JAX reference -----------------------------

def encoder_reference(x, params, context_sizes, dilations, matmul_dtype=jnp.bfloat16):
    def mm(a, w):
        return jax.lax.dot_general(
            a.astype(matmul_dtype), w.astype(matmul_dtype),
            dimension_numbers=(((a.ndim - 1,), (0,)), ((), ())),
            preferred_element_type=jnp.float32)

    h = x
    for (w, b), c, dil in zip(params["tdnn"], context_sizes, dilations):
        t_out = h.shape[1] - (c - 1) * dil
        framed = jnp.concatenate(
            [h[:, i * dil:i * dil + t_out, :] for i in range(c)], axis=-1)
        h = jax.nn.relu(mm(framed, w) + b)
    t = h.shape[1]
    mean = jnp.mean(h, axis=1)
    std = jnp.sqrt(jnp.sum((h - mean[:, None, :]) ** 2, axis=1) / (t - 1))
    pooled = jnp.concatenate([mean, std], axis=-1)
    w1, b1 = params["seg1"]
    w2, b2 = params["seg2"]
    return mm(mm(pooled, w1) + b1, w2) + b2


# ----------------------------- parameter init -----------------------------

def _init_linear(key, fan_in, fan_out):
    """Deterministic PyTorch-Linear-like init; weight stored as (in, out)."""
    kw, kb = jax.random.split(key)
    bound = 1.0 / jnp.sqrt(jnp.float32(fan_in))
    w = jax.random.uniform(kw, (fan_in, fan_out), jnp.float32, -bound, bound)
    b = jax.random.uniform(kb, (1, fan_out), jnp.float32, -bound, bound)
    return w, b


def make_params(key, num_frames, context_sizes, input_dim, output_dim,
                hidden_dim, segment_layer_dim):
    keys = jax.random.split(key, num_frames + 2)
    tdnn = []
    for i in range(num_frames):
        d_in = input_dim if i == 0 else hidden_dim
        d_out = hidden_dim if i < num_frames - 1 else output_dim
        tdnn.append(_init_linear(keys[i], context_sizes[i] * d_in, d_out))
    seg1 = _init_linear(keys[num_frames], output_dim * 2, segment_layer_dim)
    seg2 = _init_linear(keys[num_frames + 1], segment_layer_dim, segment_layer_dim)
    return {"tdnn": tdnn, "seg1": seg1, "seg2": seg2}


# ----------------------------- main -----------------------------

if __name__ == "__main__":
    # Small but lane-dense shapes (hidden/output/segment dims = 128 fill vregs).
    num_frames = 3
    context_sizes = (3, 3, 1)
    dilations = (1, 2, 1)
    input_dim = 16
    hidden_dim = 128
    output_dim = 128
    segment_layer_dim = 128
    batch, seq_len = 4, 32

    key = jax.random.PRNGKey(0)
    kx, kp = jax.random.split(key)
    x = jax.random.normal(kx, (batch, seq_len, input_dim), jnp.float32)
    params = make_params(kp, num_frames, context_sizes, input_dim, output_dim,
                         hidden_dim, segment_layer_dim)

    out = encoder_forward(x, params, context_sizes, dilations)
    out = jax.block_until_ready(out)
    assert out.shape == (batch, segment_layer_dim), out.shape
    assert bool(jnp.all(jnp.isfinite(out)))

    # apples-to-apples reference (same bf16 matmul-operand rounding, f32 accumulate)
    ref = encoder_reference(x, params, context_sizes, dilations,
                            matmul_dtype=jnp.bfloat16)
    err = float(jnp.max(jnp.abs(out - ref)))
    assert jnp.allclose(out, ref, rtol=5e-3, atol=5e-3), f"max abs err {err}"

    print("KERNEL_OK")
</pallas_src>

<mosaic_0001>
module attributes {stable_mosaic.version = 11 : i64} {
  func.func @_encoder_kernel(%arg0: i32, %arg1: memref<4x32x48xbf16, #tpu.memory_space<vmem>>, %arg2: memref<48x128xbf16, #tpu.memory_space<vmem>>, %arg3: memref<1x128xf32, #tpu.memory_space<vmem>>, %arg4: memref<384x128xbf16, #tpu.memory_space<vmem>>, %arg5: memref<1x128xf32, #tpu.memory_space<vmem>>, %arg6: memref<128x128xbf16, #tpu.memory_space<vmem>>, %arg7: memref<1x128xf32, #tpu.memory_space<vmem>>, %arg8: memref<256x128xbf16, #tpu.memory_space<vmem>>, %arg9: memref<1x128xf32, #tpu.memory_space<vmem>>, %arg10: memref<128x128xbf16, #tpu.memory_space<vmem>>, %arg11: memref<1x128xf32, #tpu.memory_space<vmem>>, %arg12: memref<4x1x128xf32, #tpu.memory_space<vmem>>) attributes {dimension_semantics = [#tpu.dimension_semantics<parallel>], iteration_bounds = array<i64: 1>, scalar_prefetch = 0 : i64, scratch_operands = 0 : i64, tpu.core_type = #tpu.core_type<tc>, window_params = [{transform_indices = @transform_0, window_bounds = array<i64: 4, 32, 48>}, {pipeline_mode = #tpu.pipeline_mode<synchronous>, transform_indices = @transform_1, window_bounds = array<i64: 48, 128>}, {pipeline_mode = #tpu.pipeline_mode<synchronous>, transform_indices = @transform_2, window_bounds = array<i64: 1, 128>}, {pipeline_mode = #tpu.pipeline_mode<synchronous>, transform_indices = @transform_3, window_bounds = array<i64: 384, 128>}, {pipeline_mode = #tpu.pipeline_mode<synchronous>, transform_indices = @transform_4, window_bounds = array<i64: 1, 128>}, {pipeline_mode = #tpu.pipeline_mode<synchronous>, transform_indices = @transform_5, window_bounds = array<i64: 128, 128>}, {pipeline_mode = #tpu.pipeline_mode<synchronous>, transform_indices = @transform_6, window_bounds = array<i64: 1, 128>}, {pipeline_mode = #tpu.pipeline_mode<synchronous>, transform_indices = @transform_7, window_bounds = array<i64: 256, 128>}, {pipeline_mode = #tpu.pipeline_mode<synchronous>, transform_indices = @transform_8, window_bounds = array<i64: 1, 128>}, {pipeline_mode = #tpu.pipeline_mode<synchronous>, transform_indices = @transform_9, window_bounds = array<i64: 128, 128>}, {pipeline_mode = #tpu.pipeline_mode<synchronous>, transform_indices = @transform_10, window_bounds = array<i64: 1, 128>}, {transform_indices = @transform_11, window_bounds = array<i64: 4, 1, 128>}]} {
    %c0 = arith.constant 0 : index
    %c0_0 = arith.constant 0 : index
    %c0_1 = arith.constant 0 : index
    %0 = vector.load %arg1[%c0, %c0_0, %c0_1] : memref<4x32x48xbf16, #tpu.memory_space<vmem>>, vector<4x32x48xbf16>
    %1 = vector.shape_cast %0 : vector<4x32x48xbf16> to vector<128x48xbf16>
    %c0_2 = arith.constant 0 : index
    %c0_3 = arith.constant 0 : index
    %2 = vector.load %arg2[%c0_2, %c0_3] : memref<48x128xbf16, #tpu.memory_space<vmem>>, vector<48x128xbf16>
    %c0_4 = arith.constant 0 : index
    %c0_5 = arith.constant 0 : index
    %3 = vector.load %arg3[%c0_4, %c0_5] : memref<1x128xf32, #tpu.memory_space<vmem>>, vector<1x128xf32>
    %4 = vector.shape_cast %3 : vector<1x128xf32> to vector<1x128xf32>
    %5 = vector.broadcast %4 : vector<1x128xf32> to vector<128x128xf32>
    %cst = arith.constant dense<0.000000e+00> : vector<128x128xf32>
    %6 = tpu.matmul %1, %2, %cst {dimension_numbers = #tpu.dot_dimension_numbers<[1], [0], [0], [1], [0, 0, 1, 1], [], []>} : vector<128x48xbf16>, vector<48x128xbf16>, vector<128x128xf32> -> vector<128x128xf32>
    %7 = arith.addf %5, %6 : vector<128x128xf32>
    %cst_6 = arith.constant 0.000000e+00 : f32
    %8 = vector.broadcast %cst_6 : f32 to vector<128x128xf32>
    %9 = arith.maximumf %7, %8 : vector<128x128xf32>
    %c0_7 = arith.constant 0 : index
    %c0_8 = arith.constant 0 : index
    %10 = vector.load %arg4[%c0_7, %c0_8] : memref<384x128xbf16, #tpu.memory_space<vmem>>, vector<384x128xbf16>
    %11 = arith.truncf %9 : vector<128x128xf32> to vector<128x128xbf16>
    %c0_9 = arith.constant 0 : index
    %c0_10 = arith.constant 0 : index
    %12 = vector.load %arg5[%c0_9, %c0_10] : memref<1x128xf32, #tpu.memory_space<vmem>>, vector<1x128xf32>
    %13 = vector.shape_cast %12 : vector<1x128xf32> to vector<1x128xf32>
    %14 = vector.broadcast %13 : vector<1x128xf32> to vector<128x128xf32>
    %cst_11 = arith.constant 0.000000e+00 : bf16
    %15 = vector.broadcast %cst_11 : bf16 to vector<4x128xbf16>
    %16 = tpu.concatenate %11, %15 in 0 : vector<128x128xbf16>, vector<4x128xbf16> -> vector<132x128xbf16>
    %17 = vector.extract_strided_slice %16 {offsets = [0, 0], sizes = [128, 128], strides = [1, 1]} : vector<132x128xbf16> to vector<128x128xbf16>
    %18 = vector.extract_strided_slice %10 {offsets = [0, 0], sizes = [128, 128], strides = [1, 1]} : vector<384x128xbf16> to vector<128x128xbf16>
    %cst_12 = arith.constant dense<0.000000e+00> : vector<128x128xf32>
    %19 = tpu.matmul %17, %18, %cst_12 {dimension_numbers = #tpu.dot_dimension_numbers<[1], [0], [0], [1], [0, 0, 1, 1], [], []>} : vector<128x128xbf16>, vector<128x128xbf16>, vector<128x128xf32> -> vector<128x128xf32>
    %20 = arith.addf %14, %19 : vector<128x128xf32>
    %21 = vector.extract_strided_slice %16 {offsets = [2, 0], sizes = [128, 128], strides = [1, 1]} : vector<132x128xbf16> to vector<128x128xbf16>
    %22 = vector.extract_strided_slice %10 {offsets = [128, 0], sizes = [128, 128], strides = [1, 1]} : vector<384x128xbf16> to vector<128x128xbf16>
    %cst_13 = arith.constant dense<0.000000e+00> : vector<128x128xf32>
    %23 = tpu.matmul %21, %22, %cst_13 {dimension_numbers = #tpu.dot_dimension_numbers<[1], [0], [0], [1], [0, 0, 1, 1], [], []>} : vector<128x128xbf16>, vector<128x128xbf16>, vector<128x128xf32> -> vector<128x128xf32>
    %24 = arith.addf %20, %23 : vector<128x128xf32>
    %25 = vector.extract_strided_slice %16 {offsets = [4, 0], sizes = [128, 128], strides = [1, 1]} : vector<132x128xbf16> to vector<128x128xbf16>
    %26 = vector.extract_strided_slice %10 {offsets = [256, 0], sizes = [128, 128], strides = [1, 1]} : vector<384x128xbf16> to vector<128x128xbf16>
    %cst_14 = arith.constant dense<0.000000e+00> : vector<128x128xf32>
    %27 = tpu.matmul %25, %26, %cst_14 {dimension_numbers = #tpu.dot_dimension_numbers<[1], [0], [0], [1], [0, 0, 1, 1], [], []>} : vector<128x128xbf16>, vector<128x128xbf16>, vector<128x128xf32> -> vector<128x128xf32>
    %28 = arith.addf %24, %27 : vector<128x128xf32>
    %cst_15 = arith.constant 0.000000e+00 : f32
    %29 = vector.broadcast %cst_15 : f32 to vector<128x128xf32>
    %30 = arith.maximumf %28, %29 : vector<128x128xf32>
    %c0_16 = arith.constant 0 : index
    %c0_17 = arith.constant 0 : index
    %31 = vector.load %arg6[%c0_16, %c0_17] : memref<128x128xbf16, #tpu.memory_space<vmem>>, vector<128x128xbf16>
    %32 = arith.truncf %30 : vector<128x128xf32> to vector<128x128xbf16>
    %c0_18 = arith.constant 0 : index
    %c0_19 = arith.constant 0 : index
    %33 = vector.load %arg7[%c0_18, %c0_19] : memref<1x128xf32, #tpu.memory_space<vmem>>, vector<1x128xf32>
    %34 = vector.shape_cast %33 : vector<1x128xf32> to vector<1x128xf32>
    %35 = vector.broadcast %34 : vector<1x128xf32> to vector<128x128xf32>
    %cst_20 = arith.constant dense<0.000000e+00> : vector<128x128xf32>
    %36 = tpu.matmul %32, %31, %cst_20 {dimension_numbers = #tpu.dot_dimension_numbers<[1], [0], [0], [1], [0, 0, 1, 1], [], []>} : vector<128x128xbf16>, vector<128x128xbf16>, vector<128x128xf32> -> vector<128x128xf32>
    %37 = arith.addf %35, %36 : vector<128x128xf32>
    %cst_21 = arith.constant 0.000000e+00 : f32
    %38 = vector.broadcast %cst_21 : f32 to vector<128x128xf32>
    %39 = arith.maximumf %37, %38 : vector<128x128xf32>
    %40 = vector.shape_cast %39 : vector<128x128xf32> to vector<4x32x128xf32>
    %41 = tpu.iota {dimensions = array<i32: 1>} : vector<1x32x1xi32>
    %c26_i32 = arith.constant 26 : i32
    %42 = vector.broadcast %c26_i32 : i32 to vector<1x32x1xi32>
    %43 = arith.cmpi slt, %41, %42 : vector<1x32x1xi32>
    %cst_22 = arith.constant 0.000000e+00 : f32
    %44 = vector.shape_cast %43 : vector<1x32x1xi1> to vector<1x32x1xi1>
    %45 = vector.broadcast %44 : vector<1x32x1xi1> to vector<4x32x128xi1>
    %46 = vector.broadcast %cst_22 : f32 to vector<4x32x128xf32>
    %47 = arith.select %45, %40, %46 : vector<4x32x128xi1>, vector<4x32x128xf32>
    %cst_23 = arith.constant dense<0.000000e+00> : vector<4x128xf32>
    %48 = vector.multi_reduction <add>, %47, %cst_23 [1] : vector<4x32x128xf32> to vector<4x128xf32>
    %cst_24 = arith.constant 0.0384615399 : f32
    %49 = vector.broadcast %cst_24 : f32 to vector<4x128xf32>
    %50 = arith.mulf %48, %49 : vector<4x128xf32>
    %51 = vector.shape_cast %50 : vector<4x128xf32> to vector<4x1x128xf32>
    %52 = vector.broadcast %51 : vector<4x1x128xf32> to vector<4x32x128xf32>
    %53 = arith.subf %40, %52 : vector<4x32x128xf32>
    %cst_25 = arith.constant 0.000000e+00 : f32
    %54 = vector.shape_cast %43 : vector<1x32x1xi1> to vector<1x32x1xi1>
    %55 = vector.broadcast %54 : vector<1x32x1xi1> to vector<4x32x128xi1>
    %56 = vector.broadcast %cst_25 : f32 to vector<4x32x128xf32>
    %57 = arith.select %55, %53, %56 : vector<4x32x128xi1>, vector<4x32x128xf32>
    %58 = arith.mulf %57, %57 : vector<4x32x128xf32>
    %cst_26 = arith.constant dense<0.000000e+00> : vector<4x128xf32>
    %59 = vector.multi_reduction <add>, %58, %cst_26 [1] : vector<4x32x128xf32> to vector<4x128xf32>
    %cst_27 = arith.constant 4.000000e-02 : f32
    %60 = vector.broadcast %cst_27 : f32 to vector<4x128xf32>
    %61 = arith.mulf %59, %60 : vector<4x128xf32>
    %62 = math.sqrt %61 : vector<4x128xf32>
    %c0_28 = arith.constant 0 : index
    %c0_29 = arith.constant 0 : index
    %63 = vector.load %arg8[%c0_28, %c0_29] : memref<256x128xbf16, #tpu.memory_space<vmem>>, vector<256x128xbf16>
    %64 = arith.truncf %50 : vector<4x128xf32> to vector<4x128xbf16>
    %65 = vector.extract_strided_slice %63 {offsets = [0, 0], sizes = [128, 128], strides = [1, 1]} : vector<256x128xbf16> to vector<128x128xbf16>
    %cst_30 = arith.constant dense<0.000000e+00> : vector<4x128xf32>
    %66 = tpu.matmul %64, %65, %cst_30 {dimension_numbers = #tpu.dot_dimension_numbers<[1], [0], [0], [1], [0, 0, 1, 1], [], []>} : vector<4x128xbf16>, vector<128x128xbf16>, vector<4x128xf32> -> vector<4x128xf32>
    %67 = arith.truncf %62 : vector<4x128xf32> to vector<4x128xbf16>
    %68 = vector.extract_strided_slice %63 {offsets = [128, 0], sizes = [128, 128], strides = [1, 1]} : vector<256x128xbf16> to vector<128x128xbf16>
    %cst_31 = arith.constant dense<0.000000e+00> : vector<4x128xf32>
    %69 = tpu.matmul %67, %68, %cst_31 {dimension_numbers = #tpu.dot_dimension_numbers<[1], [0], [0], [1], [0, 0, 1, 1], [], []>} : vector<4x128xbf16>, vector<128x128xbf16>, vector<4x128xf32> -> vector<4x128xf32>
    %70 = arith.addf %66, %69 : vector<4x128xf32>
    %c0_32 = arith.constant 0 : index
    %c0_33 = arith.constant 0 : index
    %71 = vector.load %arg9[%c0_32, %c0_33] : memref<1x128xf32, #tpu.memory_space<vmem>>, vector<1x128xf32>
    %72 = vector.broadcast %71 : vector<1x128xf32> to vector<4x128xf32>
    %73 = arith.addf %70, %72 : vector<4x128xf32>
    %74 = arith.truncf %73 : vector<4x128xf32> to vector<4x128xbf16>
    %c0_34 = arith.constant 0 : index
    %c0_35 = arith.constant 0 : index
    %75 = vector.load %arg10[%c0_34, %c0_35] : memref<128x128xbf16, #tpu.memory_space<vmem>>, vector<128x128xbf16>
    %cst_36 = arith.constant dense<0.000000e+00> : vector<4x128xf32>
    %76 = tpu.matmul %74, %75, %cst_36 {dimension_numbers = #tpu.dot_dimension_numbers<[1], [0], [0], [1], [0, 0, 1, 1], [], []>} : vector<4x128xbf16>, vector<128x128xbf16>, vector<4x128xf32> -> vector<4x128xf32>
    %c0_37 = arith.constant 0 : index
    %c0_38 = arith.constant 0 : index
    %77 = vector.load %arg11[%c0_37, %c0_38] : memref<1x128xf32, #tpu.memory_space<vmem>>, vector<1x128xf32>
    %78 = vector.broadcast %77 : vector<1x128xf32> to vector<4x128xf32>
    %79 = arith.addf %76, %78 : vector<4x128xf32>
    %80 = vector.shape_cast %79 : vector<4x128xf32> to vector<4x1x128xf32>
    %c0_39 = arith.constant 0 : index
    %c0_40 = arith.constant 0 : index
    %c0_41 = arith.constant 0 : index
    %81 = vector.load %arg12[%c0_39, %c0_40, %c0_41] : memref<4x1x128xf32, #tpu.memory_space<vmem>>, vector<4x1x128xf32>
    tpu.vector_store %arg12[%c0_39, %c0_40, %c0_41], %80 {strides = array<i32>} : memref<4x1x128xf32, #tpu.memory_space<vmem>>, vector<4x1x128xf32>,
    return
  }
  func.func @transform_0(%arg0: i32) -> (i32, i32, i32) {
    %c0_i32 = arith.constant 0 : i32
    %c0_i32_0 = arith.constant 0 : i32
    %c0_i32_1 = arith.constant 0 : i32
    return %arg0, %c0_i32, %c0_i32_0 : i32, i32, i32
  }
  func.func @transform_1(%arg0: i32) -> (i32, i32) {
    %c0_i32 = arith.constant 0 : i32
    %c0_i32_0 = arith.constant 0 : i32
    %c0_i32_1 = arith.constant 0 : i32
    return %c0_i32, %c0_i32_0 : i32, i32
  }
  func.func @transform_2(%arg0: i32) -> (i32, i32) {
    %c0_i32 = arith.constant 0 : i32
    %c0_i32_0 = arith.constant 0 : i32
    %c0_i32_1 = arith.constant 0 : i32
    return %c0_i32, %c0_i32_0 : i32, i32
  }
  func.func @transform_3(%arg0: i32) -> (i32, i32) {
    %c0_i32 = arith.constant 0 : i32
    %c0_i32_0 = arith.constant 0 : i32
    %c0_i32_1 = arith.constant 0 : i32
    return %c0_i32, %c0_i32_0 : i32, i32
  }
  func.func @transform_4(%arg0: i32) -> (i32, i32) {
    %c0_i32 = arith.constant 0 : i32
    %c0_i32_0 = arith.constant 0 : i32
    %c0_i32_1 = arith.constant 0 : i32
    return %c0_i32, %c0_i32_0 : i32, i32
  }
  func.func @transform_5(%arg0: i32) -> (i32, i32) {
    %c0_i32 = arith.constant 0 : i32
    %c0_i32_0 = arith.constant 0 : i32
    %c0_i32_1 = arith.constant 0 : i32
    return %c0_i32, %c0_i32_0 : i32, i32
  }
  func.func @transform_6(%arg0: i32) -> (i32, i32) {
    %c0_i32 = arith.constant 0 : i32
    %c0_i32_0 = arith.constant 0 : i32
    %c0_i32_1 = arith.constant 0 : i32
    return %c0_i32, %c0_i32_0 : i32, i32
  }
  func.func @transform_7(%arg0: i32) -> (i32, i32) {
    %c0_i32 = arith.constant 0 : i32
    %c0_i32_0 = arith.constant 0 : i32
    %c0_i32_1 = arith.constant 0 : i32
    return %c0_i32, %c0_i32_0 : i32, i32
  }
  func.func @transform_8(%arg0: i32) -> (i32, i32) {
    %c0_i32 = arith.constant 0 : i32
    %c0_i32_0 = arith.constant 0 : i32
    %c0_i32_1 = arith.constant 0 : i32
    return %c0_i32, %c0_i32_0 : i32, i32
  }
  func.func @transform_9(%arg0: i32) -> (i32, i32) {
    %c0_i32 = arith.constant 0 : i32
    %c0_i32_0 = arith.constant 0 : i32
    %c0_i32_1 = arith.constant 0 : i32
    return %c0_i32, %c0_i32_0 : i32, i32
  }
  func.func @transform_10(%arg0: i32) -> (i32, i32) {
    %c0_i32 = arith.constant 0 : i32
    %c0_i32_0 = arith.constant 0 : i32
    %c0_i32_1 = arith.constant 0 : i32
    return %c0_i32, %c0_i32_0 : i32, i32
  }
  func.func @transform_11(%arg0: i32) -> (i32, i32, i32) {
    %c0_i32 = arith.constant 0 : i32
    %c0_i32_0 = arith.constant 0 : i32
    %c0_i32_1 = arith.constant 0 : i32
    return %arg0, %c0_i32, %c0_i32_0 : i32, i32, i32
  }
}

module attributes {stable_mosaic.version = 11 : i64} {
  func.func @_encoder_kernel(%arg0: i32, %arg1: memref<4x32x48xbf16, #tpu.memory_space<vmem>>, %arg2: memref<48x128xbf16, #tpu.memory_space<vmem>>, %arg3: memref<1x128xf32, #tpu.memory_space<vmem>>, %arg4: memref<384x128xbf16, #tpu.memory_space<vmem>>, %arg5: memref<1x128xf32, #tpu.memory_space<vmem>>, %arg6: memref<128x128xbf16, #tpu.memory_space<vmem>>, %arg7: memref<1x128xf32, #tpu.memory_space<vmem>>, %arg8: memref<256x128xbf16, #tpu.memory_space<vmem>>, %arg9: memref<1x128xf32, #tpu.memory_space<vmem>>, %arg10: memref<128x128xbf16, #tpu.memory_space<vmem>>, %arg11: memref<1x128xf32, #tpu.memory_space<vmem>>, %arg12: memref<4x1x128xf32, #tpu.memory_space<vmem>>) attributes {dimension_semantics = [#tpu.dimension_semantics<parallel>], iteration_bounds = array<i64: 1>, scalar_prefetch = 0 : i64, scratch_operands = 0 : i64, tpu.core_type = #tpu.core_type<tc>, window_params = [{transform_indices = @transform_0, window_bounds = array<i64: 4, 32, 48>}, {pipeline_mode = #tpu.pipeline_mode<synchronous>, transform_indices = @transform_1, window_bounds = array<i64: 48, 128>}, {pipeline_mode = #tpu.pipeline_mode<synchronous>, transform_indices = @transform_2, window_bounds = array<i64: 1, 128>}, {pipeline_mode = #tpu.pipeline_mode<synchronous>, transform_indices = @transform_3, window_bounds = array<i64: 384, 128>}, {pipeline_mode = #tpu.pipeline_mode<synchronous>, transform_indices = @transform_4, window_bounds = array<i64: 1, 128>}, {pipeline_mode = #tpu.pipeline_mode<synchronous>, transform_indices = @transform_5, window_bounds = array<i64: 128, 128>}, {pipeline_mode = #tpu.pipeline_mode<synchronous>, transform_indices = @transform_6, window_bounds = array<i64: 1, 128>}, {pipeline_mode = #tpu.pipeline_mode<synchronous>, transform_indices = @transform_7, window_bounds = array<i64: 256, 128>}, {pipeline_mode = #tpu.pipeline_mode<synchronous>, transform_indices = @transform_8, window_bounds = array<i64: 1, 128>}, {pipeline_mode = #tpu.pipeline_mode<synchronous>, transform_indices = @transform_9, window_bounds = array<i64: 128, 128>}, {pipeline_mode = #tpu.pipeline_mode<synchronous>, transform_indices = @transform_10, window_bounds = array<i64: 1, 128>}, {transform_indices = @transform_11, window_bounds = array<i64: 4, 1, 128>}]} {
    %c0 = arith.constant 0 : index
    %c0_0 = arith.constant 0 : index
    %c0_1 = arith.constant 0 : index
    %0 = vector.load %arg1[%c0, %c0_0, %c0_1] : memref<4x32x48xbf16, #tpu.memory_space<vmem>>, vector<4x32x48xbf16>
    %1 = vector.shape_cast %0 : vector<4x32x48xbf16> to vector<128x48xbf16>
    %c0_2 = arith.constant 0 : index
    %c0_3 = arith.constant 0 : index
    %2 = vector.load %arg2[%c0_2, %c0_3] : memref<48x128xbf16, #tpu.memory_space<vmem>>, vector<48x128xbf16>
    %c0_4 = arith.constant 0 : index
    %c0_5 = arith.constant 0 : index
    %3 = vector.load %arg3[%c0_4, %c0_5] : memref<1x128xf32, #tpu.memory_space<vmem>>, vector<1x128xf32>
    %4 = vector.shape_cast %3 : vector<1x128xf32> to vector<1x128xf32>
    %5 = vector.broadcast %4 : vector<1x128xf32> to vector<128x128xf32>
    %cst = arith.constant dense<0.000000e+00> : vector<128x128xf32>
    %6 = tpu.matmul %1, %2, %cst {dimension_numbers = #tpu.dot_dimension_numbers<[1], [0], [0], [1], [0, 0, 1, 1], [], []>} : vector<128x48xbf16>, vector<48x128xbf16>, vector<128x128xf32> -> vector<128x128xf32>
    %7 = arith.addf %5, %6 : vector<128x128xf32>
    %cst_6 = arith.constant 0.000000e+00 : f32
    %8 = vector.broadcast %cst_6 : f32 to vector<128x128xf32>
    %9 = arith.maximumf %7, %8 : vector<128x128xf32>
    %c0_7 = arith.constant 0 : index
    %c0_8 = arith.constant 0 : index
    %10 = vector.load %arg4[%c0_7, %c0_8] : memref<384x128xbf16, #tpu.memory_space<vmem>>, vector<384x128xbf16>
    %11 = arith.truncf %9 : vector<128x128xf32> to vector<128x128xbf16>
    %c0_9 = arith.constant 0 : index
    %c0_10 = arith.constant 0 : index
    %12 = vector.load %arg5[%c0_9, %c0_10] : memref<1x128xf32, #tpu.memory_space<vmem>>, vector<1x128xf32>
    %13 = vector.shape_cast %12 : vector<1x128xf32> to vector<1x128xf32>
    %14 = vector.broadcast %13 : vector<1x128xf32> to vector<128x128xf32>
    %cst_11 = arith.constant 0.000000e+00 : bf16
    %15 = vector.broadcast %cst_11 : bf16 to vector<4x128xbf16>
    %16 = tpu.concatenate %11, %15 in 0 : vector<128x128xbf16>, vector<4x128xbf16> -> vector<132x128xbf16>
    %17 = vector.extract_strided_slice %16 {offsets = [0, 0], sizes = [128, 128], strides = [1, 1]} : vector<132x128xbf16> to vector<128x128xbf16>
    %18 = vector.extract_strided_slice %10 {offsets = [0, 0], sizes = [128, 128], strides = [1, 1]} : vector<384x128xbf16> to vector<128x128xbf16>
    %cst_12 = arith.constant dense<0.000000e+00> : vector<128x128xf32>
    %19 = tpu.matmul %17, %18, %cst_12 {dimension_numbers = #tpu.dot_dimension_numbers<[1], [0], [0], [1], [0, 0, 1, 1], [], []>} : vector<128x128xbf16>, vector<128x128xbf16>, vector<128x128xf32> -> vector<128x128xf32>
    %20 = arith.addf %14, %19 : vector<128x128xf32>
    %21 = vector.extract_strided_slice %16 {offsets = [2, 0], sizes = [128, 128], strides = [1, 1]} : vector<132x128xbf16> to vector<128x128xbf16>
    %22 = vector.extract_strided_slice %10 {offsets = [128, 0], sizes = [128, 128], strides = [1, 1]} : vector<384x128xbf16> to vector<128x128xbf16>
    %cst_13 = arith.constant dense<0.000000e+00> : vector<128x128xf32>
    %23 = tpu.matmul %21, %22, %cst_13 {dimension_numbers = #tpu.dot_dimension_numbers<[1], [0], [0], [1], [0, 0, 1, 1], [], []>} : vector<128x128xbf16>, vector<128x128xbf16>, vector<128x128xf32> -> vector<128x128xf32>
    %24 = arith.addf %20, %23 : vector<128x128xf32>
    %25 = vector.extract_strided_slice %16 {offsets = [4, 0], sizes = [128, 128], strides = [1, 1]} : vector<132x128xbf16> to vector<128x128xbf16>
    %26 = vector.extract_strided_slice %10 {offsets = [256, 0], sizes = [128, 128], strides = [1, 1]} : vector<384x128xbf16> to vector<128x128xbf16>
    %cst_14 = arith.constant dense<0.000000e+00> : vector<128x128xf32>
    %27 = tpu.matmul %25, %26, %cst_14 {dimension_numbers = #tpu.dot_dimension_numbers<[1], [0], [0], [1], [0, 0, 1, 1], [], []>} : vector<128x128xbf16>, vector<128x128xbf16>, vector<128x128xf32> -> vector<128x128xf32>
    %28 = arith.addf %24, %27 : vector<128x128xf32>
    %cst_15 = arith.constant 0.000000e+00 : f32
    %29 = vector.broadcast %cst_15 : f32 to vector<128x128xf32>
    %30 = arith.maximumf %28, %29 : vector<128x128xf32>
    %c0_16 = arith.constant 0 : index
    %c0_17 = arith.constant 0 : index
    %31 = vector.load %arg6[%c0_16, %c0_17] : memref<128x128xbf16, #tpu.memory_space<vmem>>, vector<128x128xbf16>
    %32 = arith.truncf %30 : vector<128x128xf32> to vector<128x128xbf16>
    %c0_18 = arith.constant 0 : index
    %c0_19 = arith.constant 0 : index
    %33 = vector.load %arg7[%c0_18, %c0_19] : memref<1x128xf32, #tpu.memory_space<vmem>>, vector<1x128xf32>
    %34 = vector.shape_cast %33 : vector<1x128xf32> to vector<1x128xf32>
    %35 = vector.broadcast %34 : vector<1x128xf32> to vector<128x128xf32>
    %cst_20 = arith.constant dense<0.000000e+00> : vector<128x128xf32>
    %36 = tpu.matmul %32, %31, %cst_20 {dimension_numbers = #tpu.dot_dimension_numbers<[1], [0], [0], [1], [0, 0, 1, 1], [], []>} : vector<128x128xbf16>, vector<128x128xbf16>, vector<128x128xf32> -> vector<128x128xf32>
    %37 = arith.addf %35, %36 : vector<128x128xf32>
    %cst_21 = arith.constant 0.000000e+00 : f32
    %38 = vector.broadcast %cst_21 : f32 to vector<128x128xf32>
    %39 = arith.maximumf %37, %38 : vector<128x128xf32>
    %40 = vector.shape_cast %39 : vector<128x128xf32> to vector<4x32x128xf32>
    %41 = tpu.iota {dimensions = array<i32: 1>} : vector<1x32x1xi32>
    %c26_i32 = arith.constant 26 : i32
    %42 = vector.broadcast %c26_i32 : i32 to vector<1x32x1xi32>
    %43 = arith.cmpi slt, %41, %42 : vector<1x32x1xi32>
    %cst_22 = arith.constant 0.000000e+00 : f32
    %44 = vector.shape_cast %43 : vector<1x32x1xi1> to vector<1x32x1xi1>
    %45 = vector.broadcast %44 : vector<1x32x1xi1> to vector<4x32x128xi1>
    %46 = vector.broadcast %cst_22 : f32 to vector<4x32x128xf32>
    %47 = arith.select %45, %40, %46 : vector<4x32x128xi1>, vector<4x32x128xf32>
    %cst_23 = arith.constant dense<0.000000e+00> : vector<4x128xf32>
    %48 = vector.multi_reduction <add>, %47, %cst_23 [1] : vector<4x32x128xf32> to vector<4x128xf32>
    %cst_24 = arith.constant 0.0384615399 : f32
    %49 = vector.broadcast %cst_24 : f32 to vector<4x128xf32>
    %50 = arith.mulf %48, %49 : vector<4x128xf32>
    %51 = vector.shape_cast %50 : vector<4x128xf32> to vector<4x1x128xf32>
    %52 = vector.broadcast %51 : vector<4x1x128xf32> to vector<4x32x128xf32>
    %53 = arith.subf %40, %52 : vector<4x32x128xf32>
    %cst_25 = arith.constant 0.000000e+00 : f32
    %54 = vector.shape_cast %43 : vector<1x32x1xi1> to vector<1x32x1xi1>
    %55 = vector.broadcast %54 : vector<1x32x1xi1> to vector<4x32x128xi1>
    %56 = vector.broadcast %cst_25 : f32 to vector<4x32x128xf32>
    %57 = arith.select %55, %53, %56 : vector<4x32x128xi1>, vector<4x32x128xf32>
    %58 = arith.mulf %57, %57 : vector<4x32x128xf32>
    %cst_26 = arith.constant dense<0.000000e+00> : vector<4x128xf32>
    %59 = vector.multi_reduction <add>, %58, %cst_26 [1] : vector<4x32x128xf32> to vector<4x128xf32>
    %cst_27 = arith.constant 4.000000e-02 : f32
    %60 = vector.broadcast %cst_27 : f32 to vector<4x128xf32>
    %61 = arith.mulf %59, %60 : vector<4x128xf32>
    %62 = math.sqrt %61 : vector<4x128xf32>
    %c0_28 = arith.constant 0 : index
    %c0_29 = arith.constant 0 : index
    %63 = vector.load %arg8[%c0_28, %c0_29] : memref<256x128xbf16, #tpu.memory_space<vmem>>, vector<256x128xbf16>
    %64 = arith.truncf %50 : vector<4x128xf32> to vector<4x128xbf16>
    %65 = vector.extract_strided_slice %63 {offsets = [0, 0], sizes = [128, 128], strides = [1, 1]} : vector<256x128xbf16> to vector<128x128xbf16>
    %cst_30 = arith.constant dense<0.000000e+00> : vector<4x128xf32>
    %66 = tpu.matmul %64, %65, %cst_30 {dimension_numbers = #tpu.dot_dimension_numbers<[1], [0], [0], [1], [0, 0, 1, 1], [], []>} : vector<4x128xbf16>, vector<128x128xbf16>, vector<4x128xf32> -> vector<4x128xf32>
    %67 = arith.truncf %62 : vector<4x128xf32> to vector<4x128xbf16>
    %68 = vector.extract_strided_slice %63 {offsets = [128, 0], sizes = [128, 128], strides = [1, 1]} : vector<256x128xbf16> to vector<128x128xbf16>
    %cst_31 = arith.constant dense<0.000000e+00> : vector<4x128xf32>
    %69 = tpu.matmul %67, %68, %cst_31 {dimension_numbers = #tpu.dot_dimension_numbers<[1], [0], [0], [1], [0, 0, 1, 1], [], []>} : vector<4x128xbf16>, vector<128x128xbf16>, vector<4x128xf32> -> vector<4x128xf32>
    %70 = arith.addf %66, %69 : vector<4x128xf32>
    %c0_32 = arith.constant 0 : index
    %c0_33 = arith.constant 0 : index
    %71 = vector.load %arg9[%c0_32, %c0_33] : memref<1x128xf32, #tpu.memory_space<vmem>>, vector<1x128xf32>
    %72 = vector.broadcast %71 : vector<1x128xf32> to vector<4x128xf32>
    %73 = arith.addf %70, %72 : vector<4x128xf32>
    %74 = arith.truncf %73 : vector<4x128xf32> to vector<4x128xbf16>
    %c0_34 = arith.constant 0 : index
    %c0_35 = arith.constant 0 : index
    %75 = vector.load %arg10[%c0_34, %c0_35] : memref<128x128xbf16, #tpu.memory_space<vmem>>, vector<128x128xbf16>
    %cst_36 = arith.constant dense<0.000000e+00> : vector<4x128xf32>
    %76 = tpu.matmul %74, %75, %cst_36 {dimension_numbers = #tpu.dot_dimension_numbers<[1], [0], [0], [1], [0, 0, 1, 1], [], []>} : vector<4x128xbf16>, vector<128x128xbf16>, vector<4x128xf32> -> vector<4x128xf32>
    %c0_37 = arith.constant 0 : index
    %c0_38 = arith.constant 0 : index
    %77 = vector.load %arg11[%c0_37, %c0_38] : memref<1x128xf32, #tpu.memory_space<vmem>>, vector<1x128xf32>
    %78 = vector.broadcast %77 : vector<1x128xf32> to vector<4x128xf32>
    %79 = arith.addf %76, %78 : vector<4x128xf32>
    %80 = vector.shape_cast %79 : vector<4x128xf32> to vector<4x1x128xf32>
    %c0_39 = arith.constant 0 : index
    %c0_40 = arith.constant 0 : index
    %c0_41 = arith.constant 0 : index
    %81 = vector.load %arg12[%c0_39, %c0_40, %c0_41] : memref<4x1x128xf32, #tpu.memory_space<vmem>>, vector<4x1x128xf32>
    tpu.vector_store %arg12[%c0_39, %c0_40, %c0_41], %80 {strides = array<i32>} : memref<4x1x128xf32, #tpu.memory_space<vmem>>, vector<4x1x128xf32>,
    return
  }
  func.func @transform_0(%arg0: i32) -> (i32, i32, i32) {
    %c0_i32 = arith.constant 0 : i32
    %c0_i32_0 = arith.constant 0 : i32
    %c0_i32_1 = arith.constant 0 : i32
    return %arg0, %c0_i32, %c0_i32_0 : i32, i32, i32
  }
  func.func @transform_1(%arg0: i32) -> (i32, i32) {
    %c0_i32 = arith.constant 0 : i32
    %c0_i32_0 = arith.constant 0 : i32
    %c0_i32_1 = arith.constant 0 : i32
    return %c0_i32, %c0_i32_0 : i32, i32
  }
  func.func @transform_2(%arg0: i32) -> (i32, i32) {
    %c0_i32 = arith.constant 0 : i32
    %c0_i32_0 = arith.constant 0 : i32
    %c0_i32_1 = arith.constant 0 : i32
    return %c0_i32, %c0_i32_0 : i32, i32
  }
  func.func @transform_3(%arg0: i32) -> (i32, i32) {
    %c0_i32 = arith.constant 0 : i32
    %c0_i32_0 = arith.constant 0 : i32
    %c0_i32_1 = arith.constant 0 : i32
    return %c0_i32, %c0_i32_0 : i32, i32
  }
  func.func @transform_4(%arg0: i32) -> (i32, i32) {
    %c0_i32 = arith.constant 0 : i32
    %c0_i32_0 = arith.constant 0 : i32
    %c0_i32_1 = arith.constant 0 : i32
    return %c0_i32, %c0_i32_0 : i32, i32
  }
  func.func @transform_5(%arg0: i32) -> (i32, i32) {
    %c0_i32 = arith.constant 0 : i32
    %c0_i32_0 = arith.constant 0 : i32
    %c0_i32_1 = arith.constant 0 : i32
    return %c0_i32, %c0_i32_0 : i32, i32
  }
  func.func @transform_6(%arg0: i32) -> (i32, i32) {
    %c0_i32 = arith.constant 0 : i32
    %c0_i32_0 = arith.constant 0 : i32
    %c0_i32_1 = arith.constant 0 : i32
    return %c0_i32, %c0_i32_0 : i32, i32
  }
  func.func @transform_7(%arg0: i32) -> (i32, i32) {
    %c0_i32 = arith.constant 0 : i32
    %c0_i32_0 = arith.constant 0 : i32
    %c0_i32_1 = arith.constant 0 : i32
    return %c0_i32, %c0_i32_0 : i32, i32
  }
  func.func @transform_8(%arg0: i32) -> (i32, i32) {
    %c0_i32 = arith.constant 0 : i32
    %c0_i32_0 = arith.constant 0 : i32
    %c0_i32_1 = arith.constant 0 : i32
    return %c0_i32, %c0_i32_0 : i32, i32
  }
  func.func @transform_9(%arg0: i32) -> (i32, i32) {
    %c0_i32 = arith.constant 0 : i32
    %c0_i32_0 = arith.constant 0 : i32
    %c0_i32_1 = arith.constant 0 : i32
    return %c0_i32, %c0_i32_0 : i32, i32
  }
  func.func @transform_10(%arg0: i32) -> (i32, i32) {
    %c0_i32 = arith.constant 0 : i32
    %c0_i32_0 = arith.constant 0 : i32
    %c0_i32_1 = arith.constant 0 : i32
    return %c0_i32, %c0_i32_0 : i32, i32
  }
  func.func @transform_11(%arg0: i32) -> (i32, i32, i32) {
    %c0_i32 = arith.constant 0 : i32
    %c0_i32_0 = arith.constant 0 : i32
    %c0_i32_1 = arith.constant 0 : i32
    return %arg0, %c0_i32, %c0_i32_0 : i32, i32, i32
  }
}

module attributes {stable_mosaic.version = 11 : i64} {
  func.func @_encoder_kernel(%arg0: i32, %arg1: memref<4x32x48xbf16, #tpu.memory_space<vmem>>, %arg2: memref<48x128xbf16, #tpu.memory_space<vmem>>, %arg3: memref<1x128xf32, #tpu.memory_space<vmem>>, %arg4: memref<384x128xbf16, #tpu.memory_space<vmem>>, %arg5: memref<1x128xf32, #tpu.memory_space<vmem>>, %arg6: memref<128x128xbf16, #tpu.memory_space<vmem>>, %arg7: memref<1x128xf32, #tpu.memory_space<vmem>>, %arg8: memref<256x128xbf16, #tpu.memory_space<vmem>>, %arg9: memref<1x128xf32, #tpu.memory_space<vmem>>, %arg10: memref<128x128xbf16, #tpu.memory_space<vmem>>, %arg11: memref<1x128xf32, #tpu.memory_space<vmem>>, %arg12: memref<4x1x128xf32, #tpu.memory_space<vmem>>) attributes {dimension_semantics = [#tpu.dimension_semantics<parallel>], iteration_bounds = array<i64: 1>, scalar_prefetch = 0 : i64, scratch_operands = 0 : i64, tpu.core_type = #tpu.core_type<tc>, window_params = [{transform_indices = @transform_0, window_bounds = array<i64: 4, 32, 48>}, {pipeline_mode = #tpu.pipeline_mode<synchronous>, transform_indices = @transform_1, window_bounds = array<i64: 48, 128>}, {pipeline_mode = #tpu.pipeline_mode<synchronous>, transform_indices = @transform_2, window_bounds = array<i64: 1, 128>}, {pipeline_mode = #tpu.pipeline_mode<synchronous>, transform_indices = @transform_3, window_bounds = array<i64: 384, 128>}, {pipeline_mode = #tpu.pipeline_mode<synchronous>, transform_indices = @transform_4, window_bounds = array<i64: 1, 128>}, {pipeline_mode = #tpu.pipeline_mode<synchronous>, transform_indices = @transform_5, window_bounds = array<i64: 128, 128>}, {pipeline_mode = #tpu.pipeline_mode<synchronous>, transform_indices = @transform_6, window_bounds = array<i64: 1, 128>}, {pipeline_mode = #tpu.pipeline_mode<synchronous>, transform_indices = @transform_7, window_bounds = array<i64: 256, 128>}, {pipeline_mode = #tpu.pipeline_mode<synchronous>, transform_indices = @transform_8, window_bounds = array<i64: 1, 128>}, {pipeline_mode = #tpu.pipeline_mode<synchronous>, transform_indices = @transform_9, window_bounds = array<i64: 128, 128>}, {pipeline_mode = #tpu.pipeline_mode<synchronous>, transform_indices = @transform_10, window_bounds = array<i64: 1, 128>}, {transform_indices = @transform_11, window_bounds = array<i64: 4, 1, 128>}]} {
    %c0 = arith.constant 0 : index
    %c0_0 = arith.constant 0 : index
    %c0_1 = arith.constant 0 : index
    %0 = vector.load %arg1[%c0, %c0_0, %c0_1] : memref<4x32x48xbf16, #tpu.memory_space<vmem>>, vector<4x32x48xbf16>
    %1 = vector.shape_cast %0 : vector<4x32x48xbf16> to vector<128x48xbf16>
    %c0_2 = arith.constant 0 : index
    %c0_3 = arith.constant 0 : index
    %2 = vector.load %arg2[%c0_2, %c0_3] : memref<48x128xbf16, #tpu.memory_space<vmem>>, vector<48x128xbf16>
    %c0_4 = arith.constant 0 : index
    %c0_5 = arith.constant 0 : index
    %3 = vector.load %arg3[%c0_4, %c0_5] : memref<1x128xf32, #tpu.memory_space<vmem>>, vector<1x128xf32>
    %4 = vector.shape_cast %3 : vector<1x128xf32> to vector<1x128xf32>
    %5 = vector.broadcast %4 : vector<1x128xf32> to vector<128x128xf32>
    %cst = arith.constant dense<0.000000e+00> : vector<128x128xf32>
    %6 = tpu.matmul %1, %2, %cst {dimension_numbers = #tpu.dot_dimension_numbers<[1], [0], [0], [1], [0, 0, 1, 1], [], []>} : vector<128x48xbf16>, vector<48x128xbf16>, vector<128x128xf32> -> vector<128x128xf32>
    %7 = arith.addf %5, %6 : vector<128x128xf32>
    %cst_6 = arith.constant 0.000000e+00 : f32
    %8 = vector.broadcast %cst_6 : f32 to vector<128x128xf32>
    %9 = arith.maximumf %7, %8 : vector<128x128xf32>
    %c0_7 = arith.constant 0 : index
    %c0_8 = arith.constant 0 : index
    %10 = vector.load %arg4[%c0_7, %c0_8] : memref<384x128xbf16, #tpu.memory_space<vmem>>, vector<384x128xbf16>
    %11 = arith.truncf %9 : vector<128x128xf32> to vector<128x128xbf16>
    %c0_9 = arith.constant 0 : index
    %c0_10 = arith.constant 0 : index
    %12 = vector.load %arg5[%c0_9, %c0_10] : memref<1x128xf32, #tpu.memory_space<vmem>>, vector<1x128xf32>
    %13 = vector.shape_cast %12 : vector<1x128xf32> to vector<1x128xf32>
    %14 = vector.broadcast %13 : vector<1x128xf32> to vector<128x128xf32>
    %cst_11 = arith.constant 0.000000e+00 : bf16
    %15 = vector.broadcast %cst_11 : bf16 to vector<4x128xbf16>
    %16 = tpu.concatenate %11, %15 in 0 : vector<128x128xbf16>, vector<4x128xbf16> -> vector<132x128xbf16>
    %17 = vector.extract_strided_slice %16 {offsets = [0, 0], sizes = [128, 128], strides = [1, 1]} : vector<132x128xbf16> to vector<128x128xbf16>
    %18 = vector.extract_strided_slice %10 {offsets = [0, 0], sizes = [128, 128], strides = [1, 1]} : vector<384x128xbf16> to vector<128x128xbf16>
    %cst_12 = arith.constant dense<0.000000e+00> : vector<128x128xf32>
    %19 = tpu.matmul %17, %18, %cst_12 {dimension_numbers = #tpu.dot_dimension_numbers<[1], [0], [0], [1], [0, 0, 1, 1], [], []>} : vector<128x128xbf16>, vector<128x128xbf16>, vector<128x128xf32> -> vector<128x128xf32>
    %20 = arith.addf %14, %19 : vector<128x128xf32>
    %21 = vector.extract_strided_slice %16 {offsets = [2, 0], sizes = [128, 128], strides = [1, 1]} : vector<132x128xbf16> to vector<128x128xbf16>
    %22 = vector.extract_strided_slice %10 {offsets = [128, 0], sizes = [128, 128], strides = [1, 1]} : vector<384x128xbf16> to vector<128x128xbf16>
    %cst_13 = arith.constant dense<0.000000e+00> : vector<128x128xf32>
    %23 = tpu.matmul %21, %22, %cst_13 {dimension_numbers = #tpu.dot_dimension_numbers<[1], [0], [0], [1], [0, 0, 1, 1], [], []>} : vector<128x128xbf16>, vector<128x128xbf16>, vector<128x128xf32> -> vector<128x128xf32>
    %24 = arith.addf %20, %23 : vector<128x128xf32>
    %25 = vector.extract_strided_slice %16 {offsets = [4, 0], sizes = [128, 128], strides = [1, 1]} : vector<132x128xbf16> to vector<128x128xbf16>
    %26 = vector.extract_strided_slice %10 {offsets = [256, 0], sizes = [128, 128], strides = [1, 1]} : vector<384x128xbf16> to vector<128x128xbf16>
    %cst_14 = arith.constant dense<0.000000e+00> : vector<128x128xf32>
    %27 = tpu.matmul %25, %26, %cst_14 {dimension_numbers = #tpu.dot_dimension_numbers<[1], [0], [0], [1], [0, 0, 1, 1], [], []>} : vector<128x128xbf16>, vector<128x128xbf16>, vector<128x128xf32> -> vector<128x128xf32>
    %28 = arith.addf %24, %27 : vector<128x128xf32>
    %cst_15 = arith.constant 0.000000e+00 : f32
    %29 = vector.broadcast %cst_15 : f32 to vector<128x128xf32>
    %30 = arith.maximumf %28, %29 : vector<128x128xf32>
    %c0_16 = arith.constant 0 : index
    %c0_17 = arith.constant 0 : index
    %31 = vector.load %arg6[%c0_16, %c0_17] : memref<128x128xbf16, #tpu.memory_space<vmem>>, vector<128x128xbf16>
    %32 = arith.truncf %30 : vector<128x128xf32> to vector<128x128xbf16>
    %c0_18 = arith.constant 0 : index
    %c0_19 = arith.constant 0 : index
    %33 = vector.load %arg7[%c0_18, %c0_19] : memref<1x128xf32, #tpu.memory_space<vmem>>, vector<1x128xf32>
    %34 = vector.shape_cast %33 : vector<1x128xf32> to vector<1x128xf32>
    %35 = vector.broadcast %34 : vector<1x128xf32> to vector<128x128xf32>
    %cst_20 = arith.constant dense<0.000000e+00> : vector<128x128xf32>
    %36 = tpu.matmul %32, %31, %cst_20 {dimension_numbers = #tpu.dot_dimension_numbers<[1], [0], [0], [1], [0, 0, 1, 1], [], []>} : vector<128x128xbf16>, vector<128x128xbf16>, vector<128x128xf32> -> vector<128x128xf32>
    %37 = arith.addf %35, %36 : vector<128x128xf32>
    %cst_21 = arith.constant 0.000000e+00 : f32
    %38 = vector.broadcast %cst_21 : f32 to vector<128x128xf32>
    %39 = arith.maximumf %37, %38 : vector<128x128xf32>
    %40 = vector.shape_cast %39 : vector<128x128xf32> to vector<4x32x128xf32>
    %41 = tpu.iota {dimensions = array<i32: 1>} : vector<1x32x1xi32>
    %c26_i32 = arith.constant 26 : i32
    %42 = vector.broadcast %c26_i32 : i32 to vector<1x32x1xi32>
    %43 = arith.cmpi slt, %41, %42 : vector<1x32x1xi32>
    %cst_22 = arith.constant 0.000000e+00 : f32
    %44 = vector.shape_cast %43 : vector<1x32x1xi1> to vector<1x32x1xi1>
    %45 = vector.broadcast %44 : vector<1x32x1xi1> to vector<4x32x128xi1>
    %46 = vector.broadcast %cst_22 : f32 to vector<4x32x128xf32>
    %47 = arith.select %45, %40, %46 : vector<4x32x128xi1>, vector<4x32x128xf32>
    %cst_23 = arith.constant dense<0.000000e+00> : vector<4x128xf32>
    %48 = vector.multi_reduction <add>, %47, %cst_23 [1] : vector<4x32x128xf32> to vector<4x128xf32>
    %cst_24 = arith.constant 0.0384615399 : f32
    %49 = vector.broadcast %cst_24 : f32 to vector<4x128xf32>
    %50 = arith.mulf %48, %49 : vector<4x128xf32>
    %51 = vector.shape_cast %50 : vector<4x128xf32> to vector<4x1x128xf32>
    %52 = vector.broadcast %51 : vector<4x1x128xf32> to vector<4x32x128xf32>
    %53 = arith.subf %40, %52 : vector<4x32x128xf32>
    %cst_25 = arith.constant 0.000000e+00 : f32
    %54 = vector.shape_cast %43 : vector<1x32x1xi1> to vector<1x32x1xi1>
    %55 = vector.broadcast %54 : vector<1x32x1xi1> to vector<4x32x128xi1>
    %56 = vector.broadcast %cst_25 : f32 to vector<4x32x128xf32>
    %57 = arith.select %55, %53, %56 : vector<4x32x128xi1>, vector<4x32x128xf32>
    %58 = arith.mulf %57, %57 : vector<4x32x128xf32>
    %cst_26 = arith.constant dense<0.000000e+00> : vector<4x128xf32>
    %59 = vector.multi_reduction <add>, %58, %cst_26 [1] : vector<4x32x128xf32> to vector<4x128xf32>
    %cst_27 = arith.constant 4.000000e-02 : f32
    %60 = vector.broadcast %cst_27 : f32 to vector<4x128xf32>
    %61 = arith.mulf %59, %60 : vector<4x128xf32>
    %62 = math.sqrt %61 : vector<4x128xf32>
    %c0_28 = arith.constant 0 : index
    %c0_29 = arith.constant 0 : index
    %63 = vector.load %arg8[%c0_28, %c0_29] : memref<256x128xbf16, #tpu.memory_space<vmem>>, vector<256x128xbf16>
    %64 = arith.truncf %50 : vector<4x128xf32> to vector<4x128xbf16>
    %65 = vector.extract_strided_slice %63 {offsets = [0, 0], sizes = [128, 128], strides = [1, 1]} : vector<256x128xbf16> to vector<128x128xbf16>
    %cst_30 = arith.constant dense<0.000000e+00> : vector<4x128xf32>
    %66 = tpu.matmul %64, %65, %cst_30 {dimension_numbers = #tpu.dot_dimension_numbers<[1], [0], [0], [1], [0, 0, 1, 1], [], []>} : vector<4x128xbf16>, vector<128x128xbf16>, vector<4x128xf32> -> vector<4x128xf32>
    %67 = arith.truncf %62 : vector<4x128xf32> to vector<4x128xbf16>
    %68 = vector.extract_strided_slice %63 {offsets = [128, 0], sizes = [128, 128], strides = [1, 1]} : vector<256x128xbf16> to vector<128x128xbf16>
    %cst_31 = arith.constant dense<0.000000e+00> : vector<4x128xf32>
    %69 = tpu.matmul %67, %68, %cst_31 {dimension_numbers = #tpu.dot_dimension_numbers<[1], [0], [0], [1], [0, 0, 1, 1], [], []>} : vector<4x128xbf16>, vector<128x128xbf16>, vector<4x128xf32> -> vector<4x128xf32>
    %70 = arith.addf %66, %69 : vector<4x128xf32>
    %c0_32 = arith.constant 0 : index
    %c0_33 = arith.constant 0 : index
    %71 = vector.load %arg9[%c0_32, %c0_33] : memref<1x128xf32, #tpu.memory_space<vmem>>, vector<1x128xf32>
    %72 = vector.broadcast %71 : vector<1x128xf32> to vector<4x128xf32>
    %73 = arith.addf %70, %72 : vector<4x128xf32>
    %74 = arith.truncf %73 : vector<4x128xf32> to vector<4x128xbf16>
    %c0_34 = arith.constant 0 : index
    %c0_35 = arith.constant 0 : index
    %75 = vector.load %arg10[%c0_34, %c0_35] : memref<128x128xbf16, #tpu.memory_space<vmem>>, vector<128x128xbf16>
    %cst_36 = arith.constant dense<0.000000e+00> : vector<4x128xf32>
    %76 = tpu.matmul %74, %75, %cst_36 {dimension_numbers = #tpu.dot_dimension_numbers<[1], [0], [0], [1], [0, 0, 1, 1], [], []>} : vector<4x128xbf16>, vector<128x128xbf16>, vector<4x128xf32> -> vector<4x128xf32>
    %c0_37 = arith.constant 0 : index
    %c0_38 = arith.constant 0 : index
    %77 = vector.load %arg11[%c0_37, %c0_38] : memref<1x128xf32, #tpu.memory_space<vmem>>, vector<1x128xf32>
    %78 = vector.broadcast %77 : vector<1x128xf32> to vector<4x128xf32>
    %79 = arith.addf %76, %78 : vector<4x128xf32>
    %80 = vector.shape_cast %79 : vector<4x128xf32> to vector<4x1x128xf32>
    %c0_39 = arith.constant 0 : index
    %c0_40 = arith.constant 0 : index
    %c0_41 = arith.constant 0 : index
    %81 = vector.load %arg12[%c0_39, %c0_40, %c0_41] : memref<4x1x128xf32, #tpu.memory_space<vmem>>, vector<4x1x128xf32>
    tpu.vector_store %arg12[%c0_39, %c0_40, %c0_41], %80 {strides = array<i32>} : memref<4x1x128xf32, #tpu.memory_space<vmem>>, vector<4x1x128xf32>,
    return
  }
  func.func @transform_0(%arg0: i32) -> (i32, i32, i32) {
    %c0_i32 = arith.constant 0 : i32
    %c0_i32_0 = arith.constant 0 : i32
    %c0_i32_1 = arith.constant 0 : i32
    return %arg0, %c0_i32, %c0_i32_0 : i32, i32, i32
  }
  func.func @transform_1(%arg0: i32) -> (i32, i32) {
    %c0_i32 = arith.constant 0 : i32
    %c0_i32_0 = arith.constant 0 : i32
    %c0_i32_1 = arith.constant 0 : i32
    return %c0_i32, %c0_i32_0 : i32, i32
  }
  func.func @transform_2(%arg0: i32) -> (i32, i32) {
    %c0_i32 = arith.constant 0 : i32
    %c0_i32_0 = arith.constant 0 : i32
    %c0_i32_1 = arith.constant 0 : i32
    return %c0_i32, %c0_i32_0 : i32, i32
  }
  func.func @transform_3(%arg0: i32) -> (i32, i32) {
    %c0_i32 = arith.constant 0 : i32
    %c0_i32_0 = arith.constant 0 : i32
    %c0_i32_1 = arith.constant 0 : i32
    return %c0_i32, %c0_i32_0 : i32, i32
  }
  func.func @transform_4(%arg0: i32) -> (i32, i32) {
    %c0_i32 = arith.constant 0 : i32
    %c0_i32_0 = arith.constant 0 : i32
    %c0_i32_1 = arith.constant 0 : i32
    return %c0_i32, %c0_i32_0 : i32, i32
  }
  func.func @transform_5(%arg0: i32) -> (i32, i32) {
    %c0_i32 = arith.constant 0 : i32
    %c0_i32_0 = arith.constant 0 : i32
    %c0_i32_1 = arith.constant 0 : i32
    return %c0_i32, %c0_i32_0 : i32, i32
  }
  func.func @transform_6(%arg0: i32) -> (i32, i32) {
    %c0_i32 = arith.constant 0 : i32
    %c0_i32_0 = arith.constant 0 : i32
    %c0_i32_1 = arith.constant 0 : i32
    return %c0_i32, %c0_i32_0 : i32, i32
  }
  func.func @transform_7(%arg0: i32) -> (i32, i32) {
    %c0_i32 = arith.constant 0 : i32
    %c0_i32_0 = arith.constant 0 : i32
    %c0_i32_1 = arith.constant 0 : i32
    return %c0_i32, %c0_i32_0 : i32, i32
  }
  func.func @transform_8(%arg0: i32) -> (i32, i32) {
    %c0_i32 = arith.constant 0 : i32
    %c0_i32_0 = arith.constant 0 : i32
    %c0_i32_1 = arith.constant 0 : i32
    return %c0_i32, %c0_i32_0 : i32, i32
  }
  func.func @transform_9(%arg0: i32) -> (i32, i32) {
    %c0_i32 = arith.constant 0 : i32
    %c0_i32_0 = arith.constant 0 : i32
    %c0_i32_1 = arith.constant 0 : i32
    return %c0_i32, %c0_i32_0 : i32, i32
  }
  func.func @transform_10(%arg0: i32) -> (i32, i32) {
    %c0_i32 = arith.constant 0 : i32
    %c0_i32_0 = arith.constant 0 : i32
    %c0_i32_1 = arith.constant 0 : i32
    return %c0_i32, %c0_i32_0 : i32, i32
  }
  func.func @transform_11(%arg0: i32) -> (i32, i32, i32) {
    %c0_i32 = arith.constant 0 : i32
    %c0_i32_0 = arith.constant 0 : i32
    %c0_i32_1 = arith.constant 0 : i32
    return %arg0, %c0_i32, %c0_i32_0 : i32, i32, i32
  }
}

</mosaic_0001>

<bundles_post_ra>
// kernel: tpu_custom_call.1
= control target key start
LH: loop header
LB: loop body
LE: loop exit
PB: predicated region body
PF: predicated region fallthrough
CT: control target
= control target key end

     0   :  { %16 = vsyncpa [#allocation3], 0  ;;  %s2838_s0 = inlined_call_operand.hbm [shape: bf16[4,32,48], index: 0, kind: input, shape index: {}]   ;;  %s2839_s1 = inlined_call_operand.hbm [shape: bf16[48,128], index: 1, kind: input, shape index: {}]   ;;  %s2840_s2 = inlined_call_operand.vmem [shape: f32[1,128], index: 2, kind: input, shape index: {}]   ;;  %s2841_s3 = inlined_call_operand.hbm [shape: bf16[384,128], index: 3, kind: input, shape index: {}]   ;;  %s2842_s4 = inlined_call_operand.vmem [shape: f32[1,128], index: 4, kind: input, shape index: {}]   ;;  %s2843_s5 = inlined_call_operand.hbm [shape: bf16[128,128], index: 5, kind: input, shape index: {}]   ;;  %s2844_s6 = inlined_call_operand.vmem [shape: f32[1,128], index: 6, kind: input, shape index: {}]   ;;  %s2845_s7 = inlined_call_operand.hbm [shape: bf16[256,128], index: 7, kind: input, shape index: {}]   ;;  %s2846_s8 = inlined_call_operand.vmem [shape: f32[1,128], index: 8, kind: input, shape index: {}]   ;;  %s2847_s9 = inlined_call_operand.hbm [shape: bf16[128,128], index: 9, kind: input, shape index: {}]   ;;  %s2848_s10 = inlined_call_operand.vmem [shape: f32[1,128], index: 10, kind: input, shape index: {}]   ;;  %s2849_s11 = inlined_call_operand.hbm [shape: f32[4,1,128], index: 11, kind: output, shape index: {}]  }
   0x1   :  { %17 = vsyncpa [#allocation6], 0 }
   0x2   :  { %18 = vsyncpa [#allocation9], 0 }
   0x3   :  { %19 = vsyncpa [#allocation12], 0 }
   0x4   :  { %20 = vsyncpa [#allocation4], 0  ;;  %s2435_s17 = smov [#allocation5]   ;;  %s2436_s19 = smov [#allocation8]  }
   0x5   :  { %s38_s18 = sshll.u32 %s2435_s17, 4  ;;  %s66_s20 = sshll.u32 %s2436_s19, 4  ;;  %s39_s18 = int_to_ptr.vmem [resolvable:$true] %s38_s18  ;;  %s67_s20 = int_to_ptr.vmem [resolvable:$true] %s66_s20 }
   0x6   :  { %s2293_s21 = scalar_lea.vmem %s39_s18, 384  ;;  %p2298_p1 = scmp.lt.s32.totalorder %s39_s18, %s39_s18 }
   0x7   :  { %p2294_p0 = scmp.ne.s32.totalorder %s39_s18, %s2293_s21  ;;  %p2299_p2 = scmp.lt.s32.totalorder %s2293_s21, %s2293_s21 }
   0x9   :  { %p2300_p3 = por %p2299_p2, %p2298_p1 }
   0xb   :  { %p2301_p4 = pnand %p2300_p3, %p2294_p0 }
   0xd   :  { %2304 = shalt.err (!%p2301_p4)
}
   0xe   :  { %s2437_s22 = smov 64   ;;  %s2438_s23 = smov 4  }
   0xf   :  { %44 = dma.hbm_to_vmem [thread:$0]  %s2839_s1, 384, %s39_s18, [#allocation6], %s2437_s22, %s2437_s22, %s2438_s23  }
  0x10   :  { %s2313_s26 = scalar_lea.vmem %s67_s20, 1024  ;;  %p2318_p6 = scmp.lt.s32.totalorder %s67_s20, %s67_s20 }
  0x11   :  { %p2314_p5 = scmp.ne.s32.totalorder %s67_s20, %s2313_s26  ;;  %p2319_p7 = scmp.lt.s32.totalorder %s2313_s26, %s2313_s26 }
  0x13   :  { %p2320_p8 = por %p2319_p7, %p2318_p6 }
  0x15   :  { %p2321_p9 = pnand %p2320_p8, %p2314_p5 }
  0x17   :  { %2324 = shalt.err (!%p2321_p9)
}
  0x18   :  { %72 = dma.hbm_to_vmem [thread:$0]  %s2843_s5, 1024, %s67_s20, [#allocation9], %s2437_s22, %s2437_s22, %s2438_s23  }
  0x19   :  { %s2439_s29 = smov [#allocation2]   ;;  %s2440_s12 = smov [#allocation7]  }
  0x1a   :  { %s26_s30 = sshll.u32 %s2439_s29, 4  ;;  %s52_s13 = sshll.u32 %s2440_s12, 4  ;;  %s27_s30 = int_to_ptr.vmem [resolvable:$true] %s26_s30  ;;  %s53_s13 = int_to_ptr.vmem [resolvable:$true] %s52_s13 }
  0x1b   :  { %s2333_s1 = scalar_lea.vmem %s27_s30, 1024  ;;  %p2338_p11 = scmp.lt.s32.totalorder %s27_s30, %s27_s30 }
  0x1c   :  { %p2334_p10 = scmp.ne.s32.totalorder %s27_s30, %s2333_s1  ;;  %p2339_p12 = scmp.lt.s32.totalorder %s2333_s1, %s2333_s1 }
  0x1e   :  { %p2340_p13 = por %p2339_p12, %p2338_p11 }
  0x20   :  { %p2341_p0 = pnand %p2340_p13, %p2334_p10 }
  0x22   :  { %2344 = shalt.err (!%p2341_p0)
}
  0x23   :  { %32 = dma.hbm_to_vmem [thread:$0]  %s2838_s0, 1024, %s27_s30, [#allocation3], %s2437_s22, %s2437_s22, %s2438_s23  }
  0x24   :  { %s2353_s5 = scalar_lea.vmem %s53_s13, 3072  ;;  %p2358_p2 = scmp.lt.s32.totalorder %s53_s13, %s53_s13 }
  0x25   :  { %p2354_p1 = scmp.ne.s32.totalorder %s53_s13, %s2353_s5  ;;  %p2359_p3 = scmp.lt.s32.totalorder %s2353_s5, %s2353_s5 }
  0x27   :  { %p2360_p4 = por %p2359_p3, %p2358_p2 }
  0x29   :  { %p2361_p5 = pnand %p2360_p4, %p2354_p1 }
  0x2b   :  { %2364 = shalt.err (!%p2361_p5)
}
  0x2c   :  { %58 = dma.hbm_to_vmem [thread:$0]  %s2841_s3, 3072, %s53_s13, [#allocation6], %s2437_s22, %s2437_s22, %s2438_s23  }
  0x2d   :  { %s2441_s18 = smov [#allocation10]   ;;  %s2442_s20 = smov [#allocation11]  }
  0x2e   :  { %s80_s19 = sshll.u32 %s2441_s18, 4  ;;  %s94_s21 = sshll.u32 %s2442_s20, 4  ;;  %s81_s19 = int_to_ptr.vmem [resolvable:$true] %s80_s19  ;;  %s95_s21 = int_to_ptr.vmem [resolvable:$true] %s94_s21 }
  0x2f   :  { %s2373_s0 = scalar_lea.vmem %s81_s19, 2048  ;;  %p2378_p7 = scmp.lt.s32.totalorder %s81_s19, %s81_s19 }
  0x30   :  { %p2374_p6 = scmp.ne.s32.totalorder %s81_s19, %s2373_s0  ;;  %p2379_p8 = scmp.lt.s32.totalorder %s2373_s0, %s2373_s0 }
  0x32   :  { %p2380_p9 = por %p2379_p8, %p2378_p7 }
  0x34   :  { %p2381_p10 = pnand %p2380_p9, %p2374_p6 }
  0x36   :  { %2384 = shalt.err (!%p2381_p10)
}
  0x37   :  { %86 = dma.hbm_to_vmem [thread:$0]  %s2845_s7, 2048, %s81_s19, [#allocation9], %s2437_s22, %s2437_s22, %s2438_s23  }
  0x38   :  { %s2393_s3 = scalar_lea.vmem %s95_s21, 1024  ;;  %p2398_p12 = scmp.lt.s32.totalorder %s95_s21, %s95_s21 }
  0x39   :  { %p2394_p11 = scmp.ne.s32.totalorder %s95_s21, %s2393_s3  ;;  %p2399_p13 = scmp.lt.s32.totalorder %s2393_s3, %s2393_s3 }
  0x3b   :  { %p2400_p0 = por %p2399_p13, %p2398_p12 }
  0x3d   :  { %p2401_p1 = pnand %p2400_p0, %p2394_p11 }
  0x3f   :  { %2404 = shalt.err (!%p2401_p1)
}
  0x40   :  { %100 = dma.hbm_to_vmem [thread:$0]  %s2847_s9, 1024, %s95_s21, [#allocation12], %s2437_s22, %s2437_s22, %s2438_s23  }
  0x41   :  { %2425 = dma.done.wait [#allocation3], 1024  }
  0x42   :  { %2426 = vsyncadd [#allocation3], 4294966272 }
  0x43   :  { %2427 = dma.done.wait [#allocation6], 3456  }
  0x44   :  { %2428 = vsyncadd [#allocation6], 4294963840 }
  0x45   :  { %2429 = dma.done.wait [#allocation9], 3072  }
  0x46   :  { %2430 = vsyncadd [#allocation9], 4294964224 }
  0x47   :  { %2431 = dma.done.wait [#allocation12], 1024  }
  0x48   :  { %2432 = vsyncadd [#allocation12], 4294966272  ;;  %v2210_v0 = vld [vmem:[#allocation5 + $0x10] sm:$0xff]   ;;  %v2211_v1 = vld [vmem:[#allocation5 + $0x8] sm:$0xff]   ;;  %vm209_vm0 = vcmask 392192   ;;  %vm596_vm1 = vcmask 1046528  }
  0x49   :  { %1985 = vmatprep.subr.bf16.mxu0 %v2210_v0  ;;  %v2213_v2 = vld [vmem:[#allocation2] sm:$0xff]   ;;  %v2214_v4 = vld [vmem:[#allocation2 + $0x8] sm:$0xff]   ;;  %v2215_v5 = vld [vmem:[#allocation2 + $0x10] sm:$0xff]   ;;  %vm783_vm2 = vcmask 1045504   ;;  %vm2445_vm3 = vmmov 0   ;;  %vm1431_vm5 = vcmask 1041409  }
  0x4a   :  { %1986 = vmatpush3.bf16.msra.mxu0 %v2210_v0  ;;  %v2212_v3 = vld [vmem:[#allocation5] sm:$0xff]   ;;  %1991 = vmatprep.mubr.msk.bf16.mxu0 %vm209_vm0, %v2213_v2  ;;  %v2221_v6 = vld [vmem:[#allocation7 + $0x38] sm:$0xff]   ;;  %v2222_v7 = vld [vmem:[#allocation7 + $0x30] sm:$0xff]   ;;  %vm1433_vm6 = vcmask 1042434   ;;  %vm1435_vm7 = vcmask 1043459  }
  0x4b   :  { %1987 = vmatprep.subr.bf16.mxu0 %v2211_v1  ;;  %2007 = vmatprep.subr.bf16.mxu1 %v2221_v6  ;;  %v2224_v8 = vld [vmem:[#allocation7 + $0x78] sm:$0xff]   ;;  %v2223_v9 = vld [vmem:[#allocation7 + $0x28] sm:$0xff]   ;;  %v2216_v10 = vld [vmem:[#allocation2 + $0x18] sm:$0xff]  }
  0x4c   :  { %2008 = vmatpush3.bf16.msra.mxu1 %v2221_v6  ;;  %v2226_v11 = vld [vmem:[#allocation7 + $0x70] sm:$0xff]   ;;  %v2217_v12 = vld [vmem:[#allocation2 + $0x20] sm:$0xff]   ;;  %v2225_v13 = vld [vmem:[#allocation7 + $0x20] sm:$0xff]  }
  0x4d   :  { %2009 = vmatprep.subr.bf16.mxu1 %v2222_v7  ;;  %v2227_v14 = vld [vmem:[#allocation7 + $0x18] sm:$0xff]   ;;  %v2218_v15 = vld [vmem:[#allocation2 + $0x28] sm:$0xff]   ;;  %v2220_v17 = vld [vmem:[#allocation2 + $0x38] sm:$0xff]  }
  0x4e   :  { %1988 = vmatpush3.bf16.msra.mxu0 %v2211_v1  ;;  %v2219_v16 = vld [vmem:[#allocation2 + $0x30] sm:$0xff]   ;;  %v2228_v18 = vld [vmem:[#allocation7 + $0x68] sm:$0xff]   ;;  %v2229_v19 = vld [vmem:[#allocation7 + $0x10] sm:$0xff]  }
  0x4f   :  { %1989 = vmatprep.subr.bf16.mxu0 %v2212_v3  ;;  %v2230_v20 = vld [vmem:[#allocation7 + $0x60] sm:$0xff]   ;;  %v2231_v21 = vld [vmem:[#allocation7 + $0x8] sm:$0xff]   ;;  %v2232_v22 = vld [vmem:[#allocation7 + $0x58] sm:$0xff]  }
  0x50   :  { %2010 = vmatpush3.bf16.msra.mxu1 %v2222_v7  ;;  %v2233_v23 = vld [vmem:[#allocation7] sm:$0xff]   ;;  %v2234_v24 = vld [vmem:[#allocation7 + $0x50] sm:$0xff]   ;;  %v2235_v25 = vld [vmem:[#allocation7 + $0xb8] sm:$0xff]  }
  0x51   :  { %2011 = vmatprep.subr.bf16.mxu1 %v2223_v9  ;;  %v2236_v26 = vld [vmem:[#allocation7 + $0x48] sm:$0xff]   ;;  %v2238_v27 = vld [vmem:[#allocation7 + $0x40] sm:$0xff]   ;;  %v2237_v47 = vld [vmem:[#allocation7 + $0xb0] sm:$0xff]  }
  0x52   :  { %1990 = vmatpush3.bf16.msra.mxu0 %v2212_v3  ;;  %v2557_v28 = vld [vmem:[%s2840_s2] ss:$0 sm:$0xff]  ;;  %v2240_v2 = vld [vmem:[#allocation7 + $0xa0] sm:$0xff]  }
  0x53   :  { %2039 = vmatprep.subr.bf16.mxu0 %v2224_v8  ;;  %v2239_v58 = vld [vmem:[#allocation7 + $0xa8] sm:$0xff]  }
  0x54   :  { %2012 = vmatpush3.bf16.msra.mxu1 %v2223_v9 }
  0x55   :  { %1992 = vmatmul.mubr.msk.bf16.vlgmr.msra.gmra.mxu0 %vm209_vm0, %v2214_v4  ;;  %2013 = vmatprep.subr.bf16.mxu1 %v2225_v13 }
  0x56   :  { %1995 = vmatprep.mubr.msk.bf16.mxu0 %vm209_vm0, %v2215_v5  ;;  %2040 = vmatpush3.bf16.msra.mxu0 %v2224_v8 }
  0x57   :  { %2041 = vmatprep.subr.bf16.mxu0 %v2226_v11 }
  0x58   :  { %2014 = vmatpush3.bf16.msra.mxu1 %v2225_v13 }
  0x59   :  { %2015 = vmatprep.subr.bf16.mxu1 %v2227_v14 }
  0x5a   :  { %2042 = vmatpush3.bf16.msra.mxu0 %v2226_v11 }
  0x5b   :  { %2043 = vmatprep.subr.bf16.mxu0 %v2228_v18 }
  0x5c   :  { %2016 = vmatpush3.bf16.msra.mxu1 %v2227_v14  ;;  %v2241_v14 = vld [vmem:[#allocation7 + $0x98] sm:$0xff]  }
  0x5d   :  { %1996 = vmatmul.mubr.msk.bf16.gmra.mxu0 %vm209_vm0, %v2216_v10  ;;  %2017 = vmatprep.subr.bf16.mxu1 %v2229_v19 }
  0x5e   :  { %1999 = vmatprep.mubr.msk.bf16.mxu0 %vm209_vm0, %v2217_v12  ;;  %2044 = vmatpush3.bf16.msra.mxu0 %v2228_v18 }
  0x5f   :  { %2045 = vmatprep.subr.bf16.mxu0 %v2230_v20 }
  0x60   :  { %2018 = vmatpush3.bf16.msra.mxu1 %v2229_v19 }
  0x61   :  { %2019 = vmatprep.subr.bf16.mxu1 %v2231_v21 }
  0x62   :  { %2046 = vmatpush3.bf16.msra.mxu0 %v2230_v20 }
  0x63   :  { %2047 = vmatprep.subr.bf16.mxu0 %v2232_v22 }
  0x64   :  { %2020 = vmatpush3.bf16.msra.mxu1 %v2231_v21 }
  0x65   :  { %2000 = vmatmul.mubr.msk.bf16.gmra.mxu0 %vm209_vm0, %v2218_v15  ;;  %2021 = vmatprep.subr.bf16.mxu1 %v2233_v23 }
  0x66   :  { %2003 = vmatprep.mubr.msk.bf16.mxu0 %vm209_vm0, %v2219_v16  ;;  %2048 = vmatpush3.bf16.msra.mxu0 %v2232_v22  ;;  %v2242_v22 = vld [vmem:[#allocation7 + $0x90] sm:$0xff]  }
  0x67   :  { %2049 = vmatprep.subr.bf16.mxu0 %v2234_v24 }
  0x68   :  { %2022 = vmatpush3.bf16.msra.mxu1 %v2233_v23 }
  0x69   :  { %2071 = vmatprep.subr.bf16.mxu1 %v2235_v25 }
  0x6a   :  { %2050 = vmatpush3.bf16.msra.mxu0 %v2234_v24 }
  0x6b   :  { %2051 = vmatprep.subr.bf16.mxu0 %v2236_v26 }
  0x6d   :  { %2004 = vmatmul.mubr.msk.bf16.gmra.mxu0 %vm209_vm0, %v2220_v17 }
  0x6e   :  { %2052 = vmatpush3.bf16.msra.mxu0 %v2236_v26 }
  0x6f   :  { %2053 = vmatprep.subr.bf16.mxu0 %v2238_v27 }
  0x72   :  { %2054 = vmatpush3.bf16.msra.mxu0 %v2238_v27 }
 0x115   :  { %v1993_v29 = vpop.f32.mrf.mxu0 }
 0x116   :  { %v333_v31 = vadd.f32 %v1993_v29, %v2557_v28 }
 0x117   :  { %v268_v30 = vpop.f32.mrf.mxu0 }
 0x118   :  { %v331_v33 = vadd.f32 %v2557_v28, %v268_v30  ;;  %v349_v36 = vmax.f32 %v333_v31, 0.0 }
 0x119   :  { %v1994_v32 = vpop.f32.mrf.mxu0 }
 0x11a   :  { %v334_v34 = vadd.f32 %v1994_v32, %v2557_v28  ;;  %v347_v40 = vmax.f32 %v331_v33, 0.0 }
 0x11b   :  { %v271_v35 = vpop.f32.mrf.mxu0 }
 0x11c   :  { %v350_v37 = vmax.f32 %v334_v34, 0.0  ;;  %v332_v38 = vadd.f32 %v2557_v28, %v271_v35  ;;  %v2243_v34 = vld [vmem:[#allocation7 + $0x88] sm:$0xff]  }
 0x11d   :  { %v1997_v39 = vpop.f32.mrf.mxu0 }
 0x11e   :  { %v2563_v41 = vpack.c.bf16 %v350_v37, %v349_v36  ;;  %v348_v42 = vmax.f32 %v332_v38, 0.0  ;;  %v337_v45 = vadd.f32 %v1997_v39, %v2557_v28 }
 0x11f   :  { %v284_v43 = vpop.f32.mrf.mxu0 }
 0x120   :  { %v2565_v44 = vpack.c.bf16 %v348_v42, %v347_v40  ;;  %v335_v48 = vadd.f32 %v2557_v28, %v284_v43  ;;  %v598_v51 = vrot.slane %v2563_v41, 1  ;;  %v353_v53 = vmax.f32 %v337_v45, 0.0  ;;  %v2244_v40 = vld [vmem:[#allocation7 + $0x80] sm:$0xff]  }
 0x121   :  { %v1998_v46 = vpop.f32.mrf.mxu0 }
 0x122   :  { %v338_v49 = vadd.f32 %v1998_v46, %v2557_v28  ;;  %2023 = vmatprep.mubr.bf16.mxu1 %v2565_v44  ;;  %v597_v50 = vrot.slane %v2565_v44, 1  ;;  %v351_v59 = vmax.f32 %v335_v48, 0.0  ;;  %v784_v38 = vrot.slane %v2565_v44, 2 }
 0x123   :  { %v287_v52 = vpop.f32.mrf.mxu0  ;;  %2024 = vmatmul.mubr.bf16.vlgmr.msra.gmra.mxu1 %v2563_v41 }
 0x124   :  { %v354_v54 = vmax.f32 %v338_v49, 0.0  ;;  %v336_v55 = vadd.f32 %v2557_v28, %v287_v52  ;;  %2072 = vmatpush3.bf16.msra.mxu1 %v2235_v25  ;;  %v599_v56 = vsel %vm596_vm1, %v597_v50, %v598_v51 }
 0x125   :  { %v2001_v57 = vpop.f32.mrf.mxu0  ;;  %2055 = vmatprep.mubr.bf16.mxu0 %v599_v56  ;;  %2073 = vmatprep.subr.bf16.mxu1 %v2237_v47 }
 0x126   :  { %v2576_v60 = vpack.c.bf16 %v354_v54, %v353_v53  ;;  %v352_v61 = vmax.f32 %v336_v55, 0.0  ;;  %v341_v62 = vadd.f32 %v2001_v57, %v2557_v28 }
 0x127   :  { %v300_v63 = vpop.f32.mrf.mxu0 }
 0x128   :  { %v2579_v0 = vpack.c.bf16 %v352_v61, %v351_v59  ;;  %2074 = vmatpush3.bf16.msra.mxu1 %v2237_v47  ;;  %v339_v4 = vadd.f32 %v2557_v28, %v300_v63  ;;  %v602_v6 = vrot.slane %v2576_v60, 1  ;;  %v357_v7 = vmax.f32 %v341_v62, 0.0  ;;  %v2245_v63 = vld [vmem:[#allocation8 + $0x38] sm:$0xff]  }
 0x129   :  { %v2002_v1 = vpop.f32.mrf.mxu0  ;;  %2075 = vmatprep.subr.bf16.mxu1 %v2239_v58  ;;  %v789_v49 = vrot.slane %v2576_v60, 2  ;;  %2103 = vmatprep.subr.bf16.mxu0 %v2245_v63 }
 0x12a   :  { %v600_v3 = vrot.slane %v2579_v0, 1  ;;  %v342_v5 = vadd.f32 %v2002_v1, %v2557_v28  ;;  %2027 = vmatprep.mubr.bf16.mxu1 %v2579_v0  ;;  %v355_v15 = vmax.f32 %v339_v4, 0.0  ;;  %v787_v44 = vrot.slane %v2579_v0, 2  ;;  %v2246_v0 = vld [vmem:[#allocation8 + $0x30] sm:$0xff]   ;;  %v2247_v1 = vld [vmem:[#allocation8 + $0x28] sm:$0xff]  }
 0x12b   :  { %v303_v8 = vpop.f32.mrf.mxu0  ;;  %2028 = vmatmul.mubr.bf16.gmra.mxu1 %v2576_v60  ;;  %v2250_v4 = vld [vmem:[#allocation8 + $0x10] sm:$0xff]  }
 0x12c   :  { %v358_v9 = vmax.f32 %v342_v5, 0.0  ;;  %v340_v10 = vadd.f32 %v2557_v28, %v303_v8  ;;  %2076 = vmatpush3.bf16.msra.mxu1 %v2239_v58  ;;  %v601_v11 = vsel %vm596_vm1, %v598_v51, %v600_v3  ;;  %v603_v12 = vsel %vm596_vm1, %v600_v3, %v602_v6  ;;  %v2249_v3 = vld [vmem:[#allocation8 + $0x18] sm:$0xff]   ;;  %v2251_v5 = vld [vmem:[#allocation8 + $0x8] sm:$0xff]  }
 0x12d   :  { %v2005_v13 = vpop.f32.mrf.mxu0  ;;  %2056 = vmatmul.mubr.bf16.vlgmr.msra.gmra.mxu0 %v601_v11  ;;  %2077 = vmatprep.subr.bf16.mxu1 %v2240_v2  ;;  %v790_v51 = vsel %vm783_vm2, %v787_v44, %v789_v49 }
 0x12e   :  { %v2590_v16 = vpack.c.bf16 %v358_v9, %v357_v7  ;;  %v356_v17 = vmax.f32 %v340_v10, 0.0  ;;  %2059 = vmatprep.mubr.bf16.mxu0 %v603_v12  ;;  %v345_v18 = vadd.f32 %v2005_v13, %v2557_v28  ;;  %2104 = vmatpush3.bf16.msra.mxu0 %v2245_v63 }
 0x12f   :  { %v316_v19 = vpop.f32.mrf.mxu0  ;;  %2105 = vmatprep.subr.bf16.mxu0 %v2246_v0 }
 0x130   :  { %v415_v20 = vpack.c.bf16 %v356_v17, %v355_v15  ;;  %2078 = vmatpush3.bf16.msra.mxu1 %v2240_v2  ;;  %v343_v23 = vadd.f32 %v2557_v28, %v316_v19  ;;  %v606_v26 = vrot.slane %v2590_v16, 1  ;;  %v361_v27 = vmax.f32 %v345_v18, 0.0  ;;  %v2248_v2 = vld [vmem:[#allocation8 + $0x20] sm:$0xff]  }
 0x131   :  { %v2006_v21 = vpop.f32.mrf.mxu0  ;;  %2079 = vmatprep.subr.bf16.mxu1 %v2241_v14  ;;  %v793_v54 = vrot.slane %v2590_v16, 2 }
 0x132   :  { %v346_v24 = vadd.f32 %v2006_v21, %v2557_v28  ;;  %2031 = vmatprep.mubr.bf16.mxu1 %v415_v20  ;;  %v604_v25 = vrot.slane %v415_v20, 1  ;;  %v359_v35 = vmax.f32 %v343_v23, 0.0  ;;  %v791_v53 = vrot.slane %v415_v20, 2  ;;  %2106 = vmatpush3.bf16.msra.mxu0 %v2246_v0 }
 0x133   :  { %v319_v29 = vpop.f32.mrf.mxu0  ;;  %2032 = vmatmul.mubr.bf16.gmra.mxu1 %v2590_v16  ;;  %2107 = vmatprep.subr.bf16.mxu0 %v2247_v1 }
 0x134   :  { %v362_v30 = vmax.f32 %v346_v24, 0.0  ;;  %v344_v31 = vadd.f32 %v2557_v28, %v319_v29  ;;  %2080 = vmatpush3.bf16.msra.mxu1 %v2241_v14  ;;  %v605_v32 = vsel %vm596_vm1, %v602_v6, %v604_v25  ;;  %v607_v33 = vsel %vm596_vm1, %v604_v25, %v606_v26  ;;  %v2252_v6 = vld [vmem:[#allocation8] sm:$0xff]  }
 0x135   :  { %2060 = vmatmul.mubr.bf16.gmra.mxu0 %v605_v32  ;;  %2081 = vmatprep.subr.bf16.mxu1 %v2242_v22  ;;  %v785_v28 = vrot.slane %v2563_v41, 2  ;;  %v2443_v41 = vmov 0   ;;  %v792_v55 = vsel %vm783_vm2, %v789_v49, %v791_v53  ;;  %v794_v56 = vsel %vm783_vm2, %v791_v53, %v793_v54 }
 0x136   :  { %v418_v36 = vpack.c.bf16 %v362_v30, %v361_v27  ;;  %v360_v37 = vmax.f32 %v344_v31, 0.0  ;;  %2063 = vmatprep.mubr.bf16.mxu0 %v607_v33  ;;  %v612_v48 = vrot.slane %v2443_v41, 1  ;;  %v799_v61 = vrot.slane %v2443_v41, 2  ;;  %2108 = vmatpush3.bf16.msra.mxu0 %v2247_v1  ;;  %v2631_v33 = vld [vmem:[%s2842_s4] ss:$0 sm:$0xff] }
 0x137   :  { %v786_v45 = vsel %vm783_vm2, %v784_v38, %v785_v28  ;;  %v788_v50 = vsel %vm783_vm2, %v785_v28, %v787_v44  ;;  %2109 = vmatprep.subr.bf16.mxu0 %v2248_v2 }
 0x138   :  { %v417_v39 = vpack.c.bf16 %v360_v37, %v359_v35  ;;  %2082 = vmatpush3.bf16.msra.mxu1 %v2242_v22  ;;  %v610_v43 = vrot.slane %v418_v36, 1  ;;  %v797_v58 = vrot.slane %v418_v36, 2 }
 0x139   :  { %2083 = vmatprep.subr.bf16.mxu1 %v2243_v34 }
 0x13a   :  { %2035 = vmatprep.mubr.bf16.mxu1 %v417_v39  ;;  %v608_v42 = vrot.slane %v417_v39, 1  ;;  %v613_v52 = vsel %vm596_vm1, %v610_v43, %v612_v48  ;;  %v795_v57 = vrot.slane %v417_v39, 2  ;;  %v800_v62 = vsel %vm783_vm2, %v797_v58, %v799_v61  ;;  %2110 = vmatpush3.bf16.msra.mxu0 %v2248_v2 }
 0x13b   :  { %2036 = vmatmul.mubr.bf16.gmra.mxu1 %v418_v36  ;;  %2111 = vmatprep.subr.bf16.mxu0 %v2249_v3 }
 0x13c   :  { %2084 = vmatpush3.bf16.msra.mxu1 %v2243_v34  ;;  %2087 = vmatprep.mubr.bf16.mxu1 %v786_v45  ;;  %v609_v46 = vsel %vm596_vm1, %v606_v26, %v608_v42  ;;  %v611_v47 = vsel %vm596_vm1, %v608_v42, %v610_v43  ;;  %v796_v59 = vsel %vm783_vm2, %v793_v54, %v795_v57 }
 0x13d   :  { %2064 = vmatmul.mubr.bf16.gmra.mxu0 %v609_v46  ;;  %2085 = vmatprep.subr.bf16.mxu1 %v2244_v40  ;;  %v798_v60 = vsel %vm783_vm2, %v795_v57, %v797_v58 }
 0x13e   :  { %2067 = vmatprep.mubr.bf16.mxu0 %v611_v47  ;;  %2112 = vmatpush3.bf16.msra.mxu0 %v2249_v3 }
 0x13f   :  { %2113 = vmatprep.subr.bf16.mxu0 %v2250_v4 }
 0x140   :  { %2086 = vmatpush3.bf16.msra.mxu1 %v2244_v40 }
 0x142   :  { %2114 = vmatpush3.bf16.msra.mxu0 %v2250_v4 }
 0x143   :  { %2088 = vmatmul.mubr.bf16.vlgmr.msra.gmra.mxu1 %v788_v50  ;;  %2115 = vmatprep.subr.bf16.mxu0 %v2251_v5 }
 0x144   :  { %2091 = vmatprep.mubr.bf16.mxu1 %v790_v51 }
 0x145   :  { %2068 = vmatmul.mubr.bf16.gmra.mxu0 %v613_v52 }
 0x146   :  { %2116 = vmatpush3.bf16.msra.mxu0 %v2251_v5 }
 0x147   :  { %2117 = vmatprep.subr.bf16.mxu0 %v2252_v6 }
 0x14a   :  { %2118 = vmatpush3.bf16.msra.mxu0 %v2252_v6 }
 0x14b   :  { %2092 = vmatmul.mubr.bf16.gmra.mxu1 %v792_v55 }
 0x14c   :  { %2095 = vmatprep.mubr.bf16.mxu1 %v794_v56 }
 0x153   :  { %2096 = vmatmul.mubr.bf16.gmra.mxu1 %v796_v59 }
 0x154   :  { %2099 = vmatprep.mubr.bf16.mxu1 %v798_v60 }
 0x15b   :  { %2100 = vmatmul.mubr.bf16.gmra.mxu1 %v800_v62 }
 0x1e3   :  { %v2025_v7 = vpop.f32.mrf.mxu1 }
 0x1e4   :  { %v573_v37 = vadd.f32 %v2025_v7, %v2631_v33 }
 0x1e5   :  { %v508_v8 = vpop.f32.mrf.mxu1 }
 0x1e6   :  { %v571_v35 = vadd.f32 %v2631_v33, %v508_v8 }
 0x1e7   :  { %v2026_v9 = vpop.f32.mrf.mxu1 }
 0x1e8   :  { %v574_v36 = vadd.f32 %v2026_v9, %v2631_v33 }
 0x1e9   :  { %v511_v10 = vpop.f32.mrf.mxu1 }
 0x1ea   :  { %v572_v28 = vadd.f32 %v2631_v33, %v511_v10 }
 0x1eb   :  { %v2029_v11 = vpop.f32.mrf.mxu1 }
 0x1ec   :  { %v577_v57 = vadd.f32 %v2029_v11, %v2631_v33 }
 0x1ed   :  { %v524_v12 = vpop.f32.mrf.mxu1  ;;  %v2057_v13 = vpop.f32.mrf.mxu0 }
 0x1ee   :  { %v769_v43 = vadd.f32 %v2057_v13, %v573_v37  ;;  %v575_v53 = vadd.f32 %v2631_v33, %v524_v12 }
 0x1ef   :  { %v2030_v14 = vpop.f32.mrf.mxu1  ;;  %v704_v15 = vpop.f32.mrf.mxu0 }
 0x1f0   :  { %v767_v40 = vadd.f32 %v704_v15, %v571_v35  ;;  %v578_v54 = vadd.f32 %v2030_v14, %v2631_v33 }
 0x1f1   :  { %v527_v16 = vpop.f32.mrf.mxu1  ;;  %v2058_v17 = vpop.f32.mrf.mxu0 }
 0x1f2   :  { %v770_v42 = vadd.f32 %v2058_v17, %v574_v36  ;;  %v576_v61 = vadd.f32 %v2631_v33, %v527_v16 }
 0x1f3   :  { %v2616_v18 = vpop.f32.mrf.mxu1  ;;  %v707_v19 = vpop.f32.mrf.mxu0 }
 0x1f4   :  { %v768_v46 = vadd.f32 %v707_v19, %v572_v28  ;;  %v581_v17 = vadd.f32 %v2616_v18, %v2631_v33 }
 0x1f5   :  { %v540_v20 = vpop.f32.mrf.mxu1  ;;  %v2061_v21 = vpop.f32.mrf.mxu0 }
 0x1f6   :  { %v773_v1 = vadd.f32 %v2061_v21, %v577_v57  ;;  %v579_v13 = vadd.f32 %v2631_v33, %v540_v20 }
 0x1f7   :  { %v2034_v22 = vpop.f32.mrf.mxu1  ;;  %v720_v23 = vpop.f32.mrf.mxu0 }
 0x1f8   :  { %v771_v62 = vadd.f32 %v720_v23, %v575_v53  ;;  %v582_v14 = vadd.f32 %v2034_v22, %v2631_v33 }
 0x1f9   :  { %v2618_v24 = vpop.f32.mrf.mxu1  ;;  %v2062_v25 = vpop.f32.mrf.mxu0 }
 0x1fa   :  { %v774_v63 = vadd.f32 %v2062_v25, %v578_v54  ;;  %v580_v25 = vadd.f32 %v2631_v33, %v2618_v24 }
 0x1fb   :  { %v2620_v26 = vpop.f32.mrf.mxu1  ;;  %v723_v27 = vpop.f32.mrf.mxu0 }
 0x1fc   :  { %v772_v4 = vadd.f32 %v723_v27, %v576_v61 }
 0x1fd   :  { %v2622_v29 = vpop.f32.mrf.mxu1  ;;  %v2065_v31 = vpop.f32.mrf.mxu0 }
 0x1fe   :  { %v777_v36 = vadd.f32 %v2065_v31, %v581_v17  ;;  %v583_v24 = vadd.f32 %v2631_v33, %v2622_v29  ;;  %v1194_v17 = vlaneseq }
 0x1ff   :  { %v2624_v30 = vpop.f32.mrf.mxu1  ;;  %v736_v38 = vpop.f32.mrf.mxu0 }
 0x200   :  { %v775_v27 = vadd.f32 %v736_v38, %v579_v13  ;;  %v586_v38 = vadd.f32 %v2624_v30, %v2631_v33  ;;  %v2265_v13 = vld [vmem:[#allocation10 + $0x58] sm:$0xff]  }
 0x201   :  { %v2626_v32 = vpop.f32.mrf.mxu1  ;;  %v2066_v41 = vpop.f32.mrf.mxu0 }
 0x203   :  { %v2089_v34 = vpop.f32.mrf.mxu1  ;;  %v739_v58 = vpop.f32.mrf.mxu0 }
 0x204   :  { %v956_v48 = vadd.f32 %v2089_v34, %v769_v43  ;;  %v778_v34 = vadd.f32 %v2066_v41, %v582_v14  ;;  %v776_v20 = vadd.f32 %v739_v58, %v580_v25  ;;  %v2266_v14 = vld [vmem:[#allocation10 + $0x50] sm:$0xff]   ;;  %v2681_v25 = vld [vmem:[%s2844_s6] ss:$0 sm:$0xff] }
 0x205   :  { %v891_v39 = vpop.f32.mrf.mxu1  ;;  %v2069_v7 = vpop.f32.mrf.mxu0 }
 0x206   :  { %v954_v47 = vadd.f32 %v891_v39, %v767_v40  ;;  %v972_v59 = vmax.f32 %v956_v48, 0.0 }
 0x207   :  { %v2090_v45 = vpop.f32.mrf.mxu1  ;;  %v752_v19 = vpop.f32.mrf.mxu0 }
 0x208   :  { %v957_v44 = vadd.f32 %v2090_v45, %v770_v42  ;;  %v970_v55 = vmax.f32 %v954_v47, 0.0 }
 0x209   :  { %v894_v49 = vpop.f32.mrf.mxu1  ;;  %v2070_v40 = vpop.f32.mrf.mxu0 }
 0x20a   :  { %v955_v50 = vadd.f32 %v894_v49, %v768_v46  ;;  %v973_v51 = vmax.f32 %v957_v44, 0.0  ;;  %v585_v44 = vadd.f32 %v2620_v26, %v2631_v33 }
 0x20b   :  { %v2093_v52 = vpop.f32.mrf.mxu1  ;;  %v755_v41 = vpop.f32.mrf.mxu0 }
 0x20c   :  { %v971_v56 = vmax.f32 %v955_v50, 0.0  ;;  %v1003_v2 = vpack.c.bf16 %v973_v51, %v972_v59  ;;  %v960_v8 = vadd.f32 %v2093_v52, %v773_v1  ;;  %v584_v50 = vadd.f32 %v2631_v33, %v2626_v32  ;;  %v2253_v33 = vld [vmem:[#allocation10 + $0x38] sm:$0xff]  }
 0x20d   :  { %v907_v60 = vpop.f32.mrf.mxu1  ;;  %v779_v51 = vadd.f32 %v752_v19, %v583_v24  ;;  %v782_v52 = vadd.f32 %v2070_v40, %v586_v38  ;;  %v781_v54 = vadd.f32 %v2069_v7, %v585_v44  ;;  %v2444_v1 = vmov 0.0   ;;  %v2259_v7 = vld [vmem:[#allocation10 + $0x8] sm:$0xff]  }
 0x20e   :  { %v1002_v0 = vpack.c.bf16 %v971_v56, %v970_v55  ;;  %v958_v5 = vadd.f32 %v907_v60, %v771_v62  ;;  %v976_v21 = vmax.f32 %v960_v8, 0.0  ;;  %v780_v56 = vadd.f32 %v755_v41, %v584_v50  ;;  %2155 = vmatprep.subr.bf16.mxu0 %v2444_v1  ;;  %2135 = vmatprep.subr.bf16.mxu1 %v2444_v1  ;;  %v2260_v8 = vld [vmem:[#allocation10] sm:$0xff]  }
 0x20f   :  { %v2094_v3 = vpop.f32.mrf.mxu1  ;;  %2151 = vmatprep.mubr.msk.bf16.mxu1 %vm2445_vm3, %v2444_v1 }
 0x210   :  { %v961_v6 = vadd.f32 %v2094_v3, %v774_v63  ;;  %2119 = vmatprep.mubr.bf16.mxu0 %v1002_v0  ;;  %v974_v15 = vmax.f32 %v958_v5, 0.0  ;;  %v2255_v3 = vld [vmem:[#allocation10 + $0x28] sm:$0xff]   ;;  %v2257_v5 = vld [vmem:[#allocation10 + $0x18] sm:$0xff]  }
 0x211   :  { %v910_v9 = vpop.f32.mrf.mxu1  ;;  %2120 = vmatmul.mubr.bf16.vlgmr.msra.gmra.mxu0 %v1003_v2  ;;  %v2254_v2 = vld [vmem:[#allocation10 + $0x30] sm:$0xff]  }
 0x212   :  { %v959_v10 = vadd.f32 %v910_v9, %v772_v4  ;;  %v977_v11 = vmax.f32 %v961_v6, 0.0  ;;  %2156 = vmatpush3.bf16.msra.mxu0 %v2253_v33  ;;  %v2256_v4 = vld [vmem:[#allocation10 + $0x20] sm:$0xff]   ;;  %v2258_v6 = vld [vmem:[#allocation10 + $0x10] sm:$0xff]   ;;  %v2261_v9 = vld [vmem:[#allocation10 + $0x78] sm:$0xff]  }
 0x213   :  { %v2097_v12 = vpop.f32.mrf.mxu1  ;;  %2157 = vmatprep.subr.bf16.mxu0 %v2444_v1  ;;  %2136 = vmatpush3.bf16.msra.mxu1 %v2261_v9 }
 0x214   :  { %v975_v16 = vmax.f32 %v959_v10, 0.0  ;;  %v1005_v37 = vpack.c.bf16 %v977_v11, %v976_v21  ;;  %v964_v42 = vadd.f32 %v2097_v12, %v777_v36  ;;  %2137 = vmatprep.subr.bf16.mxu1 %v2444_v1  ;;  %v2262_v10 = vld [vmem:[#allocation10 + $0x70] sm:$0xff]   ;;  %v2263_v11 = vld [vmem:[#allocation10 + $0x68] sm:$0xff]   ;;  %v2264_v12 = vld [vmem:[#allocation10 + $0x60] sm:$0xff]  }
 0x215   :  { %v923_v23 = vpop.f32.mrf.mxu1 }
 0x216   :  { %v1004_v35 = vpack.c.bf16 %v975_v16, %v974_v15  ;;  %v962_v28 = vadd.f32 %v923_v23, %v775_v27  ;;  %v980_v48 = vmax.f32 %v964_v42, 0.0  ;;  %2158 = vmatpush3.bf16.msra.mxu0 %v2254_v2  ;;  %v2267_v15 = vld [vmem:[#allocation10 + $0x48] sm:$0xff]   ;;  %v2268_v16 = vld [vmem:[#allocation10 + $0x40] sm:$0xff]   ;;  %v2676_v23 = vshrl.u32 %v1194_v17, 7 }
 0x217   :  { %v2098_v39 = vpop.f32.mrf.mxu1  ;;  %2159 = vmatprep.subr.bf16.mxu0 %v2444_v1  ;;  %2138 = vmatpush3.bf16.msra.mxu1 %v2262_v10 }
 0x218   :  { %v965_v22 = vadd.f32 %v2098_v39, %v778_v34  ;;  %2123 = vmatprep.mubr.bf16.mxu0 %v1004_v35  ;;  %v978_v31 = vmax.f32 %v962_v28, 0.0  ;;  %2139 = vmatprep.subr.bf16.mxu1 %v2444_v1  ;;  %v2691_v39 = vadd.s32 24, %v2676_v23 }
 0x219   :  { %v926_v43 = vpop.f32.mrf.mxu1  ;;  %2124 = vmatmul.mubr.bf16.gmra.mxu0 %v1005_v37 }
 0x21a   :  { %v963_v18 = vadd.f32 %v926_v43, %v776_v20  ;;  %v981_v45 = vmax.f32 %v965_v22, 0.0  ;;  %2160 = vmatpush3.bf16.msra.mxu0 %v2255_v3  ;;  %vm1202_vm4 = vcmp.lt.s32.totalorder %v2691_v39, 26 }
 0x21b   :  { %v2101_v46 = vpop.f32.mrf.mxu1  ;;  %2161 = vmatprep.subr.bf16.mxu0 %v2444_v1  ;;  %2140 = vmatpush3.bf16.msra.mxu1 %v2263_v11 }
 0x21c   :  { %v979_v47 = vmax.f32 %v963_v18, 0.0  ;;  %v1007_v55 = vpack.c.bf16 %v981_v45, %v980_v48  ;;  %v968_v58 = vadd.f32 %v2101_v46, %v781_v54  ;;  %2141 = vmatprep.subr.bf16.mxu1 %v2444_v1 }
 0x21d   :  { %v939_v49 = vpop.f32.mrf.mxu1 }
 0x21e   :  { %v1006_v53 = vpack.c.bf16 %v979_v47, %v978_v31  ;;  %v966_v57 = vadd.f32 %v939_v49, %v779_v51  ;;  %v984_v63 = vmax.f32 %v968_v58, 0.0  ;;  %2162 = vmatpush3.bf16.msra.mxu0 %v2256_v4 }
 0x21f   :  { %v2102_v29 = vpop.f32.mrf.mxu1  ;;  %2163 = vmatprep.subr.bf16.mxu0 %v2444_v1  ;;  %2142 = vmatpush3.bf16.msra.mxu1 %v2264_v12 }
 0x220   :  { %v969_v30 = vadd.f32 %v2102_v29, %v782_v52  ;;  %2127 = vmatprep.mubr.bf16.mxu0 %v1006_v53  ;;  %v982_v61 = vmax.f32 %v966_v57, 0.0  ;;  %2143 = vmatprep.subr.bf16.mxu1 %v2444_v1 }
 0x221   :  { %v942_v59 = vpop.f32.mrf.mxu1  ;;  %2128 = vmatmul.mubr.bf16.gmra.mxu0 %v1007_v55 }
 0x222   :  { %v967_v26 = vadd.f32 %v942_v59, %v780_v56  ;;  %v985_v60 = vmax.f32 %v969_v30, 0.0  ;;  %2164 = vmatpush3.bf16.msra.mxu0 %v2257_v5 }
 0x223   :  { %2165 = vmatprep.subr.bf16.mxu0 %v2444_v1  ;;  %2144 = vmatpush3.bf16.msra.mxu1 %v2265_v13 }
 0x224   :  { %v983_v62 = vmax.f32 %v967_v26, 0.0  ;;  %v1009_v32 = vpack.c.bf16 %v985_v60, %v984_v63  ;;  %2145 = vmatprep.subr.bf16.mxu1 %v2444_v1 }
 0x226   :  { %v1008_v0 = vpack.c.bf16 %v983_v62, %v982_v61  ;;  %2166 = vmatpush3.bf16.msra.mxu0 %v2258_v6 }
 0x227   :  { %2167 = vmatprep.subr.bf16.mxu0 %v2444_v1  ;;  %2146 = vmatpush3.bf16.msra.mxu1 %v2266_v14 }
 0x228   :  { %2131 = vmatprep.mubr.bf16.mxu0 %v1008_v0  ;;  %2147 = vmatprep.subr.bf16.mxu1 %v2444_v1 }
 0x229   :  { %2132 = vmatmul.mubr.bf16.gmra.mxu0 %v1009_v32 }
 0x22a   :  { %2168 = vmatpush3.bf16.msra.mxu0 %v2259_v7  ;;  %2171 = vmatprep.mubr.msk.bf16.mxu0 %vm2445_vm3, %v2444_v1 }
 0x22b   :  { %2169 = vmatprep.subr.bf16.mxu0 %v2444_v1  ;;  %2148 = vmatpush3.bf16.msra.mxu1 %v2267_v15 }
 0x22c   :  { %2149 = vmatprep.subr.bf16.mxu1 %v2444_v1 }
 0x22e   :  { %2170 = vmatpush3.bf16.msra.mxu0 %v2260_v8 }
 0x22f   :  { %2150 = vmatpush3.bf16.msra.mxu1 %v2268_v16 }
 0x230   :  { %2175 = vmatprep.subr.bf16.mxu1 %v2444_v1 }
 0x2d1   :  { %v2121_v19 = vpop.f32.mrf.mxu0 }
 0x2d2   :  { %v1164_v37 = vadd.f32 %v2121_v19, %v2681_v25 }
 0x2d3   :  { %v1099_v21 = vpop.f32.mrf.mxu0 }
 0x2d4   :  { %v2684_v34 = vadd.f32 %v2681_v25, %v1099_v21  ;;  %v1180_v18 = vmax.f32 %v1164_v37, 0.0 }
 0x2d5   :  { %v2122_v27 = vpop.f32.mrf.mxu0 }
 0x2d6   :  { %v2687_v35 = vadd.f32 %v2122_v27, %v2681_v25  ;;  %v1178_v22 = vmax.f32 %v2684_v34, 0.0 }
 0x2d7   :  { %v1102_v36 = vpop.f32.mrf.mxu0 }
 0x2d8   :  { %v1163_v20 = vadd.f32 %v2681_v25, %v1102_v36  ;;  %v1181_v42 = vmax.f32 %v2687_v35, 0.0 }
 0x2d9   :  { %v2125_v28 = vpop.f32.mrf.mxu0 }
 0x2da   :  { %v1179_v40 = vmax.f32 %v1163_v20, 0.0  ;;  %v1214_v31 = vsel %vm1202_vm4, %v1181_v42, 0.0  ;;  %v2706_v48 = vadd.f32 %v2125_v28, %v2681_v25 }
 0x2db   :  { %v1115_v43 = vpop.f32.mrf.mxu0 }
 0x2dc   :  { %v1227_v45 = vadd.f32 %v1179_v40, %v1178_v22  ;;  %v2698_v38 = vadd.f32 %v2681_v25, %v1115_v43  ;;  %v1184_v56 = vmax.f32 %v2706_v48, 0.0 }
 0x2dd   :  { %v2126_v46 = vpop.f32.mrf.mxu0 }
 0x2de   :  { %v1228_v24 = vadd.f32 %v1227_v45, %v1180_v18  ;;  %v2703_v47 = vadd.f32 %v2126_v46, %v2681_v25  ;;  %v1182_v52 = vmax.f32 %v2698_v38, 0.0 }
 0x2df   :  { %v1118_v44 = vpop.f32.mrf.mxu0 }
 0x2e0   :  { %v1229_v41 = vadd.f32 %v1228_v24, %v1214_v31  ;;  %v2709_v49 = vadd.f32 %v2681_v25, %v1118_v44  ;;  %v1185_v54 = vmax.f32 %v2703_v47, 0.0 }
 0x2e1   :  { %v2129_v50 = vpop.f32.mrf.mxu0 }
 0x2e2   :  { %v1230_v51 = vrot.slane %v1229_v41, 4  ;;  %v1183_v53 = vmax.f32 %v2709_v49, 0.0  ;;  %v1218_v60 = vsel %vm1202_vm4, %v1185_v54, 0.0  ;;  %v2732_v32 = vadd.f32 %v2129_v50, %v2681_v25 }
 0x2e3   :  { %v1131_v55 = vpop.f32.mrf.mxu0 }
 0x2e4   :  { %v1231_v29 = vadd.f32 %v1230_v51, %v1229_v41  ;;  %v1236_v57 = vadd.f32 %v1183_v53, %v1182_v52  ;;  %v2722_v26 = vadd.f32 %v2681_v25, %v1131_v55  ;;  %v1188_v11 = vmax.f32 %v2732_v32, 0.0 }
 0x2e5   :  { %v2130_v30 = vpop.f32.mrf.mxu0 }
 0x2e6   :  { %v1232_v58 = vrot.slane %v1231_v29, 2  ;;  %v1237_v59 = vadd.f32 %v1236_v57, %v1184_v56  ;;  %v2729_v61 = vadd.f32 %v2130_v30, %v2681_v25  ;;  %v1186_v5 = vmax.f32 %v2722_v26, 0.0 }
 0x2e7   :  { %v1134_v62 = vpop.f32.mrf.mxu0 }
 0x2e8   :  { %v1233_v63 = vadd.f32 %v1232_v58, %v1231_v29  ;;  %v1238_v0 = vadd.f32 %v1237_v59, %v1218_v60  ;;  %v2735_v33 = vadd.f32 %v2681_v25, %v1134_v62  ;;  %v1189_v7 = vmax.f32 %v2729_v61, 0.0 }
 0x2e9   :  { %v2133_v2 = vpop.f32.mrf.mxu0 }
 0x2ea   :  { %v1234_v3 = vrot.slane %v1233_v63, 1  ;;  %v1239_v4 = vrot.slane %v1238_v0, 4  ;;  %v1187_v6 = vmax.f32 %v2735_v33, 0.0  ;;  %v1222_v17 = vsel %vm1202_vm4, %v1189_v7, 0.0 }
 0x2eb   :  { %v1147_v8 = vpop.f32.mrf.mxu0  ;;  %v2767_v24 = vadd.f32 %v2133_v2, %v2681_v25 }
 0x2ec   :  { %v1235_v9 = vadd.f32 %v1234_v3, %v1233_v63  ;;  %v1240_v10 = vadd.f32 %v1239_v4, %v1238_v0  ;;  %v1245_v12 = vadd.f32 %v1187_v6, %v1186_v5  ;;  %v2754_v19 = vadd.f32 %v2681_v25, %v1147_v8 }
 0x2ed   :  { %v2134_v13 = vpop.f32.mrf.mxu0 }
 0x2ee   :  { %v2745_v14 = vmul.f32 0.03846154, %v1235_v9  ;;  %v1241_v15 = vrot.slane %v1240_v10, 2  ;;  %v1246_v16 = vadd.f32 %v1245_v12, %v1188_v11  ;;  %v2757_v21 = vadd.f32 %v2134_v13, %v2681_v25 }
 0x2ef   :  { %v1150_v27 = vpop.f32.mrf.mxu0 }
 0x2f0   :  { %v1267_v34 = vsub.f32 %v1178_v22, %v2745_v14  ;;  %v1268_v35 = vsub.f32 %v1179_v40, %v2745_v14  ;;  %v1269_v36 = vsub.f32 %v1180_v18, %v2745_v14  ;;  %v1270_v37 = vsub.f32 %v1181_v42, %v2745_v14 }
 0x2f1   :  { %v1242_v20 = vadd.f32 %v1241_v15, %v1240_v10  ;;  %v1247_v28 = vadd.f32 %v1246_v16, %v1222_v17  ;;  %v2764_v43 = vadd.f32 %v2681_v25, %v1150_v27  ;;  %v1190_v40 = vmax.f32 %v2754_v19, 0.0 }
 0x2f2   :  { %v1299_v45 = vmul.f32 %v1267_v34, %v1267_v34  ;;  %v1300_v46 = vmul.f32 %v1268_v35, %v1268_v35  ;;  %v1286_v31 = vsel %vm1202_vm4, %v1270_v37, 0.0  ;;  %v1301_v18 = vmul.f32 %v1269_v36, %v1269_v36 }
 0x2f3   :  { %v1243_v22 = vrot.slane %v1242_v20, 1  ;;  %v1248_v44 = vrot.slane %v1247_v28, 4  ;;  %v1193_v42 = vmax.f32 %v2757_v21, 0.0  ;;  %v1191_v50 = vmax.f32 %v2764_v43, 0.0 }
 0x2f4   :  { %v1315_v41 = vadd.f32 %v1300_v46, %v1299_v45  ;;  %v1302_v29 = vmul.f32 %v1286_v31, %v1286_v31  ;;  %v1192_v25 = vmax.f32 %v2767_v24, 0.0  ;;  %v1415_v61 = vpack.c.bf16 %v2745_v14, %v2745_v14 }
 0x2f5   :  { %v1244_v51 = vadd.f32 %v1243_v22, %v1242_v20  ;;  %v1249_v55 = vadd.f32 %v1248_v44, %v1247_v28  ;;  %v1254_v30 = vadd.f32 %v1191_v50, %v1190_v40  ;;  %v1226_v62 = vsel %vm1202_vm4, %v1193_v42, 0.0 }
 0x2f6   :  { %v1316_v57 = vadd.f32 %v1315_v41, %v1301_v18 }
 0x2f7   :  { %v1264_v58 = vmul.f32 0.03846154, %v1244_v51  ;;  %v1250_v59 = vrot.slane %v1249_v55, 2  ;;  %v1255_v63 = vadd.f32 %v1254_v30, %v1192_v25 }
 0x2f8   :  { %v1317_v60 = vadd.f32 %v1316_v57, %v1302_v29 }
 0x2f9   :  { %v1271_v0 = vsub.f32 %v1182_v52, %v1264_v58  ;;  %v1272_v2 = vsub.f32 %v1183_v53, %v1264_v58  ;;  %v1273_v3 = vsub.f32 %v1184_v56, %v1264_v58  ;;  %v1274_v4 = vsub.f32 %v1185_v54, %v1264_v58 }
 0x2fa   :  { %v1318_v8 = vrot.slane %v1317_v60, 4  ;;  %v1251_v9 = vadd.f32 %v1250_v59, %v1249_v55  ;;  %v1256_v10 = vadd.f32 %v1255_v63, %v1226_v62  ;;  %v1416_v26 = vpack.c.bf16 %v1264_v58, %v1264_v58 }
 0x2fb   :  { %v1303_v12 = vmul.f32 %v1271_v0, %v1271_v0  ;;  %v1304_v13 = vmul.f32 %v1272_v2, %v1272_v2  ;;  %v1290_v15 = vsel %vm1202_vm4, %v1274_v4, 0.0  ;;  %v1305_v52 = vmul.f32 %v1273_v3, %v1273_v3 }
 0x2fc   :  { %v1252_v16 = vrot.slane %v1251_v9, 1  ;;  %v1257_v38 = vrot.slane %v1256_v10, 4  ;;  %v1319_v49 = vadd.f32 %v1318_v8, %v1317_v60  ;;  %v1306_v48 = vmul.f32 %v1290_v15, %v1290_v15 }
 0x2fd   :  { %v1324_v17 = vadd.f32 %v1304_v13, %v1303_v12  ;;  %v1532_v59 = vunpack.c.l.b16 %v1416_v26  ;;  %v1531_v4 = vunpack.c.l.b16 %v1415_v61 }
 0x2fe   :  { %v1253_v53 = vadd.f32 %v1252_v16, %v1251_v9  ;;  %v1258_v27 = vadd.f32 %v1257_v38, %v1256_v10  ;;  %v1320_v35 = vrot.slane %v1319_v49, 2 }
 0x2ff   :  { %v1325_v56 = vadd.f32 %v1324_v17, %v1305_v52 }
 0x300   :  { %v1265_v34 = vmul.f32 0.03846154, %v1253_v53  ;;  %v1259_v47 = vrot.slane %v1258_v27, 2 }
 0x301   :  { %v1326_v54 = vadd.f32 %v1325_v56, %v1306_v48 }
 0x302   :  { %v1275_v36 = vsub.f32 %v1186_v5, %v1265_v34  ;;  %v1276_v37 = vsub.f32 %v1187_v6, %v1265_v34  ;;  %v1277_v20 = vsub.f32 %v1188_v11, %v1265_v34  ;;  %v1278_v45 = vsub.f32 %v1189_v7, %v1265_v34 }
 0x303   :  { %v1327_v28 = vrot.slane %v1326_v54, 4  ;;  %v1260_v46 = vadd.f32 %v1259_v47, %v1258_v27  ;;  %v1321_v5 = vadd.f32 %v1320_v35, %v1319_v49  ;;  %v1417_v6 = vpack.c.bf16 %v1265_v34, %v1265_v34 }
 0x304   :  { %v1307_v24 = vmul.f32 %v1275_v36, %v1275_v36  ;;  %v1308_v31 = vmul.f32 %v1276_v37, %v1276_v37  ;;  %v1294_v44 = vsel %vm1202_vm4, %v1278_v45, 0.0  ;;  %v1309_v41 = vmul.f32 %v1277_v20, %v1277_v20 }
 0x305   :  { %v1328_v22 = vadd.f32 %v1327_v28, %v1326_v54  ;;  %v1261_v18 = vrot.slane %v1260_v46, 1  ;;  %v1310_v11 = vmul.f32 %v1294_v44, %v1294_v44  ;;  %v1322_v57 = vrot.slane %v1321_v5, 1 }
 0x306   :  { %v1333_v33 = vadd.f32 %v1308_v31, %v1307_v24  ;;  %v1533_v60 = vunpack.c.l.b16 %v1417_v6 }
 0x307   :  { %v1329_v51 = vrot.slane %v1328_v22, 2  ;;  %v1262_v32 = vadd.f32 %v1261_v18, %v1260_v46  ;;  %v1323_v43 = vadd.f32 %v1322_v57, %v1321_v5 }
 0x308   :  { %v1334_v55 = vadd.f32 %v1333_v33, %v1309_v41 }
 0x309   :  { %v1330_v7 = vadd.f32 %v1329_v51, %v1328_v22  ;;  %v1266_v29 = vmul.f32 0.03846154, %v1262_v32  ;;  %v1351_v53 = vmul.f32 0.04, %v1323_v43  ;;  %v2276_v43 = vld [vmem:[#allocation11] sm:$0xff]  }
 0x30a   :  { %v1335_v30 = vadd.f32 %v1334_v55, %v1310_v11 }
 0x30b   :  { %v1331_v58 = vrot.slane %v1330_v7, 1  ;;  %v1279_v62 = vsub.f32 %v1190_v40, %v1266_v29  ;;  %v1280_v63 = vsub.f32 %v1191_v50, %v1266_v29  ;;  %v1281_v0 = vsub.f32 %v1192_v25, %v1266_v29 }
 0x30c   :  { %v1336_v2 = vrot.slane %v1335_v30, 4  ;;  %v1282_v14 = vsub.f32 %v1193_v42, %v1266_v29  ;;  %v1418_v3 = vpack.c.bf16 %v1266_v29, %v1266_v29  ;;  %v1535_v40 = vsel %vm1431_vm5, %v1532_v59, %v1531_v4 }
 0x30d   :  { %v1332_v8 = vadd.f32 %v1331_v58, %v1330_v7  ;;  %v1311_v9 = vmul.f32 %v1279_v62, %v1279_v62  ;;  %v1312_v10 = vmul.f32 %v1280_v63, %v1280_v63  ;;  %v1313_v50 = vmul.f32 %v1281_v0, %v1281_v0 }
 0x30e   :  { %v1337_v12 = vadd.f32 %v1336_v2, %v1335_v30  ;;  %v1298_v13 = vsel %vm1202_vm4, %v1282_v14, 0.0  ;;  %v1534_v19 = vunpack.c.l.b16 %v1418_v3  ;;  %v1536_v15 = vsel %vm1433_vm6, %v1533_v60, %v1535_v40  ;;  %v2275_v40 = vld [vmem:[#allocation11 + $0x8] sm:$0xff]  }
 0x30f   :  { %v1342_v25 = vadd.f32 %v1312_v10, %v1311_v9  ;;  %v1352_v16 = vmul.f32 0.04, %v1332_v8  ;;  %v1314_v38 = vmul.f32 %v1298_v13, %v1298_v13  ;;  %vm1357_vm10 = vcmp.eq.f32.partialorder %v1351_v53, inf  ;;  %v2269_v8 = vld [vmem:[#allocation11 + $0x38] sm:$0xff]   ;;  %v2270_v9 = vld [vmem:[#allocation11 + $0x30] sm:$0xff]   ;;  %v2271_v10 = vld [vmem:[#allocation11 + $0x28] sm:$0xff]  }
 0x310   :  { %v1338_v21 = vrot.slane %v1337_v12, 2  ;;  %v1537_v42 = vsel %vm1435_vm7, %v1534_v19, %v1536_v15  ;;  %v1360_v33 = vand.u32 2147483648, %v1351_v53  ;;  %vm1359_vm13 = vcmp.eq.f32.partialorder %v1351_v53, 0.0  ;;  %v2273_v13 = vld [vmem:[#allocation11 + $0x18] sm:$0xff]   ;;  %v2274_v19 = vld [vmem:[#allocation11 + $0x10] sm:$0xff]  }
 0x311   :  { %v1343_v52 = vadd.f32 %v1342_v25, %v1313_v50  ;;  %v1538_v17 = vpack.c.b16 %v1537_v42, %v1537_v42  ;;  %2277 = vrsqrt.f32 %v1352_v16  ;;  %vm1364_vm8 = vcmp.eq.f32.partialorder %v1352_v16, inf }
 0x312   :  { %v1339_v49 = vadd.f32 %v1338_v21, %v1337_v12  ;;  %2279 = vrsqrt.f32 %v1351_v53  ;;  %v1367_v18 = vand.u32 2147483648, %v1352_v16  ;;  %vm1366_vm11 = vcmp.eq.f32.partialorder %v1352_v16, 0.0  ;;  %v2272_v12 = vld [vmem:[#allocation11 + $0x20] sm:$0xff]  }
 0x313   :  { %v1344_v27 = vadd.f32 %v1343_v52, %v1314_v38  ;;  %2172 = vmatmul.mubr.bf16.vlgmr.msra.gmra.mxu0 %v1538_v17 }
 0x314   :  { %v1340_v39 = vrot.slane %v1339_v49, 1 }
 0x315   :  { %v1345_v48 = vrot.slane %v1344_v27, 4 }
 0x316   :  { %v1341_v56 = vadd.f32 %v1340_v39, %v1339_v49  ;;  %v2446_v39 = vmov 1966171168  }
 0x317   :  { %v1346_v34 = vadd.f32 %v1345_v48, %v1344_v27 }
 0x318   :  { %v1353_v47 = vmul.f32 0.04, %v1341_v56  ;;  %v1872_v56 = vld [vmem:[%s2848_s10] ss:$0 sm:$0xff] }
 0x319   :  { %v1347_v54 = vrot.slane %v1346_v34, 2 }
 0x31a   :  { %2281 = vrsqrt.f32 %v1353_v47  ;;  %vm1371_vm9 = vcmp.eq.f32.partialorder %v1353_v47, inf  ;;  %v1374_v41 = vand.u32 2147483648, %v1353_v47  ;;  %vm1373_vm12 = vcmp.eq.f32.partialorder %v1353_v47, 0.0 }
 0x31b   :  { %v1348_v35 = vadd.f32 %v1347_v54, %v1346_v34 }
 0x31d   :  { %v1349_v36 = vrot.slane %v1348_v35, 1 }
 0x31e   :  { %v2278_v28 = vpop.eup %2277 }
 0x31f   :  { %v1350_v37 = vadd.f32 %v1349_v36, %v1348_v35  ;;  %v2280_v45 = vpop.eup %2279  ;;  %v1363_v46 = vmul.f32 %v2278_v28, %v1352_v16 }
 0x320   :  { %v1356_v31 = vmul.f32 %v2280_v45, %v1351_v53 }
 0x321   :  { %v1354_v20 = vmul.f32 0.04, %v1350_v37  ;;  %v1365_v44 = vsel %vm1364_vm8, %v1352_v16, %v1363_v46  ;;  %v1871_v16 = vld [vmem:[%s2846_s8] ss:$0 sm:$0xff]  ;;  %s2447_s8 = smov [#allocation13]  }
 0x322   :  { %v1358_v5 = vsel %vm1357_vm10, %v1351_v53, %v1356_v31  ;;  %v1368_v6 = vsel %vm1366_vm11, %v1367_v18, %v1365_v44  ;;  %s1786_s12 = sshll.u32 %s2447_s8, 4  ;;  %s1787_s12 = int_to_ptr.vmem [resolvable:$true] %s1786_s12 }
 0x323   :  { %2283 = vrsqrt.f32 %v1354_v20  ;;  %v1361_v32 = vsel %vm1359_vm13, %v1360_v33, %v1358_v5  ;;  %v1420_v11 = vpack.c.bf16 %v1368_v6, %v1368_v6  ;;  %vm1378_vm14 = vcmp.eq.f32.partialorder %v1354_v20, inf  ;;  %s2405_s10 = scalar_lea.vmem %s1787_s12, 64  ;;  %p2410_p3 = scmp.lt.s32.totalorder %s1787_s12, %s1787_s12 }
 0x324   :  { %v1419_v29 = vpack.c.bf16 %v1361_v32, %v1361_v32  ;;  %v1381_v57 = vand.u32 2147483648, %v1354_v20  ;;  %vm1380_vm15 = vcmp.eq.f32.partialorder %v1354_v20, 0.0  ;;  %p2406_p2 = scmp.ne.s32.totalorder %s1787_s12, %s2405_s10  ;;  %p2411_p4 = scmp.lt.s32.totalorder %s2405_s10, %s2405_s10 }
 0x325   :  { %v1428_v59 = vunpack.c.l.b16 %v1420_v11 }
 0x326   :  { %v1427_v63 = vunpack.c.l.b16 %v1419_v29  ;;  %p2412_p5 = por %p2411_p4, %p2410_p3 }
 0x327   :  { %v2282_v24 = vpop.eup %2281 }
 0x328   :  { %v1370_v22 = vmul.f32 %v2282_v24, %v1353_v47  ;;  %v1432_v2 = vsel %vm1431_vm5, %v1428_v59, %v1427_v63  ;;  %p2413_p6 = pnand %p2412_p5, %p2406_p2 }
 0x32a   :  { %v1372_v26 = vsel %vm1371_vm9, %v1353_v47, %v1370_v22 }
 0x32b   :  { %v1375_v51 = vsel %vm1373_vm12, %v1374_v41, %v1372_v26 }
 0x32c   :  { %v1421_v61 = vpack.c.bf16 %v1375_v51, %v1375_v51 }
 0x32e   :  { %v1429_v58 = vunpack.c.l.b16 %v1421_v61 }
 0x330   :  { %v2284_v55 = vpop.eup %2283  ;;  %v1434_v14 = vsel %vm1433_vm6, %v1429_v58, %v1432_v2 }
 0x331   :  { %v1377_v7 = vmul.f32 %v2284_v55, %v1354_v20 }
 0x333   :  { %v1379_v30 = vsel %vm1378_vm14, %v1354_v20, %v1377_v7 }
 0x334   :  { %v1382_v60 = vsel %vm1380_vm15, %v1381_v57, %v1379_v30 }
 0x335   :  { %v1422_v62 = vpack.c.bf16 %v1382_v60, %v1382_v60 }
 0x337   :  { %v1430_v0 = vunpack.c.l.b16 %v1422_v62 }
 0x339   :  { %v1436_v3 = vsel %vm1435_vm7, %v1430_v0, %v1434_v14 }
 0x33a   :  { %v1437_v4 = vpack.c.b16 %v1436_v3, %v1436_v3 }
 0x33c   :  { %2152 = vmatmul.mubr.bf16.vlgmr.msra.gmra.mxu1 %v1437_v4 }
 0x33d   :  { %2191 = vmatprep.mubr.msk.bf16.mxu1 %vm2445_vm3, %v2444_v1  ;;  %2176 = vmatpush3.bf16.msra.mxu1 %v2269_v8 }
 0x33e   :  { %2177 = vmatprep.subr.bf16.mxu1 %v2444_v1 }
 0x341   :  { %2178 = vmatpush3.bf16.msra.mxu1 %v2270_v9 }
 0x342   :  { %2179 = vmatprep.subr.bf16.mxu1 %v2444_v1 }
 0x345   :  { %2180 = vmatpush3.bf16.msra.mxu1 %v2271_v10 }
 0x346   :  { %2181 = vmatprep.subr.bf16.mxu1 %v2444_v1 }
 0x349   :  { %2182 = vmatpush3.bf16.msra.mxu1 %v2272_v12 }
 0x34a   :  { %2183 = vmatprep.subr.bf16.mxu1 %v2444_v1 }
 0x34d   :  { %2184 = vmatpush3.bf16.msra.mxu1 %v2273_v13 }
 0x34e   :  { %2185 = vmatprep.subr.bf16.mxu1 %v2444_v1 }
 0x351   :  { %2186 = vmatpush3.bf16.msra.mxu1 %v2274_v19 }
 0x352   :  { %2187 = vmatprep.subr.bf16.mxu1 %v2444_v1 }
 0x355   :  { %2188 = vmatpush3.bf16.msra.mxu1 %v2275_v40 }
 0x356   :  { %2189 = vmatprep.subr.bf16.mxu1 %v2444_v1  ;;  %v1750_v1 = vunpack.c.l.s4 %v2446_v39 }
 0x358   :  { %v1751_v48 = vunpack.c.0.s8 %v1750_v1 }
 0x359   :  { %2190 = vmatpush3.bf16.msra.mxu1 %v2276_v43 }
 0x35a   :  { %v1754_v34 = vsub.s32 %v1751_v48, %v2676_v23 }
 0x3d3   :  { %v1622_v50 = vpop.f32.mrf.mxu0 }
 0x3d5   :  { %v2173_v25 = vpop.f32.mrf.mxu0 }
 0x3d7   :  { %v1625_v15 = vpop.f32.mrf.mxu0 }
 0x3d9   :  { %v2174_v21 = vpop.f32.mrf.mxu0 }
 0x3fc   :  { %v1521_v42 = vpop.f32.mrf.mxu1 }
 0x3fd   :  { %v1623_v38 = vadd.f32 %v1622_v50, %v1521_v42 }
 0x3fe   :  { %v2153_v52 = vpop.f32.mrf.mxu1 }
 0x3ff   :  { %v1635_v17 = vadd.f32 %v1871_v16, %v1623_v38 }
 0x400   :  { %v1524_v49 = vpop.f32.mrf.mxu1 }
 0x401   :  { %v1636_v53 = vpack.c.bf16 %v1635_v17, %v1635_v17 }
 0x402   :  { %v2154_v27 = vpop.f32.mrf.mxu1 }
 0x403   :  { %2192 = vmatmul.mubr.bf16.vlgmr.msra.gmra.mxu1 %v1636_v53 }
 0x4c3   :  { %v1742_v47 = vpop.f32.mrf.mxu1 }
 0x4c4   :  { %v1743_v54 = vadd.f32 %v1872_v56, %v1742_v47 }
 0x4c5   :  { %v2193_v35 = vpop.f32.mrf.mxu1 }
 0x4c6   :  { %v1755_v36 = vrot.slane %v1743_v54, %v1754_v34 }
 0x4c7   :  { %v1745_v37 = vpop.f32.mrf.mxu1 }
 0x4c8   :  { %v1756_v20 = vcombine.high %v1755_v36, %v1755_v36  ;;  %v1763_v28 = vrot.slane %v1755_v36, %v1754_v34  ;;  %1881 = vst.sshfl [vmem:[#allocation13] sm:$0x1 pattern:$0x73625140] %v1755_v36 }
 0x4c9   :  { %v2194_v45 = vpop.f32.mrf.mxu1 }
 0x4ca   :  { %v1770_v46 = vrot.slane %v1756_v20, %v1754_v34  ;;  %v1771_v24 = vcombine.high %v1763_v28, %v1763_v28  ;;  %1882 = vst.sshfl [vmem:[#allocation13 + $0x1] sm:$0x1 pattern:$0x73625140] %v1756_v20 }
 0x4cc   :  { %v1772_v31 = vcombine.high %v1770_v46, %v1770_v46  ;;  %1779 = vst [vmem:[#allocation13 + $0x2] sm:$0x1] %v1771_v24 }
 0x4ce   :  { %1780 = vst [vmem:[#allocation13 + $0x3] sm:$0x1] %v1772_v31 }
 0x4cf   :  { %2416 = shalt.err (!%p2413_p6)
}
 0x4d0   :  { %s2448_s13 = smov 16   ;;  %s2449_s1 = smov 1  }
 0x4d1   :  { %1792 = dma.vmem_to_hbm [thread:$0]  %s1787_s12, 64, %s2849_s11, [#allocation4], %s2448_s13, %s2448_s13, %s2449_s1  }
 0x4d2   :  { %2433 = dma.done.wait [#allocation4], 64  }
 0x4d3   :  { %2434 = vsyncadd [#allocation4], 4294967232 }
 0x4d4   :  { %1796 = vsyncpa [#allocation3], 1 }
 0x4d5   :  { %1797 = vsyncpa [#allocation6], 1 }
 0x4d6   :  { %1798 = vsyncpa [#allocation9], 1 }
 0x4d7   :  { %1799 = vsyncpa [#allocation12], 1 }
 0x4d8   :  { %1800 = vsyncpa [#allocation4], 1 }

// kernel: tpu_custom_call.1
= control target key start
LH: loop header
LB: loop body
LE: loop exit
PB: predicated region body
PF: predicated region fallthrough
CT: control target
= control target key end

     0   :  { %16 = vsyncpa [#allocation3], 0  ;;  %s2838_s0 = inlined_call_operand.hbm [shape: bf16[4,32,48], index: 0, kind: input, shape index: {}]   ;;  %s2839_s1 = inlined_call_operand.hbm [shape: bf16[48,128], index: 1, kind: input, shape index: {}]   ;;  %s2840_s2 = inlined_call_operand.vmem [shape: f32[1,128], index: 2, kind: input, shape index: {}]   ;;  %s2841_s3 = inlined_call_operand.hbm [shape: bf16[384,128], index: 3, kind: input, shape index: {}]   ;;  %s2842_s4 = inlined_call_operand.vmem [shape: f32[1,128], index: 4, kind: input, shape index: {}]   ;;  %s2843_s5 = inlined_call_operand.hbm [shape: bf16[128,128], index: 5, kind: input, shape index: {}]   ;;  %s2844_s6 = inlined_call_operand.vmem [shape: f32[1,128], index: 6, kind: input, shape index: {}]   ;;  %s2845_s7 = inlined_call_operand.hbm [shape: bf16[256,128], index: 7, kind: input, shape index: {}]   ;;  %s2846_s8 = inlined_call_operand.vmem [shape: f32[1,128], index: 8, kind: input, shape index: {}]   ;;  %s2847_s9 = inlined_call_operand.hbm [shape: bf16[128,128], index: 9, kind: input, shape index: {}]   ;;  %s2848_s10 = inlined_call_operand.vmem [shape: f32[1,128], index: 10, kind: input, shape index: {}]   ;;  %s2849_s11 = inlined_call_operand.hbm [shape: f32[4,1,128], index: 11, kind: output, shape index: {}]  }
   0x1   :  { %17 = vsyncpa [#allocation6], 0 }
   0x2   :  { %18 = vsyncpa [#allocation9], 0 }
   0x3   :  { %19 = vsyncpa [#allocation12], 0 }
   0x4   :  { %20 = vsyncpa [#allocation4], 0  ;;  %s2435_s17 = smov [#allocation5]   ;;  %s2436_s19 = smov [#allocation8]  }
   0x5   :  { %s38_s18 = sshll.u32 %s2435_s17, 4  ;;  %s66_s20 = sshll.u32 %s2436_s19, 4  ;;  %s39_s18 = int_to_ptr.vmem [resolvable:$true] %s38_s18  ;;  %s67_s20 = int_to_ptr.vmem [resolvable:$true] %s66_s20 }
   0x6   :  { %s2293_s21 = scalar_lea.vmem %s39_s18, 384  ;;  %p2298_p1 = scmp.lt.s32.totalorder %s39_s18, %s39_s18 }
   0x7   :  { %p2294_p0 = scmp.ne.s32.totalorder %s39_s18, %s2293_s21  ;;  %p2299_p2 = scmp.lt.s32.totalorder %s2293_s21, %s2293_s21 }
   0x9   :  { %p2300_p3 = por %p2299_p2, %p2298_p1 }
   0xb   :  { %p2301_p4 = pnand %p2300_p3, %p2294_p0 }
   0xd   :  { %2304 = shalt.err (!%p2301_p4)
}
   0xe   :  { %s2437_s22 = smov 64   ;;  %s2438_s23 = smov 4  }
   0xf   :  { %44 = dma.hbm_to_vmem [thread:$0]  %s2839_s1, 384, %s39_s18, [#allocation6], %s2437_s22, %s2437_s22, %s2438_s23  }
  0x10   :  { %s2313_s26 = scalar_lea.vmem %s67_s20, 1024  ;;  %p2318_p6 = scmp.lt.s32.totalorder %s67_s20, %s67_s20 }
  0x11   :  { %p2314_p5 = scmp.ne.s32.totalorder %s67_s20, %s2313_s26  ;;  %p2319_p7 = scmp.lt.s32.totalorder %s2313_s26, %s2313_s26 }
  0x13   :  { %p2320_p8 = por %p2319_p7, %p2318_p6 }
  0x15   :  { %p2321_p9 = pnand %p2320_p8, %p2314_p5 }
  0x17   :  { %2324 = shalt.err (!%p2321_p9)
}
  0x18   :  { %72 = dma.hbm_to_vmem [thread:$0]  %s2843_s5, 1024, %s67_s20, [#allocation9], %s2437_s22, %s2437_s22, %s2438_s23  }
  0x19   :  { %s2439_s29 = smov [#allocation2]   ;;  %s2440_s12 = smov [#allocation7]  }
  0x1a   :  { %s26_s30 = sshll.u32 %s2439_s29, 4  ;;  %s52_s13 = sshll.u32 %s2440_s12, 4  ;;  %s27_s30 = int_to_ptr.vmem [resolvable:$true] %s26_s30  ;;  %s53_s13 = int_to_ptr.vmem [resolvable:$true] %s52_s13 }
  0x1b   :  { %s2333_s1 = scalar_lea.vmem %s27_s30, 1024  ;;  %p2338_p11 = scmp.lt.s32.totalorder %s27_s30, %s27_s30 }
  0x1c   :  { %p2334_p10 = scmp.ne.s32.totalorder %s27_s30, %s2333_s1  ;;  %p2339_p12 = scmp.lt.s32.totalorder %s2333_s1, %s2333_s1 }
  0x1e   :  { %p2340_p13 = por %p2339_p12, %p2338_p11 }
  0x20   :  { %p2341_p0 = pnand %p2340_p13, %p2334_p10 }
  0x22   :  { %2344 = shalt.err (!%p2341_p0)
}
  0x23   :  { %32 = dma.hbm_to_vmem [thread:$0]  %s2838_s0, 1024, %s27_s30, [#allocation3], %s2437_s22, %s2437_s22, %s2438_s23  }
  0x24   :  { %s2353_s5 = scalar_lea.vmem %s53_s13, 3072  ;;  %p2358_p2 = scmp.lt.s32.totalorder %s53_s13, %s53_s13 }
  0x25   :  { %p2354_p1 = scmp.ne.s32.totalorder %s53_s13, %s2353_s5  ;;  %p2359_p3 = scmp.lt.s32.totalorder %s2353_s5, %s2353_s5 }
  0x27   :  { %p2360_p4 = por %p2359_p3, %p2358_p2 }
  0x29   :  { %p2361_p5 = pnand %p2360_p4, %p2354_p1 }
  0x2b   :  { %2364 = shalt.err (!%p2361_p5)
}
  0x2c   :  { %58 = dma.hbm_to_vmem [thread:$0]  %s2841_s3, 3072, %s53_s13, [#allocation6], %s2437_s22, %s2437_s22, %s2438_s23  }
  0x2d   :  { %s2441_s18 = smov [#allocation10]   ;;  %s2442_s20 = smov [#allocation11]  }
  0x2e   :  { %s80_s19 = sshll.u32 %s2441_s18, 4  ;;  %s94_s21 = sshll.u32 %s2442_s20, 4  ;;  %s81_s19 = int_to_ptr.vmem [resolvable:$true] %s80_s19  ;;  %s95_s21 = int_to_ptr.vmem [resolvable:$true] %s94_s21 }
  0x2f   :  { %s2373_s0 = scalar_lea.vmem %s81_s19, 2048  ;;  %p2378_p7 = scmp.lt.s32.totalorder %s81_s19, %s81_s19 }
  0x30   :  { %p2374_p6 = scmp.ne.s32.totalorder %s81_s19, %s2373_s0  ;;  %p2379_p8 = scmp.lt.s32.totalorder %s2373_s0, %s2373_s0 }
  0x32   :  { %p2380_p9 = por %p2379_p8, %p2378_p7 }
  0x34   :  { %p2381_p10 = pnand %p2380_p9, %p2374_p6 }
  0x36   :  { %2384 = shalt.err (!%p2381_p10)
}
  0x37   :  { %86 = dma.hbm_to_vmem [thread:$0]  %s2845_s7, 2048, %s81_s19, [#allocation9], %s2437_s22, %s2437_s22, %s2438_s23  }
  0x38   :  { %s2393_s3 = scalar_lea.vmem %s95_s21, 1024  ;;  %p2398_p12 = scmp.lt.s32.totalorder %s95_s21, %s95_s21 }
  0x39   :  { %p2394_p11 = scmp.ne.s32.totalorder %s95_s21, %s2393_s3  ;;  %p2399_p13 = scmp.lt.s32.totalorder %s2393_s3, %s2393_s3 }
  0x3b   :  { %p2400_p0 = por %p2399_p13, %p2398_p12 }
  0x3d   :  { %p2401_p1 = pnand %p2400_p0, %p2394_p11 }
  0x3f   :  { %2404 = shalt.err (!%p2401_p1)
}
  0x40   :  { %100 = dma.hbm_to_vmem [thread:$0]  %s2847_s9, 1024, %s95_s21, [#allocation12], %s2437_s22, %s2437_s22, %s2438_s23  }
  0x41   :  { %2425 = dma.done.wait [#allocation3], 1024  }
  0x42   :  { %2426 = vsyncadd [#allocation3], 4294966272 }
  0x43   :  { %2427 = dma.done.wait [#allocation6], 3456  }
  0x44   :  { %2428 = vsyncadd [#allocation6], 4294963840 }
  0x45   :  { %2429 = dma.done.wait [#allocation9], 3072  }
  0x46   :  { %2430 = vsyncadd [#allocation9], 4294964224 }
  0x47   :  { %2431 = dma.done.wait [#allocation12], 1024  }
  0x48   :  { %2432 = vsyncadd [#allocation12], 4294966272  ;;  %v2210_v0 = vld [vmem:[#allocation5 + $0x10] sm:$0xff]   ;;  %v2211_v1 = vld [vmem:[#allocation5 + $0x8] sm:$0xff]   ;;  %vm209_vm0 = vcmask 392192   ;;  %vm596_vm1 = vcmask 1046528  }
  0x49   :  { %1985 = vmatprep.subr.bf16.mxu0 %v2210_v0  ;;  %v2213_v2 = vld [vmem:[#allocation2] sm:$0xff]   ;;  %v2214_v4 = vld [vmem:[#allocation2 + $0x8] sm:$0xff]   ;;  %v2215_v5 = vld [vmem:[#allocation2 + $0x10] sm:$0xff]   ;;  %vm783_vm2 = vcmask 1045504   ;;  %vm2445_vm3 = vmmov 0   ;;  %vm1431_vm5 = vcmask 1041409  }
  0x4a   :  { %1986 = vmatpush3.bf16.msra.mxu0 %v2210_v0  ;;  %v2212_v3 = vld [vmem:[#allocation5] sm:$0xff]   ;;  %1991 = vmatprep.mubr.msk.bf16.mxu0 %vm209_vm0, %v2213_v2  ;;  %v2221_v6 = vld [vmem:[#allocation7 + $0x38] sm:$0xff]   ;;  %v2222_v7 = vld [vmem:[#allocation7 + $0x30] sm:$0xff]   ;;  %vm1433_vm6 = vcmask 1042434   ;;  %vm1435_vm7 = vcmask 1043459  }
  0x4b   :  { %1987 = vmatprep.subr.bf16.mxu0 %v2211_v1  ;;  %2007 = vmatprep.subr.bf16.mxu1 %v2221_v6  ;;  %v2224_v8 = vld [vmem:[#allocation7 + $0x78] sm:$0xff]   ;;  %v2223_v9 = vld [vmem:[#allocation7 + $0x28] sm:$0xff]   ;;  %v2216_v10 = vld [vmem:[#allocation2 + $0x18] sm:$0xff]  }
  0x4c   :  { %2008 = vmatpush3.bf16.msra.mxu1 %v2221_v6  ;;  %v2226_v11 = vld [vmem:[#allocation7 + $0x70] sm:$0xff]   ;;  %v2217_v12 = vld [vmem:[#allocation2 + $0x20] sm:$0xff]   ;;  %v2225_v13 = vld [vmem:[#allocation7 + $0x20] sm:$0xff]  }
  0x4d   :  { %2009 = vmatprep.subr.bf16.mxu1 %v2222_v7  ;;  %v2227_v14 = vld [vmem:[#allocation7 + $0x18] sm:$0xff]   ;;  %v2218_v15 = vld [vmem:[#allocation2 + $0x28] sm:$0xff]   ;;  %v2220_v17 = vld [vmem:[#allocation2 + $0x38] sm:$0xff]  }
  0x4e   :  { %1988 = vmatpush3.bf16.msra.mxu0 %v2211_v1  ;;  %v2219_v16 = vld [vmem:[#allocation2 + $0x30] sm:$0xff]   ;;  %v2228_v18 = vld [vmem:[#allocation7 + $0x68] sm:$0xff]   ;;  %v2229_v19 = vld [vmem:[#allocation7 + $0x10] sm:$0xff]  }
  0x4f   :  { %1989 = vmatprep.subr.bf16.mxu0 %v2212_v3  ;;  %v2230_v20 = vld [vmem:[#allocation7 + $0x60] sm:$0xff]   ;;  %v2231_v21 = vld [vmem:[#allocation7 + $0x8] sm:$0xff]   ;;  %v2232_v22 = vld [vmem:[#allocation7 + $0x58] sm:$0xff]  }
  0x50   :  { %2010 = vmatpush3.bf16.msra.mxu1 %v2222_v7  ;;  %v2233_v23 = vld [vmem:[#allocation7] sm:$0xff]   ;;  %v2234_v24 = vld [vmem:[#allocation7 + $0x50] sm:$0xff]   ;;  %v2235_v25 = vld [vmem:[#allocation7 + $0xb8] sm:$0xff]  }
  0x51   :  { %2011 = vmatprep.subr.bf16.mxu1 %v2223_v9  ;;  %v2236_v26 = vld [vmem:[#allocation7 + $0x48] sm:$0xff]   ;;  %v2238_v27 = vld [vmem:[#allocation7 + $0x40] sm:$0xff]   ;;  %v2237_v47 = vld [vmem:[#allocation7 + $0xb0] sm:$0xff]  }
  0x52   :  { %1990 = vmatpush3.bf16.msra.mxu0 %v2212_v3  ;;  %v2557_v28 = vld [vmem:[%s2840_s2] ss:$0 sm:$0xff]  ;;  %v2240_v2 = vld [vmem:[#allocation7 + $0xa0] sm:$0xff]  }
  0x53   :  { %2039 = vmatprep.subr.bf16.mxu0 %v2224_v8  ;;  %v2239_v58 = vld [vmem:[#allocation7 + $0xa8] sm:$0xff]  }
  0x54   :  { %2012 = vmatpush3.bf16.msra.mxu1 %v2223_v9 }
  0x55   :  { %1992 = vmatmul.mubr.msk.bf16.vlgmr.msra.gmra.mxu0 %vm209_vm0, %v2214_v4  ;;  %2013 = vmatprep.subr.bf16.mxu1 %v2225_v13 }
  0x56   :  { %1995 = vmatprep.mubr.msk.bf16.mxu0 %vm209_vm0, %v2215_v5  ;;  %2040 = vmatpush3.bf16.msra.mxu0 %v2224_v8 }
  0x57   :  { %2041 = vmatprep.subr.bf16.mxu0 %v2226_v11 }
  0x58   :  { %2014 = vmatpush3.bf16.msra.mxu1 %v2225_v13 }
  0x59   :  { %2015 = vmatprep.subr.bf16.mxu1 %v2227_v14 }
  0x5a   :  { %2042 = vmatpush3.bf16.msra.mxu0 %v2226_v11 }
  0x5b   :  { %2043 = vmatprep.subr.bf16.mxu0 %v2228_v18 }
  0x5c   :  { %2016 = vmatpush3.bf16.msra.mxu1 %v2227_v14  ;;  %v2241_v14 = vld [vmem:[#allocation7 + $0x98] sm:$0xff]  }
  0x5d   :  { %1996 = vmatmul.mubr.msk.bf16.gmra.mxu0 %vm209_vm0, %v2216_v10  ;;  %2017 = vmatprep.subr.bf16.mxu1 %v2229_v19 }
  0x5e   :  { %1999 = vmatprep.mubr.msk.bf16.mxu0 %vm209_vm0, %v2217_v12  ;;  %2044 = vmatpush3.bf16.msra.mxu0 %v2228_v18 }
  0x5f   :  { %2045 = vmatprep.subr.bf16.mxu0 %v2230_v20 }
  0x60   :  { %2018 = vmatpush3.bf16.msra.mxu1 %v2229_v19 }
  0x61   :  { %2019 = vmatprep.subr.bf16.mxu1 %v2231_v21 }
  0x62   :  { %2046 = vmatpush3.bf16.msra.mxu0 %v2230_v20 }
  0x63   :  { %2047 = vmatprep.subr.bf16.mxu0 %v2232_v22 }
  0x64   :  { %2020 = vmatpush3.bf16.msra.mxu1 %v2231_v21 }
  0x65   :  { %2000 = vmatmul.mubr.msk.bf16.gmra.mxu0 %vm209_vm0, %v2218_v15  ;;  %2021 = vmatprep.subr.bf16.mxu1 %v2233_v23 }
  0x66   :  { %2003 = vmatprep.mubr.msk.bf16.mxu0 %vm209_vm0, %v2219_v16  ;;  %2048 = vmatpush3.bf16.msra.mxu0 %v2232_v22  ;;  %v2242_v22 = vld [vmem:[#allocation7 + $0x90] sm:$0xff]  }
  0x67   :  { %2049 = vmatprep.subr.bf16.mxu0 %v2234_v24 }
  0x68   :  { %2022 = vmatpush3.bf16.msra.mxu1 %v2233_v23 }
  0x69   :  { %2071 = vmatprep.subr.bf16.mxu1 %v2235_v25 }
  0x6a   :  { %2050 = vmatpush3.bf16.msra.mxu0 %v2234_v24 }
  0x6b   :  { %2051 = vmatprep.subr.bf16.mxu0 %v2236_v26 }
  0x6d   :  { %2004 = vmatmul.mubr.msk.bf16.gmra.mxu0 %vm209_vm0, %v2220_v17 }
  0x6e   :  { %2052 = vmatpush3.bf16.msra.mxu0 %v2236_v26 }
  0x6f   :  { %2053 = vmatprep.subr.bf16.mxu0 %v2238_v27 }
  0x72   :  { %2054 = vmatpush3.bf16.msra.mxu0 %v2238_v27 }
 0x115   :  { %v1993_v29 = vpop.f32.mrf.mxu0 }
 0x116   :  { %v333_v31 = vadd.f32 %v1993_v29, %v2557_v28 }
 0x117   :  { %v268_v30 = vpop.f32.mrf.mxu0 }
 0x118   :  { %v331_v33 = vadd.f32 %v2557_v28, %v268_v30  ;;  %v349_v36 = vmax.f32 %v333_v31, 0.0 }
 0x119   :  { %v1994_v32 = vpop.f32.mrf.mxu0 }
 0x11a   :  { %v334_v34 = vadd.f32 %v1994_v32, %v2557_v28  ;;  %v347_v40 = vmax.f32 %v331_v33, 0.0 }
 0x11b   :  { %v271_v35 = vpop.f32.mrf.mxu0 }
 0x11c   :  { %v350_v37 = vmax.f32 %v334_v34, 0.0  ;;  %v332_v38 = vadd.f32 %v2557_v28, %v271_v35  ;;  %v2243_v34 = vld [vmem:[#allocation7 + $0x88] sm:$0xff]  }
 0x11d   :  { %v1997_v39 = vpop.f32.mrf.mxu0 }
 0x11e   :  { %v2563_v41 = vpack.c.bf16 %v350_v37, %v349_v36  ;;  %v348_v42 = vmax.f32 %v332_v38, 0.0  ;;  %v337_v45 = vadd.f32 %v1997_v39, %v2557_v28 }
 0x11f   :  { %v284_v43 = vpop.f32.mrf.mxu0 }
 0x120   :  { %v2565_v44 = vpack.c.bf16 %v348_v42, %v347_v40  ;;  %v335_v48 = vadd.f32 %v2557_v28, %v284_v43  ;;  %v598_v51 = vrot.slane %v2563_v41, 1  ;;  %v353_v53 = vmax.f32 %v337_v45, 0.0  ;;  %v2244_v40 = vld [vmem:[#allocation7 + $0x80] sm:$0xff]  }
 0x121   :  { %v1998_v46 = vpop.f32.mrf.mxu0 }
 0x122   :  { %v338_v49 = vadd.f32 %v1998_v46, %v2557_v28  ;;  %2023 = vmatprep.mubr.bf16.mxu1 %v2565_v44  ;;  %v597_v50 = vrot.slane %v2565_v44, 1  ;;  %v351_v59 = vmax.f32 %v335_v48, 0.0  ;;  %v784_v38 = vrot.slane %v2565_v44, 2 }
 0x123   :  { %v287_v52 = vpop.f32.mrf.mxu0  ;;  %2024 = vmatmul.mubr.bf16.vlgmr.msra.gmra.mxu1 %v2563_v41 }
 0x124   :  { %v354_v54 = vmax.f32 %v338_v49, 0.0  ;;  %v336_v55 = vadd.f32 %v2557_v28, %v287_v52  ;;  %2072 = vmatpush3.bf16.msra.mxu1 %v2235_v25  ;;  %v599_v56 = vsel %vm596_vm1, %v597_v50, %v598_v51 }
 0x125   :  { %v2001_v57 = vpop.f32.mrf.mxu0  ;;  %2055 = vmatprep.mubr.bf16.mxu0 %v599_v56  ;;  %2073 = vmatprep.subr.bf16.mxu1 %v2237_v47 }
 0x126   :  { %v2576_v60 = vpack.c.bf16 %v354_v54, %v353_v53  ;;  %v352_v61 = vmax.f32 %v336_v55, 0.0  ;;  %v341_v62 = vadd.f32 %v2001_v57, %v2557_v28 }
 0x127   :  { %v300_v63 = vpop.f32.mrf.mxu0 }
 0x128   :  { %v2579_v0 = vpack.c.bf16 %v352_v61, %v351_v59  ;;  %2074 = vmatpush3.bf16.msra.mxu1 %v2237_v47  ;;  %v339_v4 = vadd.f32 %v2557_v28, %v300_v63  ;;  %v602_v6 = vrot.slane %v2576_v60, 1  ;;  %v357_v7 = vmax.f32 %v341_v62, 0.0  ;;  %v2245_v63 = vld [vmem:[#allocation8 + $0x38] sm:$0xff]  }
 0x129   :  { %v2002_v1 = vpop.f32.mrf.mxu0  ;;  %2075 = vmatprep.subr.bf16.mxu1 %v2239_v58  ;;  %v789_v49 = vrot.slane %v2576_v60, 2  ;;  %2103 = vmatprep.subr.bf16.mxu0 %v2245_v63 }
 0x12a   :  { %v600_v3 = vrot.slane %v2579_v0, 1  ;;  %v342_v5 = vadd.f32 %v2002_v1, %v2557_v28  ;;  %2027 = vmatprep.mubr.bf16.mxu1 %v2579_v0  ;;  %v355_v15 = vmax.f32 %v339_v4, 0.0  ;;  %v787_v44 = vrot.slane %v2579_v0, 2  ;;  %v2246_v0 = vld [vmem:[#allocation8 + $0x30] sm:$0xff]   ;;  %v2247_v1 = vld [vmem:[#allocation8 + $0x28] sm:$0xff]  }
 0x12b   :  { %v303_v8 = vpop.f32.mrf.mxu0  ;;  %2028 = vmatmul.mubr.bf16.gmra.mxu1 %v2576_v60  ;;  %v2250_v4 = vld [vmem:[#allocation8 + $0x10] sm:$0xff]  }
 0x12c   :  { %v358_v9 = vmax.f32 %v342_v5, 0.0  ;;  %v340_v10 = vadd.f32 %v2557_v28, %v303_v8  ;;  %2076 = vmatpush3.bf16.msra.mxu1 %v2239_v58  ;;  %v601_v11 = vsel %vm596_vm1, %v598_v51, %v600_v3  ;;  %v603_v12 = vsel %vm596_vm1, %v600_v3, %v602_v6  ;;  %v2249_v3 = vld [vmem:[#allocation8 + $0x18] sm:$0xff]   ;;  %v2251_v5 = vld [vmem:[#allocation8 + $0x8] sm:$0xff]  }
 0x12d   :  { %v2005_v13 = vpop.f32.mrf.mxu0  ;;  %2056 = vmatmul.mubr.bf16.vlgmr.msra.gmra.mxu0 %v601_v11  ;;  %2077 = vmatprep.subr.bf16.mxu1 %v2240_v2  ;;  %v790_v51 = vsel %vm783_vm2, %v787_v44, %v789_v49 }
 0x12e   :  { %v2590_v16 = vpack.c.bf16 %v358_v9, %v357_v7  ;;  %v356_v17 = vmax.f32 %v340_v10, 0.0  ;;  %2059 = vmatprep.mubr.bf16.mxu0 %v603_v12  ;;  %v345_v18 = vadd.f32 %v2005_v13, %v2557_v28  ;;  %2104 = vmatpush3.bf16.msra.mxu0 %v2245_v63 }
 0x12f   :  { %v316_v19 = vpop.f32.mrf.mxu0  ;;  %2105 = vmatprep.subr.bf16.mxu0 %v2246_v0 }
 0x130   :  { %v415_v20 = vpack.c.bf16 %v356_v17, %v355_v15  ;;  %2078 = vmatpush3.bf16.msra.mxu1 %v2240_v2  ;;  %v343_v23 = vadd.f32 %v2557_v28, %v316_v19  ;;  %v606_v26 = vrot.slane %v2590_v16, 1  ;;  %v361_v27 = vmax.f32 %v345_v18, 0.0  ;;  %v2248_v2 = vld [vmem:[#allocation8 + $0x20] sm:$0xff]  }
 0x131   :  { %v2006_v21 = vpop.f32.mrf.mxu0  ;;  %2079 = vmatprep.subr.bf16.mxu1 %v2241_v14  ;;  %v793_v54 = vrot.slane %v2590_v16, 2 }
 0x132   :  { %v346_v24 = vadd.f32 %v2006_v21, %v2557_v28  ;;  %2031 = vmatprep.mubr.bf16.mxu1 %v415_v20  ;;  %v604_v25 = vrot.slane %v415_v20, 1  ;;  %v359_v35 = vmax.f32 %v343_v23, 0.0  ;;  %v791_v53 = vrot.slane %v415_v20, 2  ;;  %2106 = vmatpush3.bf16.msra.mxu0 %v2246_v0 }
 0x133   :  { %v319_v29 = vpop.f32.mrf.mxu0  ;;  %2032 = vmatmul.mubr.bf16.gmra.mxu1 %v2590_v16  ;;  %2107 = vmatprep.subr.bf16.mxu0 %v2247_v1 }
 0x134   :  { %v362_v30 = vmax.f32 %v346_v24, 0.0  ;;  %v344_v31 = vadd.f32 %v2557_v28, %v319_v29  ;;  %2080 = vmatpush3.bf16.msra.mxu1 %v2241_v14  ;;  %v605_v32 = vsel %vm596_vm1, %v602_v6, %v604_v25  ;;  %v607_v33 = vsel %vm596_vm1, %v604_v25, %v606_v26  ;;  %v2252_v6 = vld [vmem:[#allocation8] sm:$0xff]  }
 0x135   :  { %2060 = vmatmul.mubr.bf16.gmra.mxu0 %v605_v32  ;;  %2081 = vmatprep.subr.bf16.mxu1 %v2242_v22  ;;  %v785_v28 = vrot.slane %v2563_v41, 2  ;;  %v2443_v41 = vmov 0   ;;  %v792_v55 = vsel %vm783_vm2, %v789_v49, %v791_v53  ;;  %v794_v56 = vsel %vm783_vm2, %v791_v53, %v793_v54 }
 0x136   :  { %v418_v36 = vpack.c.bf16 %v362_v30, %v361_v27  ;;  %v360_v37 = vmax.f32 %v344_v31, 0.0  ;;  %2063 = vmatprep.mubr.bf16.mxu0 %v607_v33  ;;  %v612_v48 = vrot.slane %v2443_v41, 1  ;;  %v799_v61 = vrot.slane %v2443_v41, 2  ;;  %2108 = vmatpush3.bf16.msra.mxu0 %v2247_v1  ;;  %v2631_v33 = vld [vmem:[%s2842_s4] ss:$0 sm:$0xff] }
 0x137   :  { %v786_v45 = vsel %vm783_vm2, %v784_v38, %v785_v28  ;;  %v788_v50 = vsel %vm783_vm2, %v785_v28, %v787_v44  ;;  %2109 = vmatprep.subr.bf16.mxu0 %v2248_v2 }
 0x138   :  { %v417_v39 = vpack.c.bf16 %v360_v37, %v359_v35  ;;  %2082 = vmatpush3.bf16.msra.mxu1 %v2242_v22  ;;  %v610_v43 = vrot.slane %v418_v36, 1  ;;  %v797_v58 = vrot.slane %v418_v36, 2 }
 0x139   :  { %2083 = vmatprep.subr.bf16.mxu1 %v2243_v34 }
 0x13a   :  { %2035 = vmatprep.mubr.bf16.mxu1 %v417_v39  ;;  %v608_v42 = vrot.slane %v417_v39, 1  ;;  %v613_v52 = vsel %vm596_vm1, %v610_v43, %v612_v48  ;;  %v795_v57 = vrot.slane %v417_v39, 2  ;;  %v800_v62 = vsel %vm783_vm2, %v797_v58, %v799_v61  ;;  %2110 = vmatpush3.bf16.msra.mxu0 %v2248_v2 }
 0x13b   :  { %2036 = vmatmul.mubr.bf16.gmra.mxu1 %v418_v36  ;;  %2111 = vmatprep.subr.bf16.mxu0 %v2249_v3 }
 0x13c   :  { %2084 = vmatpush3.bf16.msra.mxu1 %v2243_v34  ;;  %2087 = vmatprep.mubr.bf16.mxu1 %v786_v45  ;;  %v609_v46 = vsel %vm596_vm1, %v606_v26, %v608_v42  ;;  %v611_v47 = vsel %vm596_vm1, %v608_v42, %v610_v43  ;;  %v796_v59 = vsel %vm783_vm2, %v793_v54, %v795_v57 }
 0x13d   :  { %2064 = vmatmul.mubr.bf16.gmra.mxu0 %v609_v46  ;;  %2085 = vmatprep.subr.bf16.mxu1 %v2244_v40  ;;  %v798_v60 = vsel %vm783_vm2, %v795_v57, %v797_v58 }
 0x13e   :  { %2067 = vmatprep.mubr.bf16.mxu0 %v611_v47  ;;  %2112 = vmatpush3.bf16.msra.mxu0 %v2249_v3 }
 0x13f   :  { %2113 = vmatprep.subr.bf16.mxu0 %v2250_v4 }
 0x140   :  { %2086 = vmatpush3.bf16.msra.mxu1 %v2244_v40 }
 0x142   :  { %2114 = vmatpush3.bf16.msra.mxu0 %v2250_v4 }
 0x143   :  { %2088 = vmatmul.mubr.bf16.vlgmr.msra.gmra.mxu1 %v788_v50  ;;  %2115 = vmatprep.subr.bf16.mxu0 %v2251_v5 }
 0x144   :  { %2091 = vmatprep.mubr.bf16.mxu1 %v790_v51 }
 0x145   :  { %2068 = vmatmul.mubr.bf16.gmra.mxu0 %v613_v52 }
 0x146   :  { %2116 = vmatpush3.bf16.msra.mxu0 %v2251_v5 }
 0x147   :  { %2117 = vmatprep.subr.bf16.mxu0 %v2252_v6 }
 0x14a   :  { %2118 = vmatpush3.bf16.msra.mxu0 %v2252_v6 }
 0x14b   :  { %2092 = vmatmul.mubr.bf16.gmra.mxu1 %v792_v55 }
 0x14c   :  { %2095 = vmatprep.mubr.bf16.mxu1 %v794_v56 }
 0x153   :  { %2096 = vmatmul.mubr.bf16.gmra.mxu1 %v796_v59 }
 0x154   :  { %2099 = vmatprep.mubr.bf16.mxu1 %v798_v60 }
 0x15b   :  { %2100 = vmatmul.mubr.bf16.gmra.mxu1 %v800_v62 }
 0x1e3   :  { %v2025_v7 = vpop.f32.mrf.mxu1 }
 0x1e4   :  { %v573_v37 = vadd.f32 %v2025_v7, %v2631_v33 }
 0x1e5   :  { %v508_v8 = vpop.f32.mrf.mxu1 }
 0x1e6   :  { %v571_v35 = vadd.f32 %v2631_v33, %v508_v8 }
 0x1e7   :  { %v2026_v9 = vpop.f32.mrf.mxu1 }
 0x1e8   :  { %v574_v36 = vadd.f32 %v2026_v9, %v2631_v33 }
 0x1e9   :  { %v511_v10 = vpop.f32.mrf.mxu1 }
 0x1ea   :  { %v572_v28 = vadd.f32 %v2631_v33, %v511_v10 }
 0x1eb   :  { %v2029_v11 = vpop.f32.mrf.mxu1 }
 0x1ec   :  { %v577_v57 = vadd.f32 %v2029_v11, %v2631_v33 }
 0x1ed   :  { %v524_v12 = vpop.f32.mrf.mxu1  ;;  %v2057_v13 = vpop.f32.mrf.mxu0 }
 0x1ee   :  { %v769_v43 = vadd.f32 %v2057_v13, %v573_v37  ;;  %v575_v53 = vadd.f32 %v2631_v33, %v524_v12 }
 0x1ef   :  { %v2030_v14 = vpop.f32.mrf.mxu1  ;;  %v704_v15 = vpop.f32.mrf.mxu0 }
 0x1f0   :  { %v767_v40 = vadd.f32 %v704_v15, %v571_v35  ;;  %v578_v54 = vadd.f32 %v2030_v14, %v2631_v33 }
 0x1f1   :  { %v527_v16 = vpop.f32.mrf.mxu1  ;;  %v2058_v17 = vpop.f32.mrf.mxu0 }
 0x1f2   :  { %v770_v42 = vadd.f32 %v2058_v17, %v574_v36  ;;  %v576_v61 = vadd.f32 %v2631_v33, %v527_v16 }
 0x1f3   :  { %v2616_v18 = vpop.f32.mrf.mxu1  ;;  %v707_v19 = vpop.f32.mrf.mxu0 }
 0x1f4   :  { %v768_v46 = vadd.f32 %v707_v19, %v572_v28  ;;  %v581_v17 = vadd.f32 %v2616_v18, %v2631_v33 }
 0x1f5   :  { %v540_v20 = vpop.f32.mrf.mxu1  ;;  %v2061_v21 = vpop.f32.mrf.mxu0 }
 0x1f6   :  { %v773_v1 = vadd.f32 %v2061_v21, %v577_v57  ;;  %v579_v13 = vadd.f32 %v2631_v33, %v540_v20 }
 0x1f7   :  { %v2034_v22 = vpop.f32.mrf.mxu1  ;;  %v720_v23 = vpop.f32.mrf.mxu0 }
 0x1f8   :  { %v771_v62 = vadd.f32 %v720_v23, %v575_v53  ;;  %v582_v14 = vadd.f32 %v2034_v22, %v2631_v33 }
 0x1f9   :  { %v2618_v24 = vpop.f32.mrf.mxu1  ;;  %v2062_v25 = vpop.f32.mrf.mxu0 }
 0x1fa   :  { %v774_v63 = vadd.f32 %v2062_v25, %v578_v54  ;;  %v580_v25 = vadd.f32 %v2631_v33, %v2618_v24 }
 0x1fb   :  { %v2620_v26 = vpop.f32.mrf.mxu1  ;;  %v723_v27 = vpop.f32.mrf.mxu0 }
 0x1fc   :  { %v772_v4 = vadd.f32 %v723_v27, %v576_v61 }
 0x1fd   :  { %v2622_v29 = vpop.f32.mrf.mxu1  ;;  %v2065_v31 = vpop.f32.mrf.mxu0 }
 0x1fe   :  { %v777_v36 = vadd.f32 %v2065_v31, %v581_v17  ;;  %v583_v24 = vadd.f32 %v2631_v33, %v2622_v29  ;;  %v1194_v17 = vlaneseq }
 0x1ff   :  { %v2624_v30 = vpop.f32.mrf.mxu1  ;;  %v736_v38 = vpop.f32.mrf.mxu0 }
 0x200   :  { %v775_v27 = vadd.f32 %v736_v38, %v579_v13  ;;  %v586_v38 = vadd.f32 %v2624_v30, %v2631_v33  ;;  %v2265_v13 = vld [vmem:[#allocation10 + $0x58] sm:$0xff]  }
 0x201   :  { %v2626_v32 = vpop.f32.mrf.mxu1  ;;  %v2066_v41 = vpop.f32.mrf.mxu0 }
 0x203   :  { %v2089_v34 = vpop.f32.mrf.mxu1  ;;  %v739_v58 = vpop.f32.mrf.mxu0 }
 0x204   :  { %v956_v48 = vadd.f32 %v2089_v34, %v769_v43  ;;  %v778_v34 = vadd.f32 %v2066_v41, %v582_v14  ;;  %v776_v20 = vadd.f32 %v739_v58, %v580_v25  ;;  %v2266_v14 = vld [vmem:[#allocation10 + $0x50] sm:$0xff]   ;;  %v2681_v25 = vld [vmem:[%s2844_s6] ss:$0 sm:$0xff] }
 0x205   :  { %v891_v39 = vpop.f32.mrf.mxu1  ;;  %v2069_v7 = vpop.f32.mrf.mxu0 }
 0x206   :  { %v954_v47 = vadd.f32 %v891_v39, %v767_v40  ;;  %v972_v59 = vmax.f32 %v956_v48, 0.0 }
 0x207   :  { %v2090_v45 = vpop.f32.mrf.mxu1  ;;  %v752_v19 = vpop.f32.mrf.mxu0 }
 0x208   :  { %v957_v44 = vadd.f32 %v2090_v45, %v770_v42  ;;  %v970_v55 = vmax.f32 %v954_v47, 0.0 }
 0x209   :  { %v894_v49 = vpop.f32.mrf.mxu1  ;;  %v2070_v40 = vpop.f32.mrf.mxu0 }
 0x20a   :  { %v955_v50 = vadd.f32 %v894_v49, %v768_v46  ;;  %v973_v51 = vmax.f32 %v957_v44, 0.0  ;;  %v585_v44 = vadd.f32 %v2620_v26, %v2631_v33 }
 0x20b   :  { %v2093_v52 = vpop.f32.mrf.mxu1  ;;  %v755_v41 = vpop.f32.mrf.mxu0 }
 0x20c   :  { %v971_v56 = vmax.f32 %v955_v50, 0.0  ;;  %v1003_v2 = vpack.c.bf16 %v973_v51, %v972_v59  ;;  %v960_v8 = vadd.f32 %v2093_v52, %v773_v1  ;;  %v584_v50 = vadd.f32 %v2631_v33, %v2626_v32  ;;  %v2253_v33 = vld [vmem:[#allocation10 + $0x38] sm:$0xff]  }
 0x20d   :  { %v907_v60 = vpop.f32.mrf.mxu1  ;;  %v779_v51 = vadd.f32 %v752_v19, %v583_v24  ;;  %v782_v52 = vadd.f32 %v2070_v40, %v586_v38  ;;  %v781_v54 = vadd.f32 %v2069_v7, %v585_v44  ;;  %v2444_v1 = vmov 0.0   ;;  %v2259_v7 = vld [vmem:[#allocation10 + $0x8] sm:$0xff]  }
 0x20e   :  { %v1002_v0 = vpack.c.bf16 %v971_v56, %v970_v55  ;;  %v958_v5 = vadd.f32 %v907_v60, %v771_v62  ;;  %v976_v21 = vmax.f32 %v960_v8, 0.0  ;;  %v780_v56 = vadd.f32 %v755_v41, %v584_v50  ;;  %2155 = vmatprep.subr.bf16.mxu0 %v2444_v1  ;;  %2135 = vmatprep.subr.bf16.mxu1 %v2444_v1  ;;  %v2260_v8 = vld [vmem:[#allocation10] sm:$0xff]  }
 0x20f   :  { %v2094_v3 = vpop.f32.mrf.mxu1  ;;  %2151 = vmatprep.mubr.msk.bf16.mxu1 %vm2445_vm3, %v2444_v1 }
 0x210   :  { %v961_v6 = vadd.f32 %v2094_v3, %v774_v63  ;;  %2119 = vmatprep.mubr.bf16.mxu0 %v1002_v0  ;;  %v974_v15 = vmax.f32 %v958_v5, 0.0  ;;  %v2255_v3 = vld [vmem:[#allocation10 + $0x28] sm:$0xff]   ;;  %v2257_v5 = vld [vmem:[#allocation10 + $0x18] sm:$0xff]  }
 0x211   :  { %v910_v9 = vpop.f32.mrf.mxu1  ;;  %2120 = vmatmul.mubr.bf16.vlgmr.msra.gmra.mxu0 %v1003_v2  ;;  %v2254_v2 = vld [vmem:[#allocation10 + $0x30] sm:$0xff]  }
 0x212   :  { %v959_v10 = vadd.f32 %v910_v9, %v772_v4  ;;  %v977_v11 = vmax.f32 %v961_v6, 0.0  ;;  %2156 = vmatpush3.bf16.msra.mxu0 %v2253_v33  ;;  %v2256_v4 = vld [vmem:[#allocation10 + $0x20] sm:$0xff]   ;;  %v2258_v6 = vld [vmem:[#allocation10 + $0x10] sm:$0xff]   ;;  %v2261_v9 = vld [vmem:[#allocation10 + $0x78] sm:$0xff]  }
 0x213   :  { %v2097_v12 = vpop.f32.mrf.mxu1  ;;  %2157 = vmatprep.subr.bf16.mxu0 %v2444_v1  ;;  %2136 = vmatpush3.bf16.msra.mxu1 %v2261_v9 }
 0x214   :  { %v975_v16 = vmax.f32 %v959_v10, 0.0  ;;  %v1005_v37 = vpack.c.bf16 %v977_v11, %v976_v21  ;;  %v964_v42 = vadd.f32 %v2097_v12, %v777_v36  ;;  %2137 = vmatprep.subr.bf16.mxu1 %v2444_v1  ;;  %v2262_v10 = vld [vmem:[#allocation10 + $0x70] sm:$0xff]   ;;  %v2263_v11 = vld [vmem:[#allocation10 + $0x68] sm:$0xff]   ;;  %v2264_v12 = vld [vmem:[#allocation10 + $0x60] sm:$0xff]  }
 0x215   :  { %v923_v23 = vpop.f32.mrf.mxu1 }
 0x216   :  { %v1004_v35 = vpack.c.bf16 %v975_v16, %v974_v15  ;;  %v962_v28 = vadd.f32 %v923_v23, %v775_v27  ;;  %v980_v48 = vmax.f32 %v964_v42, 0.0  ;;  %2158 = vmatpush3.bf16.msra.mxu0 %v2254_v2  ;;  %v2267_v15 = vld [vmem:[#allocation10 + $0x48] sm:$0xff]   ;;  %v2268_v16 = vld [vmem:[#allocation10 + $0x40] sm:$0xff]   ;;  %v2676_v23 = vshrl.u32 %v1194_v17, 7 }
 0x217   :  { %v2098_v39 = vpop.f32.mrf.mxu1  ;;  %2159 = vmatprep.subr.bf16.mxu0 %v2444_v1  ;;  %2138 = vmatpush3.bf16.msra.mxu1 %v2262_v10 }
 0x218   :  { %v965_v22 = vadd.f32 %v2098_v39, %v778_v34  ;;  %2123 = vmatprep.mubr.bf16.mxu0 %v1004_v35  ;;  %v978_v31 = vmax.f32 %v962_v28, 0.0  ;;  %2139 = vmatprep.subr.bf16.mxu1 %v2444_v1  ;;  %v2691_v39 = vadd.s32 24, %v2676_v23 }
 0x219   :  { %v926_v43 = vpop.f32.mrf.mxu1  ;;  %2124 = vmatmul.mubr.bf16.gmra.mxu0 %v1005_v37 }
 0x21a   :  { %v963_v18 = vadd.f32 %v926_v43, %v776_v20  ;;  %v981_v45 = vmax.f32 %v965_v22, 0.0  ;;  %2160 = vmatpush3.bf16.msra.mxu0 %v2255_v3  ;;  %vm1202_vm4 = vcmp.lt.s32.totalorder %v2691_v39, 26 }
 0x21b   :  { %v2101_v46 = vpop.f32.mrf.mxu1  ;;  %2161 = vmatprep.subr.bf16.mxu0 %v2444_v1  ;;  %2140 = vmatpush3.bf16.msra.mxu1 %v2263_v11 }
 0x21c   :  { %v979_v47 = vmax.f32 %v963_v18, 0.0  ;;  %v1007_v55 = vpack.c.bf16 %v981_v45, %v980_v48  ;;  %v968_v58 = vadd.f32 %v2101_v46, %v781_v54  ;;  %2141 = vmatprep.subr.bf16.mxu1 %v2444_v1 }
 0x21d   :  { %v939_v49 = vpop.f32.mrf.mxu1 }
 0x21e   :  { %v1006_v53 = vpack.c.bf16 %v979_v47, %v978_v31  ;;  %v966_v57 = vadd.f32 %v939_v49, %v779_v51  ;;  %v984_v63 = vmax.f32 %v968_v58, 0.0  ;;  %2162 = vmatpush3.bf16.msra.mxu0 %v2256_v4 }
 0x21f   :  { %v2102_v29 = vpop.f32.mrf.mxu1  ;;  %2163 = vmatprep.subr.bf16.mxu0 %v2444_v1  ;;  %2142 = vmatpush3.bf16.msra.mxu1 %v2264_v12 }
 0x220   :  { %v969_v30 = vadd.f32 %v2102_v29, %v782_v52  ;;  %2127 = vmatprep.mubr.bf16.mxu0 %v1006_v53  ;;  %v982_v61 = vmax.f32 %v966_v57, 0.0  ;;  %2143 = vmatprep.subr.bf16.mxu1 %v2444_v1 }
 0x221   :  { %v942_v59 = vpop.f32.mrf.mxu1  ;;  %2128 = vmatmul.mubr.bf16.gmra.mxu0 %v1007_v55 }
 0x222   :  { %v967_v26 = vadd.f32 %v942_v59, %v780_v56  ;;  %v985_v60 = vmax.f32 %v969_v30, 0.0  ;;  %2164 = vmatpush3.bf16.msra.mxu0 %v2257_v5 }
 0x223   :  { %2165 = vmatprep.subr.bf16.mxu0 %v2444_v1  ;;  %2144 = vmatpush3.bf16.msra.mxu1 %v2265_v13 }
 0x224   :  { %v983_v62 = vmax.f32 %v967_v26, 0.0  ;;  %v1009_v32 = vpack.c.bf16 %v985_v60, %v984_v63  ;;  %2145 = vmatprep.subr.bf16.mxu1 %v2444_v1 }
 0x226   :  { %v1008_v0 = vpack.c.bf16 %v983_v62, %v982_v61  ;;  %2166 = vmatpush3.bf16.msra.mxu0 %v2258_v6 }
 0x227   :  { %2167 = vmatprep.subr.bf16.mxu0 %v2444_v1  ;;  %2146 = vmatpush3.bf16.msra.mxu1 %v2266_v14 }
 0x228   :  { %2131 = vmatprep.mubr.bf16.mxu0 %v1008_v0  ;;  %2147 = vmatprep.subr.bf16.mxu1 %v2444_v1 }
 0x229   :  { %2132 = vmatmul.mubr.bf16.gmra.mxu0 %v1009_v32 }
 0x22a   :  { %2168 = vmatpush3.bf16.msra.mxu0 %v2259_v7  ;;  %2171 = vmatprep.mubr.msk.bf16.mxu0 %vm2445_vm3, %v2444_v1 }
 0x22b   :  { %2169 = vmatprep.subr.bf16.mxu0 %v2444_v1  ;;  %2148 = vmatpush3.bf16.msra.mxu1 %v2267_v15 }
 0x22c   :  { %2149 = vmatprep.subr.bf16.mxu1 %v2444_v1 }
 0x22e   :  { %2170 = vmatpush3.bf16.msra.mxu0 %v2260_v8 }
 0x22f   :  { %2150 = vmatpush3.bf16.msra.mxu1 %v2268_v16 }
 0x230   :  { %2175 = vmatprep.subr.bf16.mxu1 %v2444_v1 }
 0x2d1   :  { %v2121_v19 = vpop.f32.mrf.mxu0 }
 0x2d2   :  { %v1164_v37 = vadd.f32 %v2121_v19, %v2681_v25 }
 0x2d3   :  { %v1099_v21 = vpop.f32.mrf.mxu0 }
 0x2d4   :  { %v2684_v34 = vadd.f32 %v2681_v25, %v1099_v21  ;;  %v1180_v18 = vmax.f32 %v1164_v37, 0.0 }
 0x2d5   :  { %v2122_v27 = vpop.f32.mrf.mxu0 }
 0x2d6   :  { %v2687_v35 = vadd.f32 %v2122_v27, %v2681_v25  ;;  %v1178_v22 = vmax.f32 %v2684_v34, 0.0 }
 0x2d7   :  { %v1102_v36 = vpop.f32.mrf.mxu0 }
 0x2d8   :  { %v1163_v20 = vadd.f32 %v2681_v25, %v1102_v36  ;;  %v1181_v42 = vmax.f32 %v2687_v35, 0.0 }
 0x2d9   :  { %v2125_v28 = vpop.f32.mrf.mxu0 }
 0x2da   :  { %v1179_v40 = vmax.f32 %v1163_v20, 0.0  ;;  %v1214_v31 = vsel %vm1202_vm4, %v1181_v42, 0.0  ;;  %v2706_v48 = vadd.f32 %v2125_v28, %v2681_v25 }
 0x2db   :  { %v1115_v43 = vpop.f32.mrf.mxu0 }
 0x2dc   :  { %v1227_v45 = vadd.f32 %v1179_v40, %v1178_v22  ;;  %v2698_v38 = vadd.f32 %v2681_v25, %v1115_v43  ;;  %v1184_v56 = vmax.f32 %v2706_v48, 0.0 }
 0x2dd   :  { %v2126_v46 = vpop.f32.mrf.mxu0 }
 0x2de   :  { %v1228_v24 = vadd.f32 %v1227_v45, %v1180_v18  ;;  %v2703_v47 = vadd.f32 %v2126_v46, %v2681_v25  ;;  %v1182_v52 = vmax.f32 %v2698_v38, 0.0 }
 0x2df   :  { %v1118_v44 = vpop.f32.mrf.mxu0 }
 0x2e0   :  { %v1229_v41 = vadd.f32 %v1228_v24, %v1214_v31  ;;  %v2709_v49 = vadd.f32 %v2681_v25, %v1118_v44  ;;  %v1185_v54 = vmax.f32 %v2703_v47, 0.0 }
 0x2e1   :  { %v2129_v50 = vpop.f32.mrf.mxu0 }
 0x2e2   :  { %v1230_v51 = vrot.slane %v1229_v41, 4  ;;  %v1183_v53 = vmax.f32 %v2709_v49, 0.0  ;;  %v1218_v60 = vsel %vm1202_vm4, %v1185_v54, 0.0  ;;  %v2732_v32 = vadd.f32 %v2129_v50, %v2681_v25 }
 0x2e3   :  { %v1131_v55 = vpop.f32.mrf.mxu0 }
 0x2e4   :  { %v1231_v29 = vadd.f32 %v1230_v51, %v1229_v41  ;;  %v1236_v57 = vadd.f32 %v1183_v53, %v1182_v52  ;;  %v2722_v26 = vadd.f32 %v2681_v25, %v1131_v55  ;;  %v1188_v11 = vmax.f32 %v2732_v32, 0.0 }
 0x2e5   :  { %v2130_v30 = vpop.f32.mrf.mxu0 }
 0x2e6   :  { %v1232_v58 = vrot.slane %v1231_v29, 2  ;;  %v1237_v59 = vadd.f32 %v1236_v57, %v1184_v56  ;;  %v2729_v61 = vadd.f32 %v2130_v30, %v2681_v25  ;;  %v1186_v5 = vmax.f32 %v2722_v26, 0.0 }
 0x2e7   :  { %v1134_v62 = vpop.f32.mrf.mxu0 }
 0x2e8   :  { %v1233_v63 = vadd.f32 %v1232_v58, %v1231_v29  ;;  %v1238_v0 = vadd.f32 %v1237_v59, %v1218_v60  ;;  %v2735_v33 = vadd.f32 %v2681_v25, %v1134_v62  ;;  %v1189_v7 = vmax.f32 %v2729_v61, 0.0 }
 0x2e9   :  { %v2133_v2 = vpop.f32.mrf.mxu0 }
 0x2ea   :  { %v1234_v3 = vrot.slane %v1233_v63, 1  ;;  %v1239_v4 = vrot.slane %v1238_v0, 4  ;;  %v1187_v6 = vmax.f32 %v2735_v33, 0.0  ;;  %v1222_v17 = vsel %vm1202_vm4, %v1189_v7, 0.0 }
 0x2eb   :  { %v1147_v8 = vpop.f32.mrf.mxu0  ;;  %v2767_v24 = vadd.f32 %v2133_v2, %v2681_v25 }
 0x2ec   :  { %v1235_v9 = vadd.f32 %v1234_v3, %v1233_v63  ;;  %v1240_v10 = vadd.f32 %v1239_v4, %v1238_v0  ;;  %v1245_v12 = vadd.f32 %v1187_v6, %v1186_v5  ;;  %v2754_v19 = vadd.f32 %v2681_v25, %v1147_v8 }
 0x2ed   :  { %v2134_v13 = vpop.f32.mrf.mxu0 }
 0x2ee   :  { %v2745_v14 = vmul.f32 0.03846154, %v1235_v9  ;;  %v1241_v15 = vrot.slane %v1240_v10, 2  ;;  %v1246_v16 = vadd.f32 %v1245_v12, %v1188_v11  ;;  %v2757_v21 = vadd.f32 %v2134_v13, %v2681_v25 }
 0x2ef   :  { %v1150_v27 = vpop.f32.mrf.mxu0 }
 0x2f0   :  { %v1267_v34 = vsub.f32 %v1178_v22, %v2745_v14  ;;  %v1268_v35 = vsub.f32 %v1179_v40, %v2745_v14  ;;  %v1269_v36 = vsub.f32 %v1180_v18, %v2745_v14  ;;  %v1270_v37 = vsub.f32 %v1181_v42, %v2745_v14 }
 0x2f1   :  { %v1242_v20 = vadd.f32 %v1241_v15, %v1240_v10  ;;  %v1247_v28 = vadd.f32 %v1246_v16, %v1222_v17  ;;  %v2764_v43 = vadd.f32 %v2681_v25, %v1150_v27  ;;  %v1190_v40 = vmax.f32 %v2754_v19, 0.0 }
 0x2f2   :  { %v1299_v45 = vmul.f32 %v1267_v34, %v1267_v34  ;;  %v1300_v46 = vmul.f32 %v1268_v35, %v1268_v35  ;;  %v1286_v31 = vsel %vm1202_vm4, %v1270_v37, 0.0  ;;  %v1301_v18 = vmul.f32 %v1269_v36, %v1269_v36 }
 0x2f3   :  { %v1243_v22 = vrot.slane %v1242_v20, 1  ;;  %v1248_v44 = vrot.slane %v1247_v28, 4  ;;  %v1193_v42 = vmax.f32 %v2757_v21, 0.0  ;;  %v1191_v50 = vmax.f32 %v2764_v43, 0.0 }
 0x2f4   :  { %v1315_v41 = vadd.f32 %v1300_v46, %v1299_v45  ;;  %v1302_v29 = vmul.f32 %v1286_v31, %v1286_v31  ;;  %v1192_v25 = vmax.f32 %v2767_v24, 0.0  ;;  %v1415_v61 = vpack.c.bf16 %v2745_v14, %v2745_v14 }
 0x2f5   :  { %v1244_v51 = vadd.f32 %v1243_v22, %v1242_v20  ;;  %v1249_v55 = vadd.f32 %v1248_v44, %v1247_v28  ;;  %v1254_v30 = vadd.f32 %v1191_v50, %v1190_v40  ;;  %v1226_v62 = vsel %vm1202_vm4, %v1193_v42, 0.0 }
 0x2f6   :  { %v1316_v57 = vadd.f32 %v1315_v41, %v1301_v18 }
 0x2f7   :  { %v1264_v58 = vmul.f32 0.03846154, %v1244_v51  ;;  %v1250_v59 = vrot.slane %v1249_v55, 2  ;;  %v1255_v63 = vadd.f32 %v1254_v30, %v1192_v25 }
 0x2f8   :  { %v1317_v60 = vadd.f32 %v1316_v57, %v1302_v29 }
 0x2f9   :  { %v1271_v0 = vsub.f32 %v1182_v52, %v1264_v58  ;;  %v1272_v2 = vsub.f32 %v1183_v53, %v1264_v58  ;;  %v1273_v3 = vsub.f32 %v1184_v56, %v1264_v58  ;;  %v1274_v4 = vsub.f32 %v1185_v54, %v1264_v58 }
 0x2fa   :  { %v1318_v8 = vrot.slane %v1317_v60, 4  ;;  %v1251_v9 = vadd.f32 %v1250_v59, %v1249_v55  ;;  %v1256_v10 = vadd.f32 %v1255_v63, %v1226_v62  ;;  %v1416_v26 = vpack.c.bf16 %v1264_v58, %v1264_v58 }
 0x2fb   :  { %v1303_v12 = vmul.f32 %v1271_v0, %v1271_v0  ;;  %v1304_v13 = vmul.f32 %v1272_v2, %v1272_v2  ;;  %v1290_v15 = vsel %vm1202_vm4, %v1274_v4, 0.0  ;;  %v1305_v52 = vmul.f32 %v1273_v3, %v1273_v3 }
 0x2fc   :  { %v1252_v16 = vrot.slane %v1251_v9, 1  ;;  %v1257_v38 = vrot.slane %v1256_v10, 4  ;;  %v1319_v49 = vadd.f32 %v1318_v8, %v1317_v60  ;;  %v1306_v48 = vmul.f32 %v1290_v15, %v1290_v15 }
 0x2fd   :  { %v1324_v17 = vadd.f32 %v1304_v13, %v1303_v12  ;;  %v1532_v59 = vunpack.c.l.b16 %v1416_v26  ;;  %v1531_v4 = vunpack.c.l.b16 %v1415_v61 }
 0x2fe   :  { %v1253_v53 = vadd.f32 %v1252_v16, %v1251_v9  ;;  %v1258_v27 = vadd.f32 %v1257_v38, %v1256_v10  ;;  %v1320_v35 = vrot.slane %v1319_v49, 2 }
 0x2ff   :  { %v1325_v56 = vadd.f32 %v1324_v17, %v1305_v52 }
 0x300   :  { %v1265_v34 = vmul.f32 0.03846154, %v1253_v53  ;;  %v1259_v47 = vrot.slane %v1258_v27, 2 }
 0x301   :  { %v1326_v54 = vadd.f32 %v1325_v56, %v1306_v48 }
 0x302   :  { %v1275_v36 = vsub.f32 %v1186_v5, %v1265_v34  ;;  %v1276_v37 = vsub.f32 %v1187_v6, %v1265_v34  ;;  %v1277_v20 = vsub.f32 %v1188_v11, %v1265_v34  ;;  %v1278_v45 = vsub.f32 %v1189_v7, %v1265_v34 }
 0x303   :  { %v1327_v28 = vrot.slane %v1326_v54, 4  ;;  %v1260_v46 = vadd.f32 %v1259_v47, %v1258_v27  ;;  %v1321_v5 = vadd.f32 %v1320_v35, %v1319_v49  ;;  %v1417_v6 = vpack.c.bf16 %v1265_v34, %v1265_v34 }
 0x304   :  { %v1307_v24 = vmul.f32 %v1275_v36, %v1275_v36  ;;  %v1308_v31 = vmul.f32 %v1276_v37, %v1276_v37  ;;  %v1294_v44 = vsel %vm1202_vm4, %v1278_v45, 0.0  ;;  %v1309_v41 = vmul.f32 %v1277_v20, %v1277_v20 }
 0x305   :  { %v1328_v22 = vadd.f32 %v1327_v28, %v1326_v54  ;;  %v1261_v18 = vrot.slane %v1260_v46, 1  ;;  %v1310_v11 = vmul.f32 %v1294_v44, %v1294_v44  ;;  %v1322_v57 = vrot.slane %v1321_v5, 1 }
 0x306   :  { %v1333_v33 = vadd.f32 %v1308_v31, %v1307_v24  ;;  %v1533_v60 = vunpack.c.l.b16 %v1417_v6 }
 0x307   :  { %v1329_v51 = vrot.slane %v1328_v22, 2  ;;  %v1262_v32 = vadd.f32 %v1261_v18, %v1260_v46  ;;  %v1323_v43 = vadd.f32 %v1322_v57, %v1321_v5 }
 0x308   :  { %v1334_v55 = vadd.f32 %v1333_v33, %v1309_v41 }
 0x309   :  { %v1330_v7 = vadd.f32 %v1329_v51, %v1328_v22  ;;  %v1266_v29 = vmul.f32 0.03846154, %v1262_v32  ;;  %v1351_v53 = vmul.f32 0.04, %v1323_v43  ;;  %v2276_v43 = vld [vmem:[#allocation11] sm:$0xff]  }
 0x30a   :  { %v1335_v30 = vadd.f32 %v1334_v55, %v1310_v11 }
 0x30b   :  { %v1331_v58 = vrot.slane %v1330_v7, 1  ;;  %v1279_v62 = vsub.f32 %v1190_v40, %v1266_v29  ;;  %v1280_v63 = vsub.f32 %v1191_v50, %v1266_v29  ;;  %v1281_v0 = vsub.f32 %v1192_v25, %v1266_v29 }
 0x30c   :  { %v1336_v2 = vrot.slane %v1335_v30, 4  ;;  %v1282_v14 = vsub.f32 %v1193_v42, %v1266_v29  ;;  %v1418_v3 = vpack.c.bf16 %v1266_v29, %v1266_v29  ;;  %v1535_v40 = vsel %vm1431_vm5, %v1532_v59, %v1531_v4 }
 0x30d   :  { %v1332_v8 = vadd.f32 %v1331_v58, %v1330_v7  ;;  %v1311_v9 = vmul.f32 %v1279_v62, %v1279_v62  ;;  %v1312_v10 = vmul.f32 %v1280_v63, %v1280_v63  ;;  %v1313_v50 = vmul.f32 %v1281_v0, %v1281_v0 }
 0x30e   :  { %v1337_v12 = vadd.f32 %v1336_v2, %v1335_v30  ;;  %v1298_v13 = vsel %vm1202_vm4, %v1282_v14, 0.0  ;;  %v1534_v19 = vunpack.c.l.b16 %v1418_v3  ;;  %v1536_v15 = vsel %vm1433_vm6, %v1533_v60, %v1535_v40  ;;  %v2275_v40 = vld [vmem:[#allocation11 + $0x8] sm:$0xff]  }
 0x30f   :  { %v1342_v25 = vadd.f32 %v1312_v10, %v1311_v9  ;;  %v1352_v16 = vmul.f32 0.04, %v1332_v8  ;;  %v1314_v38 = vmul.f32 %v1298_v13, %v1298_v13  ;;  %vm1357_vm10 = vcmp.eq.f32.partialorder %v1351_v53, inf  ;;  %v2269_v8 = vld [vmem:[#allocation11 + $0x38] sm:$0xff]   ;;  %v2270_v9 = vld [vmem:[#allocation11 + $0x30] sm:$0xff]   ;;  %v2271_v10 = vld [vmem:[#allocation11 + $0x28] sm:$0xff]  }
 0x310   :  { %v1338_v21 = vrot.slane %v1337_v12, 2  ;;  %v1537_v42 = vsel %vm1435_vm7, %v1534_v19, %v1536_v15  ;;  %v1360_v33 = vand.u32 2147483648, %v1351_v53  ;;  %vm1359_vm13 = vcmp.eq.f32.partialorder %v1351_v53, 0.0  ;;  %v2273_v13 = vld [vmem:[#allocation11 + $0x18] sm:$0xff]   ;;  %v2274_v19 = vld [vmem:[#allocation11 + $0x10] sm:$0xff]  }
 0x311   :  { %v1343_v52 = vadd.f32 %v1342_v25, %v1313_v50  ;;  %v1538_v17 = vpack.c.b16 %v1537_v42, %v1537_v42  ;;  %2277 = vrsqrt.f32 %v1352_v16  ;;  %vm1364_vm8 = vcmp.eq.f32.partialorder %v1352_v16, inf }
 0x312   :  { %v1339_v49 = vadd.f32 %v1338_v21, %v1337_v12  ;;  %2279 = vrsqrt.f32 %v1351_v53  ;;  %v1367_v18 = vand.u32 2147483648, %v1352_v16  ;;  %vm1366_vm11 = vcmp.eq.f32.partialorder %v1352_v16, 0.0  ;;  %v2272_v12 = vld [vmem:[#allocation11 + $0x20] sm:$0xff]  }
 0x313   :  { %v1344_v27 = vadd.f32 %v1343_v52, %v1314_v38  ;;  %2172 = vmatmul.mubr.bf16.vlgmr.msra.gmra.mxu0 %v1538_v17 }
 0x314   :  { %v1340_v39 = vrot.slane %v1339_v49, 1 }
 0x315   :  { %v1345_v48 = vrot.slane %v1344_v27, 4 }
 0x316   :  { %v1341_v56 = vadd.f32 %v1340_v39, %v1339_v49  ;;  %v2446_v39 = vmov 1966171168  }
 0x317   :  { %v1346_v34 = vadd.f32 %v1345_v48, %v1344_v27 }
 0x318   :  { %v1353_v47 = vmul.f32 0.04, %v1341_v56  ;;  %v1872_v56 = vld [vmem:[%s2848_s10] ss:$0 sm:$0xff] }
 0x319   :  { %v1347_v54 = vrot.slane %v1346_v34, 2 }
 0x31a   :  { %2281 = vrsqrt.f32 %v1353_v47  ;;  %vm1371_vm9 = vcmp.eq.f32.partialorder %v1353_v47, inf  ;;  %v1374_v41 = vand.u32 2147483648, %v1353_v47  ;;  %vm1373_vm12 = vcmp.eq.f32.partialorder %v1353_v47, 0.0 }
 0x31b   :  { %v1348_v35 = vadd.f32 %v1347_v54, %v1346_v34 }
 0x31d   :  { %v1349_v36 = vrot.slane %v1348_v35, 1 }
 0x31e   :  { %v2278_v28 = vpop.eup %2277 }
 0x31f   :  { %v1350_v37 = vadd.f32 %v1349_v36, %v1348_v35  ;;  %v2280_v45 = vpop.eup %2279  ;;  %v1363_v46 = vmul.f32 %v2278_v28, %v1352_v16 }
 0x320   :  { %v1356_v31 = vmul.f32 %v2280_v45, %v1351_v53 }
 0x321   :  { %v1354_v20 = vmul.f32 0.04, %v1350_v37  ;;  %v1365_v44 = vsel %vm1364_vm8, %v1352_v16, %v1363_v46  ;;  %v1871_v16 = vld [vmem:[%s2846_s8] ss:$0 sm:$0xff]  ;;  %s2447_s8 = smov [#allocation13]  }
 0x322   :  { %v1358_v5 = vsel %vm1357_vm10, %v1351_v53, %v1356_v31  ;;  %v1368_v6 = vsel %vm1366_vm11, %v1367_v18, %v1365_v44  ;;  %s1786_s12 = sshll.u32 %s2447_s8, 4  ;;  %s1787_s12 = int_to_ptr.vmem [resolvable:$true] %s1786_s12 }
 0x323   :  { %2283 = vrsqrt.f32 %v1354_v20  ;;  %v1361_v32 = vsel %vm1359_vm13, %v1360_v33, %v1358_v5  ;;  %v1420_v11 = vpack.c.bf16 %v1368_v6, %v1368_v6  ;;  %vm1378_vm14 = vcmp.eq.f32.partialorder %v1354_v20, inf  ;;  %s2405_s10 = scalar_lea.vmem %s1787_s12, 64  ;;  %p2410_p3 = scmp.lt.s32.totalorder %s1787_s12, %s1787_s12 }
 0x324   :  { %v1419_v29 = vpack.c.bf16 %v1361_v32, %v1361_v32  ;;  %v1381_v57 = vand.u32 2147483648, %v1354_v20  ;;  %vm1380_vm15 = vcmp.eq.f32.partialorder %v1354_v20, 0.0  ;;  %p2406_p2 = scmp.ne.s32.totalorder %s1787_s12, %s2405_s10  ;;  %p2411_p4 = scmp.lt.s32.totalorder %s2405_s10, %s2405_s10 }
 0x325   :  { %v1428_v59 = vunpack.c.l.b16 %v1420_v11 }
 0x326   :  { %v1427_v63 = vunpack.c.l.b16 %v1419_v29  ;;  %p2412_p5 = por %p2411_p4, %p2410_p3 }
 0x327   :  { %v2282_v24 = vpop.eup %2281 }
 0x328   :  { %v1370_v22 = vmul.f32 %v2282_v24, %v1353_v47  ;;  %v1432_v2 = vsel %vm1431_vm5, %v1428_v59, %v1427_v63  ;;  %p2413_p6 = pnand %p2412_p5, %p2406_p2 }
 0x32a   :  { %v1372_v26 = vsel %vm1371_vm9, %v1353_v47, %v1370_v22 }
 0x32b   :  { %v1375_v51 = vsel %vm1373_vm12, %v1374_v41, %v1372_v26 }
 0x32c   :  { %v1421_v61 = vpack.c.bf16 %v1375_v51, %v1375_v51 }
 0x32e   :  { %v1429_v58 = vunpack.c.l.b16 %v1421_v61 }
 0x330   :  { %v2284_v55 = vpop.eup %2283  ;;  %v1434_v14 = vsel %vm1433_vm6, %v1429_v58, %v1432_v2 }
 0x331   :  { %v1377_v7 = vmul.f32 %v2284_v55, %v1354_v20 }
 0x333   :  { %v1379_v30 = vsel %vm1378_vm14, %v1354_v20, %v1377_v7 }
 0x334   :  { %v1382_v60 = vsel %vm1380_vm15, %v1381_v57, %v1379_v30 }
 0x335   :  { %v1422_v62 = vpack.c.bf16 %v1382_v60, %v1382_v60 }
 0x337   :  { %v1430_v0 = vunpack.c.l.b16 %v1422_v62 }
 0x339   :  { %v1436_v3 = vsel %vm1435_vm7, %v1430_v0, %v1434_v14 }
 0x33a   :  { %v1437_v4 = vpack.c.b16 %v1436_v3, %v1436_v3 }
 0x33c   :  { %2152 = vmatmul.mubr.bf16.vlgmr.msra.gmra.mxu1 %v1437_v4 }
 0x33d   :  { %2191 = vmatprep.mubr.msk.bf16.mxu1 %vm2445_vm3, %v2444_v1  ;;  %2176 = vmatpush3.bf16.msra.mxu1 %v2269_v8 }
 0x33e   :  { %2177 = vmatprep.subr.bf16.mxu1 %v2444_v1 }
 0x341   :  { %2178 = vmatpush3.bf16.msra.mxu1 %v2270_v9 }
 0x342   :  { %2179 = vmatprep.subr.bf16.mxu1 %v2444_v1 }
 0x345   :  { %2180 = vmatpush3.bf16.msra.mxu1 %v2271_v10 }
 0x346   :  { %2181 = vmatprep.subr.bf16.mxu1 %v2444_v1 }
 0x349   :  { %2182 = vmatpush3.bf16.msra.mxu1 %v2272_v12 }
 0x34a   :  { %2183 = vmatprep.subr.bf16.mxu1 %v2444_v1 }
 0x34d   :  { %2184 = vmatpush3.bf16.msra.mxu1 %v2273_v13 }
 0x34e   :  { %2185 = vmatprep.subr.bf16.mxu1 %v2444_v1 }
 0x351   :  { %2186 = vmatpush3.bf16.msra.mxu1 %v2274_v19 }
 0x352   :  { %2187 = vmatprep.subr.bf16.mxu1 %v2444_v1 }
 0x355   :  { %2188 = vmatpush3.bf16.msra.mxu1 %v2275_v40 }
 0x356   :  { %2189 = vmatprep.subr.bf16.mxu1 %v2444_v1  ;;  %v1750_v1 = vunpack.c.l.s4 %v2446_v39 }
 0x358   :  { %v1751_v48 = vunpack.c.0.s8 %v1750_v1 }
 0x359   :  { %2190 = vmatpush3.bf16.msra.mxu1 %v2276_v43 }
 0x35a   :  { %v1754_v34 = vsub.s32 %v1751_v48, %v2676_v23 }
 0x3d3   :  { %v1622_v50 = vpop.f32.mrf.mxu0 }
 0x3d5   :  { %v2173_v25 = vpop.f32.mrf.mxu0 }
 0x3d7   :  { %v1625_v15 = vpop.f32.mrf.mxu0 }
 0x3d9   :  { %v2174_v21 = vpop.f32.mrf.mxu0 }
 0x3fc   :  { %v1521_v42 = vpop.f32.mrf.mxu1 }
 0x3fd   :  { %v1623_v38 = vadd.f32 %v1622_v50, %v1521_v42 }
 0x3fe   :  { %v2153_v52 = vpop.f32.mrf.mxu1 }
 0x3ff   :  { %v1635_v17 = vadd.f32 %v1871_v16, %v1623_v38 }
 0x400   :  { %v1524_v49 = vpop.f32.mrf.mxu1 }
 0x401   :  { %v1636_v53 = vpack.c.bf16 %v1635_v17, %v1635_v17 }
 0x402   :  { %v2154_v27 = vpop.f32.mrf.mxu1 }
 0x403   :  { %2192 = vmatmul.mubr.bf16.vlgmr.msra.gmra.mxu1 %v1636_v53 }
 0x4c3   :  { %v1742_v47 = vpop.f32.mrf.mxu1 }
 0x4c4   :  { %v1743_v54 = vadd.f32 %v1872_v56, %v1742_v47 }
 0x4c5   :  { %v2193_v35 = vpop.f32.mrf.mxu1 }
 0x4c6   :  { %v1755_v36 = vrot.slane %v1743_v54, %v1754_v34 }
 0x4c7   :  { %v1745_v37 = vpop.f32.mrf.mxu1 }
 0x4c8   :  { %v1756_v20 = vcombine.high %v1755_v36, %v1755_v36  ;;  %v1763_v28 = vrot.slane %v1755_v36, %v1754_v34  ;;  %1881 = vst.sshfl [vmem:[#allocation13] sm:$0x1 pattern:$0x73625140] %v1755_v36 }
 0x4c9   :  { %v2194_v45 = vpop.f32.mrf.mxu1 }
 0x4ca   :  { %v1770_v46 = vrot.slane %v1756_v20, %v1754_v34  ;;  %v1771_v24 = vcombine.high %v1763_v28, %v1763_v28  ;;  %1882 = vst.sshfl [vmem:[#allocation13 + $0x1] sm:$0x1 pattern:$0x73625140] %v1756_v20 }
 0x4cc   :  { %v1772_v31 = vcombine.high %v1770_v46, %v1770_v46  ;;  %1779 = vst [vmem:[#allocation13 + $0x2] sm:$0x1] %v1771_v24 }
 0x4ce   :  { %1780 = vst [vmem:[#allocation13 + $0x3] sm:$0x1] %v1772_v31 }
 0x4cf   :  { %2416 = shalt.err (!%p2413_p6)
}
 0x4d0   :  { %s2448_s13 = smov 16   ;;  %s2449_s1 = smov 1  }
 0x4d1   :  { %1792 = dma.vmem_to_hbm [thread:$0]  %s1787_s12, 64, %s2849_s11, [#allocation4], %s2448_s13, %s2448_s13, %s2449_s1  }
 0x4d2   :  { %2433 = dma.done.wait [#allocation4], 64  }
 0x4d3   :  { %2434 = vsyncadd [#allocation4], 4294967232 }
 0x4d4   :  { %1796 = vsyncpa [#allocation3], 1 }
 0x4d5   :  { %1797 = vsyncpa [#allocation6], 1 }
 0x4d6   :  { %1798 = vsyncpa [#allocation9], 1 }
 0x4d7   :  { %1799 = vsyncpa [#allocation12], 1 }
 0x4d8   :  { %1800 = vsyncpa [#allocation4], 1 }

// kernel: tpu_custom_call.1
= control target key start
LH: loop header
LB: loop body
LE: loop exit
PB: predicated region body
PF: predicated region fallthrough
CT: control target
= control target key end

     0   :  { %16 = vsyncpa [#allocation3], 0  ;;  %s2838_s0 = inlined_call_operand.hbm [shape: bf16[4,32,48], index: 0, kind: input, shape index: {}]   ;;  %s2839_s1 = inlined_call_operand.hbm [shape: bf16[48,128], index: 1, kind: input, shape index: {}]   ;;  %s2840_s2 = inlined_call_operand.vmem [shape: f32[1,128], index: 2, kind: input, shape index: {}]   ;;  %s2841_s3 = inlined_call_operand.hbm [shape: bf16[384,128], index: 3, kind: input, shape index: {}]   ;;  %s2842_s4 = inlined_call_operand.vmem [shape: f32[1,128], index: 4, kind: input, shape index: {}]   ;;  %s2843_s5 = inlined_call_operand.hbm [shape: bf16[128,128], index: 5, kind: input, shape index: {}]   ;;  %s2844_s6 = inlined_call_operand.vmem [shape: f32[1,128], index: 6, kind: input, shape index: {}]   ;;  %s2845_s7 = inlined_call_operand.hbm [shape: bf16[256,128], index: 7, kind: input, shape index: {}]   ;;  %s2846_s8 = inlined_call_operand.vmem [shape: f32[1,128], index: 8, kind: input, shape index: {}]   ;;  %s2847_s9 = inlined_call_operand.hbm [shape: bf16[128,128], index: 9, kind: input, shape index: {}]   ;;  %s2848_s10 = inlined_call_operand.vmem [shape: f32[1,128], index: 10, kind: input, shape index: {}]   ;;  %s2849_s11 = inlined_call_operand.hbm [shape: f32[4,1,128], index: 11, kind: output, shape index: {}]  }
   0x1   :  { %17 = vsyncpa [#allocation6], 0 }
   0x2   :  { %18 = vsyncpa [#allocation9], 0 }
   0x3   :  { %19 = vsyncpa [#allocation12], 0 }
   0x4   :  { %20 = vsyncpa [#allocation4], 0  ;;  %s2435_s17 = smov [#allocation5]   ;;  %s2436_s19 = smov [#allocation8]  }
   0x5   :  { %s38_s18 = sshll.u32 %s2435_s17, 4  ;;  %s66_s20 = sshll.u32 %s2436_s19, 4  ;;  %s39_s18 = int_to_ptr.vmem [resolvable:$true] %s38_s18  ;;  %s67_s20 = int_to_ptr.vmem [resolvable:$true] %s66_s20 }
   0x6   :  { %s2293_s21 = scalar_lea.vmem %s39_s18, 384  ;;  %p2298_p1 = scmp.lt.s32.totalorder %s39_s18, %s39_s18 }
   0x7   :  { %p2294_p0 = scmp.ne.s32.totalorder %s39_s18, %s2293_s21  ;;  %p2299_p2 = scmp.lt.s32.totalorder %s2293_s21, %s2293_s21 }
   0x9   :  { %p2300_p3 = por %p2299_p2, %p2298_p1 }
   0xb   :  { %p2301_p4 = pnand %p2300_p3, %p2294_p0 }
   0xd   :  { %2304 = shalt.err (!%p2301_p4)
}
   0xe   :  { %s2437_s22 = smov 64   ;;  %s2438_s23 = smov 4  }
   0xf   :  { %44 = dma.hbm_to_vmem [thread:$0]  %s2839_s1, 384, %s39_s18, [#allocation6], %s2437_s22, %s2437_s22, %s2438_s23  }
  0x10   :  { %s2313_s26 = scalar_lea.vmem %s67_s20, 1024  ;;  %p2318_p6 = scmp.lt.s32.totalorder %s67_s20, %s67_s20 }
  0x11   :  { %p2314_p5 = scmp.ne.s32.totalorder %s67_s20, %s2313_s26  ;;  %p2319_p7 = scmp.lt.s32.totalorder %s2313_s26, %s2313_s26 }
  0x13   :  { %p2320_p8 = por %p2319_p7, %p2318_p6 }
  0x15   :  { %p2321_p9 = pnand %p2320_p8, %p2314_p5 }
  0x17   :  { %2324 = shalt.err (!%p2321_p9)
}
  0x18   :  { %72 = dma.hbm_to_vmem [thread:$0]  %s2843_s5, 1024, %s67_s20, [#allocation9], %s2437_s22, %s2437_s22, %s2438_s23  }
  0x19   :  { %s2439_s29 = smov [#allocation2]   ;;  %s2440_s12 = smov [#allocation7]  }
  0x1a   :  { %s26_s30 = sshll.u32 %s2439_s29, 4  ;;  %s52_s13 = sshll.u32 %s2440_s12, 4  ;;  %s27_s30 = int_to_ptr.vmem [resolvable:$true] %s26_s30  ;;  %s53_s13 = int_to_ptr.vmem [resolvable:$true] %s52_s13 }
  0x1b   :  { %s2333_s1 = scalar_lea.vmem %s27_s30, 1024  ;;  %p2338_p11 = scmp.lt.s32.totalorder %s27_s30, %s27_s30 }
  0x1c   :  { %p2334_p10 = scmp.ne.s32.totalorder %s27_s30, %s2333_s1  ;;  %p2339_p12 = scmp.lt.s32.totalorder %s2333_s1, %s2333_s1 }
  0x1e   :  { %p2340_p13 = por %p2339_p12, %p2338_p11 }
  0x20   :  { %p2341_p0 = pnand %p2340_p13, %p2334_p10 }
  0x22   :  { %2344 = shalt.err (!%p2341_p0)
}
  0x23   :  { %32 = dma.hbm_to_vmem [thread:$0]  %s2838_s0, 1024, %s27_s30, [#allocation3], %s2437_s22, %s2437_s22, %s2438_s23  }
  0x24   :  { %s2353_s5 = scalar_lea.vmem %s53_s13, 3072  ;;  %p2358_p2 = scmp.lt.s32.totalorder %s53_s13, %s53_s13 }
  0x25   :  { %p2354_p1 = scmp.ne.s32.totalorder %s53_s13, %s2353_s5  ;;  %p2359_p3 = scmp.lt.s32.totalorder %s2353_s5, %s2353_s5 }
  0x27   :  { %p2360_p4 = por %p2359_p3, %p2358_p2 }
  0x29   :  { %p2361_p5 = pnand %p2360_p4, %p2354_p1 }
  0x2b   :  { %2364 = shalt.err (!%p2361_p5)
}
  0x2c   :  { %58 = dma.hbm_to_vmem [thread:$0]  %s2841_s3, 3072, %s53_s13, [#allocation6], %s2437_s22, %s2437_s22, %s2438_s23  }
  0x2d   :  { %s2441_s18 = smov [#allocation10]   ;;  %s2442_s20 = smov [#allocation11]  }
  0x2e   :  { %s80_s19 = sshll.u32 %s2441_s18, 4  ;;  %s94_s21 = sshll.u32 %s2442_s20, 4  ;;  %s81_s19 = int_to_ptr.vmem [resolvable:$true] %s80_s19  ;;  %s95_s21 = int_to_ptr.vmem [resolvable:$true] %s94_s21 }
  0x2f   :  { %s2373_s0 = scalar_lea.vmem %s81_s19, 2048  ;;  %p2378_p7 = scmp.lt.s32.totalorder %s81_s19, %s81_s19 }
  0x30   :  { %p2374_p6 = scmp.ne.s32.totalorder %s81_s19, %s2373_s0  ;;  %p2379_p8 = scmp.lt.s32.totalorder %s2373_s0, %s2373_s0 }
  0x32   :  { %p2380_p9 = por %p2379_p8, %p2378_p7 }
  0x34   :  { %p2381_p10 = pnand %p2380_p9, %p2374_p6 }
  0x36   :  { %2384 = shalt.err (!%p2381_p10)
}
  0x37   :  { %86 = dma.hbm_to_vmem [thread:$0]  %s2845_s7, 2048, %s81_s19, [#allocation9], %s2437_s22, %s2437_s22, %s2438_s23  }
  0x38   :  { %s2393_s3 = scalar_lea.vmem %s95_s21, 1024  ;;  %p2398_p12 = scmp.lt.s32.totalorder %s95_s21, %s95_s21 }
  0x39   :  { %p2394_p11 = scmp.ne.s32.totalorder %s95_s21, %s2393_s3  ;;  %p2399_p13 = scmp.lt.s32.totalorder %s2393_s3, %s2393_s3 }
  0x3b   :  { %p2400_p0 = por %p2399_p13, %p2398_p12 }
  0x3d   :  { %p2401_p1 = pnand %p2400_p0, %p2394_p11 }
  0x3f   :  { %2404 = shalt.err (!%p2401_p1)
}
  0x40   :  { %100 = dma.hbm_to_vmem [thread:$0]  %s2847_s9, 1024, %s95_s21, [#allocation12], %s2437_s22, %s2437_s22, %s2438_s23  }
  0x41   :  { %2425 = dma.done.wait [#allocation3], 1024  }
  0x42   :  { %2426 = vsyncadd [#allocation3], 4294966272 }
  0x43   :  { %2427 = dma.done.wait [#allocation6], 3456  }
  0x44   :  { %2428 = vsyncadd [#allocation6], 4294963840 }
  0x45   :  { %2429 = dma.done.wait [#allocation9], 3072  }
  0x46   :  { %2430 = vsyncadd [#allocation9], 4294964224 }
  0x47   :  { %2431 = dma.done.wait [#allocation12], 1024  }
  0x48   :  { %2432 = vsyncadd [#allocation12], 4294966272  ;;  %v2210_v0 = vld [vmem:[#allocation5 + $0x10] sm:$0xff]   ;;  %v2211_v1 = vld [vmem:[#allocation5 + $0x8] sm:$0xff]   ;;  %vm209_vm0 = vcmask 392192   ;;  %vm596_vm1 = vcmask 1046528  }
  0x49   :  { %1985 = vmatprep.subr.bf16.mxu0 %v2210_v0  ;;  %v2213_v2 = vld [vmem:[#allocation2] sm:$0xff]   ;;  %v2214_v4 = vld [vmem:[#allocation2 + $0x8] sm:$0xff]   ;;  %v2215_v5 = vld [vmem:[#allocation2 + $0x10] sm:$0xff]   ;;  %vm783_vm2 = vcmask 1045504   ;;  %vm2445_vm3 = vmmov 0   ;;  %vm1431_vm5 = vcmask 1041409  }
  0x4a   :  { %1986 = vmatpush3.bf16.msra.mxu0 %v2210_v0  ;;  %v2212_v3 = vld [vmem:[#allocation5] sm:$0xff]   ;;  %1991 = vmatprep.mubr.msk.bf16.mxu0 %vm209_vm0, %v2213_v2  ;;  %v2221_v6 = vld [vmem:[#allocation7 + $0x38] sm:$0xff]   ;;  %v2222_v7 = vld [vmem:[#allocation7 + $0x30] sm:$0xff]   ;;  %vm1433_vm6 = vcmask 1042434   ;;  %vm1435_vm7 = vcmask 1043459  }
  0x4b   :  { %1987 = vmatprep.subr.bf16.mxu0 %v2211_v1  ;;  %2007 = vmatprep.subr.bf16.mxu1 %v2221_v6  ;;  %v2224_v8 = vld [vmem:[#allocation7 + $0x78] sm:$0xff]   ;;  %v2223_v9 = vld [vmem:[#allocation7 + $0x28] sm:$0xff]   ;;  %v2216_v10 = vld [vmem:[#allocation2 + $0x18] sm:$0xff]  }
  0x4c   :  { %2008 = vmatpush3.bf16.msra.mxu1 %v2221_v6  ;;  %v2226_v11 = vld [vmem:[#allocation7 + $0x70] sm:$0xff]   ;;  %v2217_v12 = vld [vmem:[#allocation2 + $0x20] sm:$0xff]   ;;  %v2225_v13 = vld [vmem:[#allocation7 + $0x20] sm:$0xff]  }
  0x4d   :  { %2009 = vmatprep.subr.bf16.mxu1 %v2222_v7  ;;  %v2227_v14 = vld [vmem:[#allocation7 + $0x18] sm:$0xff]   ;;  %v2218_v15 = vld [vmem:[#allocation2 + $0x28] sm:$0xff]   ;;  %v2220_v17 = vld [vmem:[#allocation2 + $0x38] sm:$0xff]  }
  0x4e   :  { %1988 = vmatpush3.bf16.msra.mxu0 %v2211_v1  ;;  %v2219_v16 = vld [vmem:[#allocation2 + $0x30] sm:$0xff]   ;;  %v2228_v18 = vld [vmem:[#allocation7 + $0x68] sm:$0xff]   ;;  %v2229_v19 = vld [vmem:[#allocation7 + $0x10] sm:$0xff]  }
  0x4f   :  { %1989 = vmatprep.subr.bf16.mxu0 %v2212_v3  ;;  %v2230_v20 = vld [vmem:[#allocation7 + $0x60] sm:$0xff]   ;;  %v2231_v21 = vld [vmem:[#allocation7 + $0x8] sm:$0xff]   ;;  %v2232_v22 = vld [vmem:[#allocation7 + $0x58] sm:$0xff]  }
  0x50   :  { %2010 = vmatpush3.bf16.msra.mxu1 %v2222_v7  ;;  %v2233_v23 = vld [vmem:[#allocation7] sm:$0xff]   ;;  %v2234_v24 = vld [vmem:[#allocation7 + $0x50] sm:$0xff]   ;;  %v2235_v25 = vld [vmem:[#allocation7 + $0xb8] sm:$0xff]  }
  0x51   :  { %2011 = vmatprep.subr.bf16.mxu1 %v2223_v9  ;;  %v2236_v26 = vld [vmem:[#allocation7 + $0x48] sm:$0xff]   ;;  %v2238_v27 = vld [vmem:[#allocation7 + $0x40] sm:$0xff]   ;;  %v2237_v47 = vld [vmem:[#allocation7 + $0xb0] sm:$0xff]  }
  0x52   :  { %1990 = vmatpush3.bf16.msra.mxu0 %v2212_v3  ;;  %v2557_v28 = vld [vmem:[%s2840_s2] ss:$0 sm:$0xff]  ;;  %v2240_v2 = vld [vmem:[#allocation7 + $0xa0] sm:$0xff]  }
  0x53   :  { %2039 = vmatprep.subr.bf16.mxu0 %v2224_v8  ;;  %v2239_v58 = vld [vmem:[#allocation7 + $0xa8] sm:$0xff]  }
  0x54   :  { %2012 = vmatpush3.bf16.msra.mxu1 %v2223_v9 }
  0x55   :  { %1992 = vmatmul.mubr.msk.bf16.vlgmr.msra.gmra.mxu0 %vm209_vm0, %v2214_v4  ;;  %2013 = vmatprep.subr.bf16.mxu1 %v2225_v13 }
  0x56   :  { %1995 = vmatprep.mubr.msk.bf16.mxu0 %vm209_vm0, %v2215_v5  ;;  %2040 = vmatpush3.bf16.msra.mxu0 %v2224_v8 }
  0x57   :  { %2041 = vmatprep.subr.bf16.mxu0 %v2226_v11 }
  0x58   :  { %2014 = vmatpush3.bf16.msra.mxu1 %v2225_v13 }
  0x59   :  { %2015 = vmatprep.subr.bf16.mxu1 %v2227_v14 }
  0x5a   :  { %2042 = vmatpush3.bf16.msra.mxu0 %v2226_v11 }
  0x5b   :  { %2043 = vmatprep.subr.bf16.mxu0 %v2228_v18 }
  0x5c   :  { %2016 = vmatpush3.bf16.msra.mxu1 %v2227_v14  ;;  %v2241_v14 = vld [vmem:[#allocation7 + $0x98] sm:$0xff]  }
  0x5d   :  { %1996 = vmatmul.mubr.msk.bf16.gmra.mxu0 %vm209_vm0, %v2216_v10  ;;  %2017 = vmatprep.subr.bf16.mxu1 %v2229_v19 }
  0x5e   :  { %1999 = vmatprep.mubr.msk.bf16.mxu0 %vm209_vm0, %v2217_v12  ;;  %2044 = vmatpush3.bf16.msra.mxu0 %v2228_v18 }
  0x5f   :  { %2045 = vmatprep.subr.bf16.mxu0 %v2230_v20 }
  0x60   :  { %2018 = vmatpush3.bf16.msra.mxu1 %v2229_v19 }
  0x61   :  { %2019 = vmatprep.subr.bf16.mxu1 %v2231_v21 }
  0x62   :  { %2046 = vmatpush3.bf16.msra.mxu0 %v2230_v20 }
  0x63   :  { %2047 = vmatprep.subr.bf16.mxu0 %v2232_v22 }
  0x64   :  { %2020 = vmatpush3.bf16.msra.mxu1 %v2231_v21 }
  0x65   :  { %2000 = vmatmul.mubr.msk.bf16.gmra.mxu0 %vm209_vm0, %v2218_v15  ;;  %2021 = vmatprep.subr.bf16.mxu1 %v2233_v23 }
  0x66   :  { %2003 = vmatprep.mubr.msk.bf16.mxu0 %vm209_vm0, %v2219_v16  ;;  %2048 = vmatpush3.bf16.msra.mxu0 %v2232_v22  ;;  %v2242_v22 = vld [vmem:[#allocation7 + $0x90] sm:$0xff]  }
  0x67   :  { %2049 = vmatprep.subr.bf16.mxu0 %v2234_v24 }
  0x68   :  { %2022 = vmatpush3.bf16.msra.mxu1 %v2233_v23 }
  0x69   :  { %2071 = vmatprep.subr.bf16.mxu1 %v2235_v25 }
  0x6a   :  { %2050 = vmatpush3.bf16.msra.mxu0 %v2234_v24 }
  0x6b   :  { %2051 = vmatprep.subr.bf16.mxu0 %v2236_v26 }
  0x6d   :  { %2004 = vmatmul.mubr.msk.bf16.gmra.mxu0 %vm209_vm0, %v2220_v17 }
  0x6e   :  { %2052 = vmatpush3.bf16.msra.mxu0 %v2236_v26 }
  0x6f   :  { %2053 = vmatprep.subr.bf16.mxu0 %v2238_v27 }
  0x72   :  { %2054 = vmatpush3.bf16.msra.mxu0 %v2238_v27 }
 0x115   :  { %v1993_v29 = vpop.f32.mrf.mxu0 }
 0x116   :  { %v333_v31 = vadd.f32 %v1993_v29, %v2557_v28 }
 0x117   :  { %v268_v30 = vpop.f32.mrf.mxu0 }
 0x118   :  { %v331_v33 = vadd.f32 %v2557_v28, %v268_v30  ;;  %v349_v36 = vmax.f32 %v333_v31, 0.0 }
 0x119   :  { %v1994_v32 = vpop.f32.mrf.mxu0 }
 0x11a   :  { %v334_v34 = vadd.f32 %v1994_v32, %v2557_v28  ;;  %v347_v40 = vmax.f32 %v331_v33, 0.0 }
 0x11b   :  { %v271_v35 = vpop.f32.mrf.mxu0 }
 0x11c   :  { %v350_v37 = vmax.f32 %v334_v34, 0.0  ;;  %v332_v38 = vadd.f32 %v2557_v28, %v271_v35  ;;  %v2243_v34 = vld [vmem:[#allocation7 + $0x88] sm:$0xff]  }
 0x11d   :  { %v1997_v39 = vpop.f32.mrf.mxu0 }
 0x11e   :  { %v2563_v41 = vpack.c.bf16 %v350_v37, %v349_v36  ;;  %v348_v42 = vmax.f32 %v332_v38, 0.0  ;;  %v337_v45 = vadd.f32 %v1997_v39, %v2557_v28 }
 0x11f   :  { %v284_v43 = vpop.f32.mrf.mxu0 }
 0x120   :  { %v2565_v44 = vpack.c.bf16 %v348_v42, %v347_v40  ;;  %v335_v48 = vadd.f32 %v2557_v28, %v284_v43  ;;  %v598_v51 = vrot.slane %v2563_v41, 1  ;;  %v353_v53 = vmax.f32 %v337_v45, 0.0  ;;  %v2244_v40 = vld [vmem:[#allocation7 + $0x80] sm:$0xff]  }
 0x121   :  { %v1998_v46 = vpop.f32.mrf.mxu0 }
 0x122   :  { %v338_v49 = vadd.f32 %v1998_v46, %v2557_v28  ;;  %2023 = vmatprep.mubr.bf16.mxu1 %v2565_v44  ;;  %v597_v50 = vrot.slane %v2565_v44, 1  ;;  %v351_v59 = vmax.f32 %v335_v48, 0.0  ;;  %v784_v38 = vrot.slane %v2565_v44, 2 }
 0x123   :  { %v287_v52 = vpop.f32.mrf.mxu0  ;;  %2024 = vmatmul.mubr.bf16.vlgmr.msra.gmra.mxu1 %v2563_v41 }
 0x124   :  { %v354_v54 = vmax.f32 %v338_v49, 0.0  ;;  %v336_v55 = vadd.f32 %v2557_v28, %v287_v52  ;;  %2072 = vmatpush3.bf16.msra.mxu1 %v2235_v25  ;;  %v599_v56 = vsel %vm596_vm1, %v597_v50, %v598_v51 }
 0x125   :  { %v2001_v57 = vpop.f32.mrf.mxu0  ;;  %2055 = vmatprep.mubr.bf16.mxu0 %v599_v56  ;;  %2073 = vmatprep.subr.bf16.mxu1 %v2237_v47 }
 0x126   :  { %v2576_v60 = vpack.c.bf16 %v354_v54, %v353_v53  ;;  %v352_v61 = vmax.f32 %v336_v55, 0.0  ;;  %v341_v62 = vadd.f32 %v2001_v57, %v2557_v28 }
 0x127   :  { %v300_v63 = vpop.f32.mrf.mxu0 }
 0x128   :  { %v2579_v0 = vpack.c.bf16 %v352_v61, %v351_v59  ;;  %2074 = vmatpush3.bf16.msra.mxu1 %v2237_v47  ;;  %v339_v4 = vadd.f32 %v2557_v28, %v300_v63  ;;  %v602_v6 = vrot.slane %v2576_v60, 1  ;;  %v357_v7 = vmax.f32 %v341_v62, 0.0  ;;  %v2245_v63 = vld [vmem:[#allocation8 + $0x38] sm:$0xff]  }
 0x129   :  { %v2002_v1 = vpop.f32.mrf.mxu0  ;;  %2075 = vmatprep.subr.bf16.mxu1 %v2239_v58  ;;  %v789_v49 = vrot.slane %v2576_v60, 2  ;;  %2103 = vmatprep.subr.bf16.mxu0 %v2245_v63 }
 0x12a   :  { %v600_v3 = vrot.slane %v2579_v0, 1  ;;  %v342_v5 = vadd.f32 %v2002_v1, %v2557_v28  ;;  %2027 = vmatprep.mubr.bf16.mxu1 %v2579_v0  ;;  %v355_v15 = vmax.f32 %v339_v4, 0.0  ;;  %v787_v44 = vrot.slane %v2579_v0, 2  ;;  %v2246_v0 = vld [vmem:[#allocation8 + $0x30] sm:$0xff]   ;;  %v2247_v1 = vld [vmem:[#allocation8 + $0x28] sm:$0xff]  }
 0x12b   :  { %v303_v8 = vpop.f32.mrf.mxu0  ;;  %2028 = vmatmul.mubr.bf16.gmra.mxu1 %v2576_v60  ;;  %v2250_v4 = vld [vmem:[#allocation8 + $0x10] sm:$0xff]  }
 0x12c   :  { %v358_v9 = vmax.f32 %v342_v5, 0.0  ;;  %v340_v10 = vadd.f32 %v2557_v28, %v303_v8  ;;  %2076 = vmatpush3.bf16.msra.mxu1 %v2239_v58  ;;  %v601_v11 = vsel %vm596_vm1, %v598_v51, %v600_v3  ;;  %v603_v12 = vsel %vm596_vm1, %v600_v3, %v602_v6  ;;  %v2249_v3 = vld [vmem:[#allocation8 + $0x18] sm:$0xff]   ;;  %v2251_v5 = vld [vmem:[#allocation8 + $0x8] sm:$0xff]  }
 0x12d   :  { %v2005_v13 = vpop.f32.mrf.mxu0  ;;  %2056 = vmatmul.mubr.bf16.vlgmr.msra.gmra.mxu0 %v601_v11  ;;  %2077 = vmatprep.subr.bf16.mxu1 %v2240_v2  ;;  %v790_v51 = vsel %vm783_vm2, %v787_v44, %v789_v49 }
 0x12e   :  { %v2590_v16 = vpack.c.bf16 %v358_v9, %v357_v7  ;;  %v356_v17 = vmax.f32 %v340_v10, 0.0  ;;  %2059 = vmatprep.mubr.bf16.mxu0 %v603_v12  ;;  %v345_v18 = vadd.f32 %v2005_v13, %v2557_v28  ;;  %2104 = vmatpush3.bf16.msra.mxu0 %v2245_v63 }
 0x12f   :  { %v316_v19 = vpop.f32.mrf.mxu0  ;;  %2105 = vmatprep.subr.bf16.mxu0 %v2246_v0 }
 0x130   :  { %v415_v20 = vpack.c.bf16 %v356_v17, %v355_v15  ;;  %2078 = vmatpush3.bf16.msra.mxu1 %v2240_v2  ;;  %v343_v23 = vadd.f32 %v2557_v28, %v316_v19  ;;  %v606_v26 = vrot.slane %v2590_v16, 1  ;;  %v361_v27 = vmax.f32 %v345_v18, 0.0  ;;  %v2248_v2 = vld [vmem:[#allocation8 + $0x20] sm:$0xff]  }
 0x131   :  { %v2006_v21 = vpop.f32.mrf.mxu0  ;;  %2079 = vmatprep.subr.bf16.mxu1 %v2241_v14  ;;  %v793_v54 = vrot.slane %v2590_v16, 2 }
 0x132   :  { %v346_v24 = vadd.f32 %v2006_v21, %v2557_v28  ;;  %2031 = vmatprep.mubr.bf16.mxu1 %v415_v20  ;;  %v604_v25 = vrot.slane %v415_v20, 1  ;;  %v359_v35 = vmax.f32 %v343_v23, 0.0  ;;  %v791_v53 = vrot.slane %v415_v20, 2  ;;  %2106 = vmatpush3.bf16.msra.mxu0 %v2246_v0 }
 0x133   :  { %v319_v29 = vpop.f32.mrf.mxu0  ;;  %2032 = vmatmul.mubr.bf16.gmra.mxu1 %v2590_v16  ;;  %2107 = vmatprep.subr.bf16.mxu0 %v2247_v1 }
 0x134   :  { %v362_v30 = vmax.f32 %v346_v24, 0.0  ;;  %v344_v31 = vadd.f32 %v2557_v28, %v319_v29  ;;  %2080 = vmatpush3.bf16.msra.mxu1 %v2241_v14  ;;  %v605_v32 = vsel %vm596_vm1, %v602_v6, %v604_v25  ;;  %v607_v33 = vsel %vm596_vm1, %v604_v25, %v606_v26  ;;  %v2252_v6 = vld [vmem:[#allocation8] sm:$0xff]  }
 0x135   :  { %2060 = vmatmul.mubr.bf16.gmra.mxu0 %v605_v32  ;;  %2081 = vmatprep.subr.bf16.mxu1 %v2242_v22  ;;  %v785_v28 = vrot.slane %v2563_v41, 2  ;;  %v2443_v41 = vmov 0   ;;  %v792_v55 = vsel %vm783_vm2, %v789_v49, %v791_v53  ;;  %v794_v56 = vsel %vm783_vm2, %v791_v53, %v793_v54 }
 0x136   :  { %v418_v36 = vpack.c.bf16 %v362_v30, %v361_v27  ;;  %v360_v37 = vmax.f32 %v344_v31, 0.0  ;;  %2063 = vmatprep.mubr.bf16.mxu0 %v607_v33  ;;  %v612_v48 = vrot.slane %v2443_v41, 1  ;;  %v799_v61 = vrot.slane %v2443_v41, 2  ;;  %2108 = vmatpush3.bf16.msra.mxu0 %v2247_v1  ;;  %v2631_v33 = vld [vmem:[%s2842_s4] ss:$0 sm:$0xff] }
 0x137   :  { %v786_v45 = vsel %vm783_vm2, %v784_v38, %v785_v28  ;;  %v788_v50 = vsel %vm783_vm2, %v785_v28, %v787_v44  ;;  %2109 = vmatprep.subr.bf16.mxu0 %v2248_v2 }
 0x138   :  { %v417_v39 = vpack.c.bf16 %v360_v37, %v359_v35  ;;  %2082 = vmatpush3.bf16.msra.mxu1 %v2242_v22  ;;  %v610_v43 = vrot.slane %v418_v36, 1  ;;  %v797_v58 = vrot.slane %v418_v36, 2 }
 0x139   :  { %2083 = vmatprep.subr.bf16.mxu1 %v2243_v34 }
 0x13a   :  { %2035 = vmatprep.mubr.bf16.mxu1 %v417_v39  ;;  %v608_v42 = vrot.slane %v417_v39, 1  ;;  %v613_v52 = vsel %vm596_vm1, %v610_v43, %v612_v48  ;;  %v795_v57 = vrot.slane %v417_v39, 2  ;;  %v800_v62 = vsel %vm783_vm2, %v797_v58, %v799_v61  ;;  %2110 = vmatpush3.bf16.msra.mxu0 %v2248_v2 }
 0x13b   :  { %2036 = vmatmul.mubr.bf16.gmra.mxu1 %v418_v36  ;;  %2111 = vmatprep.subr.bf16.mxu0 %v2249_v3 }
 0x13c   :  { %2084 = vmatpush3.bf16.msra.mxu1 %v2243_v34  ;;  %2087 = vmatprep.mubr.bf16.mxu1 %v786_v45  ;;  %v609_v46 = vsel %vm596_vm1, %v606_v26, %v608_v42  ;;  %v611_v47 = vsel %vm596_vm1, %v608_v42, %v610_v43  ;;  %v796_v59 = vsel %vm783_vm2, %v793_v54, %v795_v57 }
 0x13d   :  { %2064 = vmatmul.mubr.bf16.gmra.mxu0 %v609_v46  ;;  %2085 = vmatprep.subr.bf16.mxu1 %v2244_v40  ;;  %v798_v60 = vsel %vm783_vm2, %v795_v57, %v797_v58 }
 0x13e   :  { %2067 = vmatprep.mubr.bf16.mxu0 %v611_v47  ;;  %2112 = vmatpush3.bf16.msra.mxu0 %v2249_v3 }
 0x13f   :  { %2113 = vmatprep.subr.bf16.mxu0 %v2250_v4 }
 0x140   :  { %2086 = vmatpush3.bf16.msra.mxu1 %v2244_v40 }
 0x142   :  { %2114 = vmatpush3.bf16.msra.mxu0 %v2250_v4 }
 0x143   :  { %2088 = vmatmul.mubr.bf16.vlgmr.msra.gmra.mxu1 %v788_v50  ;;  %2115 = vmatprep.subr.bf16.mxu0 %v2251_v5 }
 0x144   :  { %2091 = vmatprep.mubr.bf16.mxu1 %v790_v51 }
 0x145   :  { %2068 = vmatmul.mubr.bf16.gmra.mxu0 %v613_v52 }
 0x146   :  { %2116 = vmatpush3.bf16.msra.mxu0 %v2251_v5 }
 0x147   :  { %2117 = vmatprep.subr.bf16.mxu0 %v2252_v6 }
 0x14a   :  { %2118 = vmatpush3.bf16.msra.mxu0 %v2252_v6 }
 0x14b   :  { %2092 = vmatmul.mubr.bf16.gmra.mxu1 %v792_v55 }
 0x14c   :  { %2095 = vmatprep.mubr.bf16.mxu1 %v794_v56 }
 0x153   :  { %2096 = vmatmul.mubr.bf16.gmra.mxu1 %v796_v59 }
 0x154   :  { %2099 = vmatprep.mubr.bf16.mxu1 %v798_v60 }
 0x15b   :  { %2100 = vmatmul.mubr.bf16.gmra.mxu1 %v800_v62 }
 0x1e3   :  { %v2025_v7 = vpop.f32.mrf.mxu1 }
 0x1e4   :  { %v573_v37 = vadd.f32 %v2025_v7, %v2631_v33 }
 0x1e5   :  { %v508_v8 = vpop.f32.mrf.mxu1 }
 0x1e6   :  { %v571_v35 = vadd.f32 %v2631_v33, %v508_v8 }
 0x1e7   :  { %v2026_v9 = vpop.f32.mrf.mxu1 }
 0x1e8   :  { %v574_v36 = vadd.f32 %v2026_v9, %v2631_v33 }
 0x1e9   :  { %v511_v10 = vpop.f32.mrf.mxu1 }
 0x1ea   :  { %v572_v28 = vadd.f32 %v2631_v33, %v511_v10 }
 0x1eb   :  { %v2029_v11 = vpop.f32.mrf.mxu1 }
 0x1ec   :  { %v577_v57 = vadd.f32 %v2029_v11, %v2631_v33 }
 0x1ed   :  { %v524_v12 = vpop.f32.mrf.mxu1  ;;  %v2057_v13 = vpop.f32.mrf.mxu0 }
 0x1ee   :  { %v769_v43 = vadd.f32 %v2057_v13, %v573_v37  ;;  %v575_v53 = vadd.f32 %v2631_v33, %v524_v12 }
 0x1ef   :  { %v2030_v14 = vpop.f32.mrf.mxu1  ;;  %v704_v15 = vpop.f32.mrf.mxu0 }
 0x1f0   :  { %v767_v40 = vadd.f32 %v704_v15, %v571_v35  ;;  %v578_v54 = vadd.f32 %v2030_v14, %v2631_v33 }
 0x1f1   :  { %v527_v16 = vpop.f32.mrf.mxu1  ;;  %v2058_v17 = vpop.f32.mrf.mxu0 }
 0x1f2   :  { %v770_v42 = vadd.f32 %v2058_v17, %v574_v36  ;;  %v576_v61 = vadd.f32 %v2631_v33, %v527_v16 }
 0x1f3   :  { %v2616_v18 = vpop.f32.mrf.mxu1  ;;  %v707_v19 = vpop.f32.mrf.mxu0 }
 0x1f4   :  { %v768_v46 = vadd.f32 %v707_v19, %v572_v28  ;;  %v581_v17 = vadd.f32 %v2616_v18, %v2631_v33 }
 0x1f5   :  { %v540_v20 = vpop.f32.mrf.mxu1  ;;  %v2061_v21 = vpop.f32.mrf.mxu0 }
 0x1f6   :  { %v773_v1 = vadd.f32 %v2061_v21, %v577_v57  ;;  %v579_v13 = vadd.f32 %v2631_v33, %v540_v20 }
 0x1f7   :  { %v2034_v22 = vpop.f32.mrf.mxu1  ;;  %v720_v23 = vpop.f32.mrf.mxu0 }
 0x1f8   :  { %v771_v62 = vadd.f32 %v720_v23, %v575_v53  ;;  %v582_v14 = vadd.f32 %v2034_v22, %v2631_v33 }
 0x1f9   :  { %v2618_v24 = vpop.f32.mrf.mxu1  ;;  %v2062_v25 = vpop.f32.mrf.mxu0 }
 0x1fa   :  { %v774_v63 = vadd.f32 %v2062_v25, %v578_v54  ;;  %v580_v25 = vadd.f32 %v2631_v33, %v2618_v24 }
 0x1fb   :  { %v2620_v26 = vpop.f32.mrf.mxu1  ;;  %v723_v27 = vpop.f32.mrf.mxu0 }
 0x1fc   :  { %v772_v4 = vadd.f32 %v723_v27, %v576_v61 }
 0x1fd   :  { %v2622_v29 = vpop.f32.mrf.mxu1  ;;  %v2065_v31 = vpop.f32.mrf.mxu0 }
 0x1fe   :  { %v777_v36 = vadd.f32 %v2065_v31, %v581_v17  ;;  %v583_v24 = vadd.f32 %v2631_v33, %v2622_v29  ;;  %v1194_v17 = vlaneseq }
 0x1ff   :  { %v2624_v30 = vpop.f32.mrf.mxu1  ;;  %v736_v38 = vpop.f32.mrf.mxu0 }
 0x200   :  { %v775_v27 = vadd.f32 %v736_v38, %v579_v13  ;;  %v586_v38 = vadd.f32 %v2624_v30, %v2631_v33  ;;  %v2265_v13 = vld [vmem:[#allocation10 + $0x58] sm:$0xff]  }
 0x201   :  { %v2626_v32 = vpop.f32.mrf.mxu1  ;;  %v2066_v41 = vpop.f32.mrf.mxu0 }
 0x203   :  { %v2089_v34 = vpop.f32.mrf.mxu1  ;;  %v739_v58 = vpop.f32.mrf.mxu0 }
 0x204   :  { %v956_v48 = vadd.f32 %v2089_v34, %v769_v43  ;;  %v778_v34 = vadd.f32 %v2066_v41, %v582_v14  ;;  %v776_v20 = vadd.f32 %v739_v58, %v580_v25  ;;  %v2266_v14 = vld [vmem:[#allocation10 + $0x50] sm:$0xff]   ;;  %v2681_v25 = vld [vmem:[%s2844_s6] ss:$0 sm:$0xff] }
 0x205   :  { %v891_v39 = vpop.f32.mrf.mxu1  ;;  %v2069_v7 = vpop.f32.mrf.mxu0 }
 0x206   :  { %v954_v47 = vadd.f32 %v891_v39, %v767_v40  ;;  %v972_v59 = vmax.f32 %v956_v48, 0.0 }
 0x207   :  { %v2090_v45 = vpop.f32.mrf.mxu1  ;;  %v752_v19 = vpop.f32.mrf.mxu0 }
 0x208   :  { %v957_v44 = vadd.f32 %v2090_v45, %v770_v42  ;;  %v970_v55 = vmax.f32 %v954_v47, 0.0 }
 0x209   :  { %v894_v49 = vpop.f32.mrf.mxu1  ;;  %v2070_v40 = vpop.f32.mrf.mxu0 }
 0x20a   :  { %v955_v50 = vadd.f32 %v894_v49, %v768_v46  ;;  %v973_v51 = vmax.f32 %v957_v44, 0.0  ;;  %v585_v44 = vadd.f32 %v2620_v26, %v2631_v33 }
 0x20b   :  { %v2093_v52 = vpop.f32.mrf.mxu1  ;;  %v755_v41 = vpop.f32.mrf.mxu0 }
 0x20c   :  { %v971_v56 = vmax.f32 %v955_v50, 0.0  ;;  %v1003_v2 = vpack.c.bf16 %v973_v51, %v972_v59  ;;  %v960_v8 = vadd.f32 %v2093_v52, %v773_v1  ;;  %v584_v50 = vadd.f32 %v2631_v33, %v2626_v32  ;;  %v2253_v33 = vld [vmem:[#allocation10 + $0x38] sm:$0xff]  }
 0x20d   :  { %v907_v60 = vpop.f32.mrf.mxu1  ;;  %v779_v51 = vadd.f32 %v752_v19, %v583_v24  ;;  %v782_v52 = vadd.f32 %v2070_v40, %v586_v38  ;;  %v781_v54 = vadd.f32 %v2069_v7, %v585_v44  ;;  %v2444_v1 = vmov 0.0   ;;  %v2259_v7 = vld [vmem:[#allocation10 + $0x8] sm:$0xff]  }
 0x20e   :  { %v1002_v0 = vpack.c.bf16 %v971_v56, %v970_v55  ;;  %v958_v5 = vadd.f32 %v907_v60, %v771_v62  ;;  %v976_v21 = vmax.f32 %v960_v8, 0.0  ;;  %v780_v56 = vadd.f32 %v755_v41, %v584_v50  ;;  %2155 = vmatprep.subr.bf16.mxu0 %v2444_v1  ;;  %2135 = vmatprep.subr.bf16.mxu1 %v2444_v1  ;;  %v2260_v8 = vld [vmem:[#allocation10] sm:$0xff]  }
 0x20f   :  { %v2094_v3 = vpop.f32.mrf.mxu1  ;;  %2151 = vmatprep.mubr.msk.bf16.mxu1 %vm2445_vm3, %v2444_v1 }
 0x210   :  { %v961_v6 = vadd.f32 %v2094_v3, %v774_v63  ;;  %2119 = vmatprep.mubr.bf16.mxu0 %v1002_v0  ;;  %v974_v15 = vmax.f32 %v958_v5, 0.0  ;;  %v2255_v3 = vld [vmem:[#allocation10 + $0x28] sm:$0xff]   ;;  %v2257_v5 = vld [vmem:[#allocation10 + $0x18] sm:$0xff]  }
 0x211   :  { %v910_v9 = vpop.f32.mrf.mxu1  ;;  %2120 = vmatmul.mubr.bf16.vlgmr.msra.gmra.mxu0 %v1003_v2  ;;  %v2254_v2 = vld [vmem:[#allocation10 + $0x30] sm:$0xff]  }
 0x212   :  { %v959_v10 = vadd.f32 %v910_v9, %v772_v4  ;;  %v977_v11 = vmax.f32 %v961_v6, 0.0  ;;  %2156 = vmatpush3.bf16.msra.mxu0 %v2253_v33  ;;  %v2256_v4 = vld [vmem:[#allocation10 + $0x20] sm:$0xff]   ;;  %v2258_v6 = vld [vmem:[#allocation10 + $0x10] sm:$0xff]   ;;  %v2261_v9 = vld [vmem:[#allocation10 + $0x78] sm:$0xff]  }
 0x213   :  { %v2097_v12 = vpop.f32.mrf.mxu1  ;;  %2157 = vmatprep.subr.bf16.mxu0 %v2444_v1  ;;  %2136 = vmatpush3.bf16.msra.mxu1 %v2261_v9 }
 0x214   :  { %v975_v16 = vmax.f32 %v959_v10, 0.0  ;;  %v1005_v37 = vpack.c.bf16 %v977_v11, %v976_v21  ;;  %v964_v42 = vadd.f32 %v2097_v12, %v777_v36  ;;  %2137 = vmatprep.subr.bf16.mxu1 %v2444_v1  ;;  %v2262_v10 = vld [vmem:[#allocation10 + $0x70] sm:$0xff]   ;;  %v2263_v11 = vld [vmem:[#allocation10 + $0x68] sm:$0xff]   ;;  %v2264_v12 = vld [vmem:[#allocation10 + $0x60] sm:$0xff]  }
 0x215   :  { %v923_v23 = vpop.f32.mrf.mxu1 }
 0x216   :  { %v1004_v35 = vpack.c.bf16 %v975_v16, %v974_v15  ;;  %v962_v28 = vadd.f32 %v923_v23, %v775_v27  ;;  %v980_v48 = vmax.f32 %v964_v42, 0.0  ;;  %2158 = vmatpush3.bf16.msra.mxu0 %v2254_v2  ;;  %v2267_v15 = vld [vmem:[#allocation10 + $0x48] sm:$0xff]   ;;  %v2268_v16 = vld [vmem:[#allocation10 + $0x40] sm:$0xff]   ;;  %v2676_v23 = vshrl.u32 %v1194_v17, 7 }
 0x217   :  { %v2098_v39 = vpop.f32.mrf.mxu1  ;;  %2159 = vmatprep.subr.bf16.mxu0 %v2444_v1  ;;  %2138 = vmatpush3.bf16.msra.mxu1 %v2262_v10 }
 0x218   :  { %v965_v22 = vadd.f32 %v2098_v39, %v778_v34  ;;  %2123 = vmatprep.mubr.bf16.mxu0 %v1004_v35  ;;  %v978_v31 = vmax.f32 %v962_v28, 0.0  ;;  %2139 = vmatprep.subr.bf16.mxu1 %v2444_v1  ;;  %v2691_v39 = vadd.s32 24, %v2676_v23 }
 0x219   :  { %v926_v43 = vpop.f32.mrf.mxu1  ;;  %2124 = vmatmul.mubr.bf16.gmra.mxu0 %v1005_v37 }
 0x21a   :  { %v963_v18 = vadd.f32 %v926_v43, %v776_v20  ;;  %v981_v45 = vmax.f32 %v965_v22, 0.0  ;;  %2160 = vmatpush3.bf16.msra.mxu0 %v2255_v3  ;;  %vm1202_vm4 = vcmp.lt.s32.totalorder %v2691_v39, 26 }
 0x21b   :  { %v2101_v46 = vpop.f32.mrf.mxu1  ;;  %2161 = vmatprep.subr.bf16.mxu0 %v2444_v1  ;;  %2140 = vmatpush3.bf16.msra.mxu1 %v2263_v11 }
 0x21c   :  { %v979_v47 = vmax.f32 %v963_v18, 0.0  ;;  %v1007_v55 = vpack.c.bf16 %v981_v45, %v980_v48  ;;  %v968_v58 = vadd.f32 %v2101_v46, %v781_v54  ;;  %2141 = vmatprep.subr.bf16.mxu1 %v2444_v1 }
 0x21d   :  { %v939_v49 = vpop.f32.mrf.mxu1 }
 0x21e   :  { %v1006_v53 = vpack.c.bf16 %v979_v47, %v978_v31  ;;  %v966_v57 = vadd.f32 %v939_v49, %v779_v51  ;;  %v984_v63 = vmax.f32 %v968_v58, 0.0  ;;  %2162 = vmatpush3.bf16.msra.mxu0 %v2256_v4 }
 0x21f   :  { %v2102_v29 = vpop.f32.mrf.mxu1  ;;  %2163 = vmatprep.subr.bf16.mxu0 %v2444_v1  ;;  %2142 = vmatpush3.bf16.msra.mxu1 %v2264_v12 }
 0x220   :  { %v969_v30 = vadd.f32 %v2102_v29, %v782_v52  ;;  %2127 = vmatprep.mubr.bf16.mxu0 %v1006_v53  ;;  %v982_v61 = vmax.f32 %v966_v57, 0.0  ;;  %2143 = vmatprep.subr.bf16.mxu1 %v2444_v1 }
 0x221   :  { %v942_v59 = vpop.f32.mrf.mxu1  ;;  %2128 = vmatmul.mubr.bf16.gmra.mxu0 %v1007_v55 }
 0x222   :  { %v967_v26 = vadd.f32 %v942_v59, %v780_v56  ;;  %v985_v60 = vmax.f32 %v969_v30, 0.0  ;;  %2164 = vmatpush3.bf16.msra.mxu0 %v2257_v5 }
 0x223   :  { %2165 = vmatprep.subr.bf16.mxu0 %v2444_v1  ;;  %2144 = vmatpush3.bf16.msra.mxu1 %v2265_v13 }
 0x224   :  { %v983_v62 = vmax.f32 %v967_v26, 0.0  ;;  %v1009_v32 = vpack.c.bf16 %v985_v60, %v984_v63  ;;  %2145 = vmatprep.subr.bf16.mxu1 %v2444_v1 }
 0x226   :  { %v1008_v0 = vpack.c.bf16 %v983_v62, %v982_v61  ;;  %2166 = vmatpush3.bf16.msra.mxu0 %v2258_v6 }
 0x227   :  { %2167 = vmatprep.subr.bf16.mxu0 %v2444_v1  ;;  %2146 = vmatpush3.bf16.msra.mxu1 %v2266_v14 }
 0x228   :  { %2131 = vmatprep.mubr.bf16.mxu0 %v1008_v0  ;;  %2147 = vmatprep.subr.bf16.mxu1 %v2444_v1 }
 0x229   :  { %2132 = vmatmul.mubr.bf16.gmra.mxu0 %v1009_v32 }
 0x22a   :  { %2168 = vmatpush3.bf16.msra.mxu0 %v2259_v7  ;;  %2171 = vmatprep.mubr.msk.bf16.mxu0 %vm2445_vm3, %v2444_v1 }
 0x22b   :  { %2169 = vmatprep.subr.bf16.mxu0 %v2444_v1  ;;  %2148 = vmatpush3.bf16.msra.mxu1 %v2267_v15 }
 0x22c   :  { %2149 = vmatprep.subr.bf16.mxu1 %v2444_v1 }
 0x22e   :  { %2170 = vmatpush3.bf16.msra.mxu0 %v2260_v8 }
 0x22f   :  { %2150 = vmatpush3.bf16.msra.mxu1 %v2268_v16 }
 0x230   :  { %2175 = vmatprep.subr.bf16.mxu1 %v2444_v1 }
 0x2d1   :  { %v2121_v19 = vpop.f32.mrf.mxu0 }
 0x2d2   :  { %v1164_v37 = vadd.f32 %v2121_v19, %v2681_v25 }
 0x2d3   :  { %v1099_v21 = vpop.f32.mrf.mxu0 }
 0x2d4   :  { %v2684_v34 = vadd.f32 %v2681_v25, %v1099_v21  ;;  %v1180_v18 = vmax.f32 %v1164_v37, 0.0 }
 0x2d5   :  { %v2122_v27 = vpop.f32.mrf.mxu0 }
 0x2d6   :  { %v2687_v35 = vadd.f32 %v2122_v27, %v2681_v25  ;;  %v1178_v22 = vmax.f32 %v2684_v34, 0.0 }
 0x2d7   :  { %v1102_v36 = vpop.f32.mrf.mxu0 }
 0x2d8   :  { %v1163_v20 = vadd.f32 %v2681_v25, %v1102_v36  ;;  %v1181_v42 = vmax.f32 %v2687_v35, 0.0 }
 0x2d9   :  { %v2125_v28 = vpop.f32.mrf.mxu0 }
 0x2da   :  { %v1179_v40 = vmax.f32 %v1163_v20, 0.0  ;;  %v1214_v31 = vsel %vm1202_vm4, %v1181_v42, 0.0  ;;  %v2706_v48 = vadd.f32 %v2125_v28, %v2681_v25 }
 0x2db   :  { %v1115_v43 = vpop.f32.mrf.mxu0 }
 0x2dc   :  { %v1227_v45 = vadd.f32 %v1179_v40, %v1178_v22  ;;  %v2698_v38 = vadd.f32 %v2681_v25, %v1115_v43  ;;  %v1184_v56 = vmax.f32 %v2706_v48, 0.0 }
 0x2dd   :  { %v2126_v46 = vpop.f32.mrf.mxu0 }
 0x2de   :  { %v1228_v24 = vadd.f32 %v1227_v45, %v1180_v18  ;;  %v2703_v47 = vadd.f32 %v2126_v46, %v2681_v25  ;;  %v1182_v52 = vmax.f32 %v2698_v38, 0.0 }
 0x2df   :  { %v1118_v44 = vpop.f32.mrf.mxu0 }
 0x2e0   :  { %v1229_v41 = vadd.f32 %v1228_v24, %v1214_v31  ;;  %v2709_v49 = vadd.f32 %v2681_v25, %v1118_v44  ;;  %v1185_v54 = vmax.f32 %v2703_v47, 0.0 }
 0x2e1   :  { %v2129_v50 = vpop.f32.mrf.mxu0 }
 0x2e2   :  { %v1230_v51 = vrot.slane %v1229_v41, 4  ;;  %v1183_v53 = vmax.f32 %v2709_v49, 0.0  ;;  %v1218_v60 = vsel %vm1202_vm4, %v1185_v54, 0.0  ;;  %v2732_v32 = vadd.f32 %v2129_v50, %v2681_v25 }
 0x2e3   :  { %v1131_v55 = vpop.f32.mrf.mxu0 }
 0x2e4   :  { %v1231_v29 = vadd.f32 %v1230_v51, %v1229_v41  ;;  %v1236_v57 = vadd.f32 %v1183_v53, %v1182_v52  ;;  %v2722_v26 = vadd.f32 %v2681_v25, %v1131_v55  ;;  %v1188_v11 = vmax.f32 %v2732_v32, 0.0 }
 0x2e5   :  { %v2130_v30 = vpop.f32.mrf.mxu0 }
 0x2e6   :  { %v1232_v58 = vrot.slane %v1231_v29, 2  ;;  %v1237_v59 = vadd.f32 %v1236_v57, %v1184_v56  ;;  %v2729_v61 = vadd.f32 %v2130_v30, %v2681_v25  ;;  %v1186_v5 = vmax.f32 %v2722_v26, 0.0 }
 0x2e7   :  { %v1134_v62 = vpop.f32.mrf.mxu0 }
 0x2e8   :  { %v1233_v63 = vadd.f32 %v1232_v58, %v1231_v29  ;;  %v1238_v0 = vadd.f32 %v1237_v59, %v1218_v60  ;;  %v2735_v33 = vadd.f32 %v2681_v25, %v1134_v62  ;;  %v1189_v7 = vmax.f32 %v2729_v61, 0.0 }
 0x2e9   :  { %v2133_v2 = vpop.f32.mrf.mxu0 }
 0x2ea   :  { %v1234_v3 = vrot.slane %v1233_v63, 1  ;;  %v1239_v4 = vrot.slane %v1238_v0, 4  ;;  %v1187_v6 = vmax.f32 %v2735_v33, 0.0  ;;  %v1222_v17 = vsel %vm1202_vm4, %v1189_v7, 0.0 }
 0x2eb   :  { %v1147_v8 = vpop.f32.mrf.mxu0  ;;  %v2767_v24 = vadd.f32 %v2133_v2, %v2681_v25 }
 0x2ec   :  { %v1235_v9 = vadd.f32 %v1234_v3, %v1233_v63  ;;  %v1240_v10 = vadd.f32 %v1239_v4, %v1238_v0  ;;  %v1245_v12 = vadd.f32 %v1187_v6, %v1186_v5  ;;  %v2754_v19 = vadd.f32 %v2681_v25, %v1147_v8 }
 0x2ed   :  { %v2134_v13 = vpop.f32.mrf.mxu0 }
 0x2ee   :  { %v2745_v14 = vmul.f32 0.03846154, %v1235_v9  ;;  %v1241_v15 = vrot.slane %v1240_v10, 2  ;;  %v1246_v16 = vadd.f32 %v1245_v12, %v1188_v11  ;;  %v2757_v21 = vadd.f32 %v2134_v13, %v2681_v25 }
 0x2ef   :  { %v1150_v27 = vpop.f32.mrf.mxu0 }
 0x2f0   :  { %v1267_v34 = vsub.f32 %v1178_v22, %v2745_v14  ;;  %v1268_v35 = vsub.f32 %v1179_v40, %v2745_v14  ;;  %v1269_v36 = vsub.f32 %v1180_v18, %v2745_v14  ;;  %v1270_v37 = vsub.f32 %v1181_v42, %v2745_v14 }
 0x2f1   :  { %v1242_v20 = vadd.f32 %v1241_v15, %v1240_v10  ;;  %v1247_v28 = vadd.f32 %v1246_v16, %v1222_v17  ;;  %v2764_v43 = vadd.f32 %v2681_v25, %v1150_v27  ;;  %v1190_v40 = vmax.f32 %v2754_v19, 0.0 }
 0x2f2   :  { %v1299_v45 = vmul.f32 %v1267_v34, %v1267_v34  ;;  %v1300_v46 = vmul.f32 %v1268_v35, %v1268_v35  ;;  %v1286_v31 = vsel %vm1202_vm4, %v1270_v37, 0.0  ;;  %v1301_v18 = vmul.f32 %v1269_v36, %v1269_v36 }
 0x2f3   :  { %v1243_v22 = vrot.slane %v1242_v20, 1  ;;  %v1248_v44 = vrot.slane %v1247_v28, 4  ;;  %v1193_v42 = vmax.f32 %v2757_v21, 0.0  ;;  %v1191_v50 = vmax.f32 %v2764_v43, 0.0 }
 0x2f4   :  { %v1315_v41 = vadd.f32 %v1300_v46, %v1299_v45  ;;  %v1302_v29 = vmul.f32 %v1286_v31, %v1286_v31  ;;  %v1192_v25 = vmax.f32 %v2767_v24, 0.0  ;;  %v1415_v61 = vpack.c.bf16 %v2745_v14, %v2745_v14 }
 0x2f5   :  { %v1244_v51 = vadd.f32 %v1243_v22, %v1242_v20  ;;  %v1249_v55 = vadd.f32 %v1248_v44, %v1247_v28  ;;  %v1254_v30 = vadd.f32 %v1191_v50, %v1190_v40  ;;  %v1226_v62 = vsel %vm1202_vm4, %v1193_v42, 0.0 }
 0x2f6   :  { %v1316_v57 = vadd.f32 %v1315_v41, %v1301_v18 }
 0x2f7   :  { %v1264_v58 = vmul.f32 0.03846154, %v1244_v51  ;;  %v1250_v59 = vrot.slane %v1249_v55, 2  ;;  %v1255_v63 = vadd.f32 %v1254_v30, %v1192_v25 }
 0x2f8   :  { %v1317_v60 = vadd.f32 %v1316_v57, %v1302_v29 }
 0x2f9   :  { %v1271_v0 = vsub.f32 %v1182_v52, %v1264_v58  ;;  %v1272_v2 = vsub.f32 %v1183_v53, %v1264_v58  ;;  %v1273_v3 = vsub.f32 %v1184_v56, %v1264_v58  ;;  %v1274_v4 = vsub.f32 %v1185_v54, %v1264_v58 }
 0x2fa   :  { %v1318_v8 = vrot.slane %v1317_v60, 4  ;;  %v1251_v9 = vadd.f32 %v1250_v59, %v1249_v55  ;;  %v1256_v10 = vadd.f32 %v1255_v63, %v1226_v62  ;;  %v1416_v26 = vpack.c.bf16 %v1264_v58, %v1264_v58 }
 0x2fb   :  { %v1303_v12 = vmul.f32 %v1271_v0, %v1271_v0  ;;  %v1304_v13 = vmul.f32 %v1272_v2, %v1272_v2  ;;  %v1290_v15 = vsel %vm1202_vm4, %v1274_v4, 0.0  ;;  %v1305_v52 = vmul.f32 %v1273_v3, %v1273_v3 }
 0x2fc   :  { %v1252_v16 = vrot.slane %v1251_v9, 1  ;;  %v1257_v38 = vrot.slane %v1256_v10, 4  ;;  %v1319_v49 = vadd.f32 %v1318_v8, %v1317_v60  ;;  %v1306_v48 = vmul.f32 %v1290_v15, %v1290_v15 }
 0x2fd   :  { %v1324_v17 = vadd.f32 %v1304_v13, %v1303_v12  ;;  %v1532_v59 = vunpack.c.l.b16 %v1416_v26  ;;  %v1531_v4 = vunpack.c.l.b16 %v1415_v61 }
 0x2fe   :  { %v1253_v53 = vadd.f32 %v1252_v16, %v1251_v9  ;;  %v1258_v27 = vadd.f32 %v1257_v38, %v1256_v10  ;;  %v1320_v35 = vrot.slane %v1319_v49, 2 }
 0x2ff   :  { %v1325_v56 = vadd.f32 %v1324_v17, %v1305_v52 }
 0x300   :  { %v1265_v34 = vmul.f32 0.03846154, %v1253_v53  ;;  %v1259_v47 = vrot.slane %v1258_v27, 2 }
 0x301   :  { %v1326_v54 = vadd.f32 %v1325_v56, %v1306_v48 }
 0x302   :  { %v1275_v36 = vsub.f32 %v1186_v5, %v1265_v34  ;;  %v1276_v37 = vsub.f32 %v1187_v6, %v1265_v34  ;;  %v1277_v20 = vsub.f32 %v1188_v11, %v1265_v34  ;;  %v1278_v45 = vsub.f32 %v1189_v7, %v1265_v34 }
 0x303   :  { %v1327_v28 = vrot.slane %v1326_v54, 4  ;;  %v1260_v46 = vadd.f32 %v1259_v47, %v1258_v27  ;;  %v1321_v5 = vadd.f32 %v1320_v35, %v1319_v49  ;;  %v1417_v6 = vpack.c.bf16 %v1265_v34, %v1265_v34 }
 0x304   :  { %v1307_v24 = vmul.f32 %v1275_v36, %v1275_v36  ;;  %v1308_v31 = vmul.f32 %v1276_v37, %v1276_v37  ;;  %v1294_v44 = vsel %vm1202_vm4, %v1278_v45, 0.0  ;;  %v1309_v41 = vmul.f32 %v1277_v20, %v1277_v20 }
 0x305   :  { %v1328_v22 = vadd.f32 %v1327_v28, %v1326_v54  ;;  %v1261_v18 = vrot.slane %v1260_v46, 1  ;;  %v1310_v11 = vmul.f32 %v1294_v44, %v1294_v44  ;;  %v1322_v57 = vrot.slane %v1321_v5, 1 }
 0x306   :  { %v1333_v33 = vadd.f32 %v1308_v31, %v1307_v24  ;;  %v1533_v60 = vunpack.c.l.b16 %v1417_v6 }
 0x307   :  { %v1329_v51 = vrot.slane %v1328_v22, 2  ;;  %v1262_v32 = vadd.f32 %v1261_v18, %v1260_v46  ;;  %v1323_v43 = vadd.f32 %v1322_v57, %v1321_v5 }
 0x308   :  { %v1334_v55 = vadd.f32 %v1333_v33, %v1309_v41 }
 0x309   :  { %v1330_v7 = vadd.f32 %v1329_v51, %v1328_v22  ;;  %v1266_v29 = vmul.f32 0.03846154, %v1262_v32  ;;  %v1351_v53 = vmul.f32 0.04, %v1323_v43  ;;  %v2276_v43 = vld [vmem:[#allocation11] sm:$0xff]  }
 0x30a   :  { %v1335_v30 = vadd.f32 %v1334_v55, %v1310_v11 }
 0x30b   :  { %v1331_v58 = vrot.slane %v1330_v7, 1  ;;  %v1279_v62 = vsub.f32 %v1190_v40, %v1266_v29  ;;  %v1280_v63 = vsub.f32 %v1191_v50, %v1266_v29  ;;  %v1281_v0 = vsub.f32 %v1192_v25, %v1266_v29 }
 0x30c   :  { %v1336_v2 = vrot.slane %v1335_v30, 4  ;;  %v1282_v14 = vsub.f32 %v1193_v42, %v1266_v29  ;;  %v1418_v3 = vpack.c.bf16 %v1266_v29, %v1266_v29  ;;  %v1535_v40 = vsel %vm1431_vm5, %v1532_v59, %v1531_v4 }
 0x30d   :  { %v1332_v8 = vadd.f32 %v1331_v58, %v1330_v7  ;;  %v1311_v9 = vmul.f32 %v1279_v62, %v1279_v62  ;;  %v1312_v10 = vmul.f32 %v1280_v63, %v1280_v63  ;;  %v1313_v50 = vmul.f32 %v1281_v0, %v1281_v0 }
 0x30e   :  { %v1337_v12 = vadd.f32 %v1336_v2, %v1335_v30  ;;  %v1298_v13 = vsel %vm1202_vm4, %v1282_v14, 0.0  ;;  %v1534_v19 = vunpack.c.l.b16 %v1418_v3  ;;  %v1536_v15 = vsel %vm1433_vm6, %v1533_v60, %v1535_v40  ;;  %v2275_v40 = vld [vmem:[#allocation11 + $0x8] sm:$0xff]  }
 0x30f   :  { %v1342_v25 = vadd.f32 %v1312_v10, %v1311_v9  ;;  %v1352_v16 = vmul.f32 0.04, %v1332_v8  ;;  %v1314_v38 = vmul.f32 %v1298_v13, %v1298_v13  ;;  %vm1357_vm10 = vcmp.eq.f32.partialorder %v1351_v53, inf  ;;  %v2269_v8 = vld [vmem:[#allocation11 + $0x38] sm:$0xff]   ;;  %v2270_v9 = vld [vmem:[#allocation11 + $0x30] sm:$0xff]   ;;  %v2271_v10 = vld [vmem:[#allocation11 + $0x28] sm:$0xff]  }
 0x310   :  { %v1338_v21 = vrot.slane %v1337_v12, 2  ;;  %v1537_v42 = vsel %vm1435_vm7, %v1534_v19, %v1536_v15  ;;  %v1360_v33 = vand.u32 2147483648, %v1351_v53  ;;  %vm1359_vm13 = vcmp.eq.f32.partialorder %v1351_v53, 0.0  ;;  %v2273_v13 = vld [vmem:[#allocation11 + $0x18] sm:$0xff]   ;;  %v2274_v19 = vld [vmem:[#allocation11 + $0x10] sm:$0xff]  }
 0x311   :  { %v1343_v52 = vadd.f32 %v1342_v25, %v1313_v50  ;;  %v1538_v17 = vpack.c.b16 %v1537_v42, %v1537_v42  ;;  %2277 = vrsqrt.f32 %v1352_v16  ;;  %vm1364_vm8 = vcmp.eq.f32.partialorder %v1352_v16, inf }
 0x312   :  { %v1339_v49 = vadd.f32 %v1338_v21, %v1337_v12  ;;  %2279 = vrsqrt.f32 %v1351_v53  ;;  %v1367_v18 = vand.u32 2147483648, %v1352_v16  ;;  %vm1366_vm11 = vcmp.eq.f32.partialorder %v1352_v16, 0.0  ;;  %v2272_v12 = vld [vmem:[#allocation11 + $0x20] sm:$0xff]  }
 0x313   :  { %v1344_v27 = vadd.f32 %v1343_v52, %v1314_v38  ;;  %2172 = vmatmul.mubr.bf16.vlgmr.msra.gmra.mxu0 %v1538_v17 }
 0x314   :  { %v1340_v39 = vrot.slane %v1339_v49, 1 }
 0x315   :  { %v1345_v48 = vrot.slane %v1344_v27, 4 }
 0x316   :  { %v1341_v56 = vadd.f32 %v1340_v39, %v1339_v49  ;;  %v2446_v39 = vmov 1966171168  }
 0x317   :  { %v1346_v34 = vadd.f32 %v1345_v48, %v1344_v27 }
 0x318   :  { %v1353_v47 = vmul.f32 0.04, %v1341_v56  ;;  %v1872_v56 = vld [vmem:[%s2848_s10] ss:$0 sm:$0xff] }
 0x319   :  { %v1347_v54 = vrot.slane %v1346_v34, 2 }
 0x31a   :  { %2281 = vrsqrt.f32 %v1353_v47  ;;  %vm1371_vm9 = vcmp.eq.f32.partialorder %v1353_v47, inf  ;;  %v1374_v41 = vand.u32 2147483648, %v1353_v47  ;;  %vm1373_vm12 = vcmp.eq.f32.partialorder %v1353_v47, 0.0 }
 0x31b   :  { %v1348_v35 = vadd.f32 %v1347_v54, %v1346_v34 }
 0x31d   :  { %v1349_v36 = vrot.slane %v1348_v35, 1 }
 0x31e   :  { %v2278_v28 = vpop.eup %2277 }
 0x31f   :  { %v1350_v37 = vadd.f32 %v1349_v36, %v1348_v35  ;;  %v2280_v45 = vpop.eup %2279  ;;  %v1363_v46 = vmul.f32 %v2278_v28, %v1352_v16 }
 0x320   :  { %v1356_v31 = vmul.f32 %v2280_v45, %v1351_v53 }
 0x321   :  { %v1354_v20 = vmul.f32 0.04, %v1350_v37  ;;  %v1365_v44 = vsel %vm1364_vm8, %v1352_v16, %v1363_v46  ;;  %v1871_v16 = vld [vmem:[%s2846_s8] ss:$0 sm:$0xff]  ;;  %s2447_s8 = smov [#allocation13]  }
 0x322   :  { %v1358_v5 = vsel %vm1357_vm10, %v1351_v53, %v1356_v31  ;;  %v1368_v6 = vsel %vm1366_vm11, %v1367_v18, %v1365_v44  ;;  %s1786_s12 = sshll.u32 %s2447_s8, 4  ;;  %s1787_s12 = int_to_ptr.vmem [resolvable:$true] %s1786_s12 }
 0x323   :  { %2283 = vrsqrt.f32 %v1354_v20  ;;  %v1361_v32 = vsel %vm1359_vm13, %v1360_v33, %v1358_v5  ;;  %v1420_v11 = vpack.c.bf16 %v1368_v6, %v1368_v6  ;;  %vm1378_vm14 = vcmp.eq.f32.partialorder %v1354_v20, inf  ;;  %s2405_s10 = scalar_lea.vmem %s1787_s12, 64  ;;  %p2410_p3 = scmp.lt.s32.totalorder %s1787_s12, %s1787_s12 }
 0x324   :  { %v1419_v29 = vpack.c.bf16 %v1361_v32, %v1361_v32  ;;  %v1381_v57 = vand.u32 2147483648, %v1354_v20  ;;  %vm1380_vm15 = vcmp.eq.f32.partialorder %v1354_v20, 0.0  ;;  %p2406_p2 = scmp.ne.s32.totalorder %s1787_s12, %s2405_s10  ;;  %p2411_p4 = scmp.lt.s32.totalorder %s2405_s10, %s2405_s10 }
 0x325   :  { %v1428_v59 = vunpack.c.l.b16 %v1420_v11 }
 0x326   :  { %v1427_v63 = vunpack.c.l.b16 %v1419_v29  ;;  %p2412_p5 = por %p2411_p4, %p2410_p3 }
 0x327   :  { %v2282_v24 = vpop.eup %2281 }
 0x328   :  { %v1370_v22 = vmul.f32 %v2282_v24, %v1353_v47  ;;  %v1432_v2 = vsel %vm1431_vm5, %v1428_v59, %v1427_v63  ;;  %p2413_p6 = pnand %p2412_p5, %p2406_p2 }
 0x32a   :  { %v1372_v26 = vsel %vm1371_vm9, %v1353_v47, %v1370_v22 }
 0x32b   :  { %v1375_v51 = vsel %vm1373_vm12, %v1374_v41, %v1372_v26 }
 0x32c   :  { %v1421_v61 = vpack.c.bf16 %v1375_v51, %v1375_v51 }
 0x32e   :  { %v1429_v58 = vunpack.c.l.b16 %v1421_v61 }
 0x330   :  { %v2284_v55 = vpop.eup %2283  ;;  %v1434_v14 = vsel %vm1433_vm6, %v1429_v58, %v1432_v2 }
 0x331   :  { %v1377_v7 = vmul.f32 %v2284_v55, %v1354_v20 }
 0x333   :  { %v1379_v30 = vsel %vm1378_vm14, %v1354_v20, %v1377_v7 }
 0x334   :  { %v1382_v60 = vsel %vm1380_vm15, %v1381_v57, %v1379_v30 }
 0x335   :  { %v1422_v62 = vpack.c.bf16 %v1382_v60, %v1382_v60 }
 0x337   :  { %v1430_v0 = vunpack.c.l.b16 %v1422_v62 }
 0x339   :  { %v1436_v3 = vsel %vm1435_vm7, %v1430_v0, %v1434_v14 }
 0x33a   :  { %v1437_v4 = vpack.c.b16 %v1436_v3, %v1436_v3 }
 0x33c   :  { %2152 = vmatmul.mubr.bf16.vlgmr.msra.gmra.mxu1 %v1437_v4 }
 0x33d   :  { %2191 = vmatprep.mubr.msk.bf16.mxu1 %vm2445_vm3, %v2444_v1  ;;  %2176 = vmatpush3.bf16.msra.mxu1 %v2269_v8 }
 0x33e   :  { %2177 = vmatprep.subr.bf16.mxu1 %v2444_v1 }
 0x341   :  { %2178 = vmatpush3.bf16.msra.mxu1 %v2270_v9 }
 0x342   :  { %2179 = vmatprep.subr.bf16.mxu1 %v2444_v1 }
 0x345   :  { %2180 = vmatpush3.bf16.msra.mxu1 %v2271_v10 }
 0x346   :  { %2181 = vmatprep.subr.bf16.mxu1 %v2444_v1 }
 0x349   :  { %2182 = vmatpush3.bf16.msra.mxu1 %v2272_v12 }
 0x34a   :  { %2183 = vmatprep.subr.bf16.mxu1 %v2444_v1 }
 0x34d   :  { %2184 = vmatpush3.bf16.msra.mxu1 %v2273_v13 }
 0x34e   :  { %2185 = vmatprep.subr.bf16.mxu1 %v2444_v1 }
 0x351   :  { %2186 = vmatpush3.bf16.msra.mxu1 %v2274_v19 }
 0x352   :  { %2187 = vmatprep.subr.bf16.mxu1 %v2444_v1 }
 0x355   :  { %2188 = vmatpush3.bf16.msra.mxu1 %v2275_v40 }
 0x356   :  { %2189 = vmatprep.subr.bf16.mxu1 %v2444_v1  ;;  %v1750_v1 = vunpack.c.l.s4 %v2446_v39 }
 0x358   :  { %v1751_v48 = vunpack.c.0.s8 %v1750_v1 }
 0x359   :  { %2190 = vmatpush3.bf16.msra.mxu1 %v2276_v43 }
 0x35a   :  { %v1754_v34 = vsub.s32 %v1751_v48, %v2676_v23 }
 0x3d3   :  { %v1622_v50 = vpop.f32.mrf.mxu0 }
 0x3d5   :  { %v2173_v25 = vpop.f32.mrf.mxu0 }
 0x3d7   :  { %v1625_v15 = vpop.f32.mrf.mxu0 }
 0x3d9   :  { %v2174_v21 = vpop.f32.mrf.mxu0 }
 0x3fc   :  { %v1521_v42 = vpop.f32.mrf.mxu1 }
 0x3fd   :  { %v1623_v38 = vadd.f32 %v1622_v50, %v1521_v42 }
 0x3fe   :  { %v2153_v52 = vpop.f32.mrf.mxu1 }
 0x3ff   :  { %v1635_v17 = vadd.f32 %v1871_v16, %v1623_v38 }
 0x400   :  { %v1524_v49 = vpop.f32.mrf.mxu1 }
 0x401   :  { %v1636_v53 = vpack.c.bf16 %v1635_v17, %v1635_v17 }
 0x402   :  { %v2154_v27 = vpop.f32.mrf.mxu1 }
 0x403   :  { %2192 = vmatmul.mubr.bf16.vlgmr.msra.gmra.mxu1 %v1636_v53 }
 0x4c3   :  { %v1742_v47 = vpop.f32.mrf.mxu1 }
 0x4c4   :  { %v1743_v54 = vadd.f32 %v1872_v56, %v1742_v47 }
 0x4c5   :  { %v2193_v35 = vpop.f32.mrf.mxu1 }
 0x4c6   :  { %v1755_v36 = vrot.slane %v1743_v54, %v1754_v34 }
 0x4c7   :  { %v1745_v37 = vpop.f32.mrf.mxu1 }
 0x4c8   :  { %v1756_v20 = vcombine.high %v1755_v36, %v1755_v36  ;;  %v1763_v28 = vrot.slane %v1755_v36, %v1754_v34  ;;  %1881 = vst.sshfl [vmem:[#allocation13] sm:$0x1 pattern:$0x73625140] %v1755_v36 }
 0x4c9   :  { %v2194_v45 = vpop.f32.mrf.mxu1 }
 0x4ca   :  { %v1770_v46 = vrot.slane %v1756_v20, %v1754_v34  ;;  %v1771_v24 = vcombine.high %v1763_v28, %v1763_v28  ;;  %1882 = vst.sshfl [vmem:[#allocation13 + $0x1] sm:$0x1 pattern:$0x73625140] %v1756_v20 }
 0x4cc   :  { %v1772_v31 = vcombine.high %v1770_v46, %v1770_v46  ;;  %1779 = vst [vmem:[#allocation13 + $0x2] sm:$0x1] %v1771_v24 }
 0x4ce   :  { %1780 = vst [vmem:[#allocation13 + $0x3] sm:$0x1] %v1772_v31 }
 0x4cf   :  { %2416 = shalt.err (!%p2413_p6)
}
 0x4d0   :  { %s2448_s13 = smov 16   ;;  %s2449_s1 = smov 1  }
 0x4d1   :  { %1792 = dma.vmem_to_hbm [thread:$0]  %s1787_s12, 64, %s2849_s11, [#allocation4], %s2448_s13, %s2448_s13, %s2449_s1  }
 0x4d2   :  { %2433 = dma.done.wait [#allocation4], 64  }
 0x4d3   :  { %2434 = vsyncadd [#allocation4], 4294967232 }
 0x4d4   :  { %1796 = vsyncpa [#allocation3], 1 }
 0x4d5   :  { %1797 = vsyncpa [#allocation6], 1 }
 0x4d6   :  { %1798 = vsyncpa [#allocation9], 1 }
 0x4d7   :  { %1799 = vsyncpa [#allocation12], 1 }
 0x4d8   :  { %1800 = vsyncpa [#allocation4], 1 }

</bundles_post_ra>
